<compile_context>
chip_gen: v7x
topology: tpu7x:2x2x1
jax: 0.10.0
libtpu: 0.0.40
codegen_flags: <defaults>
</compile_context>

<pallas_src>
import functools

import jax
import jax.numpy as jnp
from jax import lax
from jax.experimental import pallas as pl
from jax.experimental.pallas import tpu as pltpu


def _decoder_kernel(*refs, H, W, KH, KW, c_in0, margin, norms):
    """Fused conv+norm stack.

    refs layout:
      refs[0]                      : x        (c_in0, H*W)          VMEM in
      refs[1 : 1+2L]               : (w, b) per layer,
                                     w: (Cout_l, KH*KW*Cmax), b: (Cout_l, 1)
      refs[1+2L]                   : out      (Cout_last, H*W)      VMEM out
      refs[2+2L]                   : act      (Cmax, 2*margin+H*W)  scratch
      refs[3+2L]                   : slab     (KH*KW*Cmax, H*W)     scratch
    """
    n_layers = len(norms)
    x_ref = refs[0]
    wb_refs = refs[1:1 + 2 * n_layers]
    o_ref = refs[1 + 2 * n_layers]
    act_ref = refs[2 + 2 * n_layers]
    slab_ref = refs[3 + 2 * n_layers]

    HW = H * W
    pad = KH // 2
    cmax = act_ref.shape[0]

    # Zero the padded activation buffer once; the margins (and unused channel
    # rows) stay zero for the whole kernel, providing the conv zero-padding.
    act_ref[...] = jnp.zeros_like(act_ref)
    act_ref[0:c_in0, margin:margin + HW] = x_ref[...]

    # Static per-pixel column index (lane axis) for the W-boundary masks.
    col = lax.broadcasted_iota(jnp.int32, (1, HW), 1) % W

    for l in range(n_layers):
        w_ref = wb_refs[2 * l]
        b_ref = wb_refs[2 * l + 1]
        cout = w_ref.shape[0]

        # --- im2col: stage all KH*KW shifted windows into one VMEM slab ----
        for dh in range(KH):
            for dw in range(KW):
                oh, ow = dh - pad, dw - pad
                start = margin + oh * W + ow            # static lane offset
                window = act_ref[:, start:start + HW]   # (cmax, HW)
                if ow != 0:
                    # Mask pixels whose source column wrapped across a row
                    # boundary (row over/underflow already reads zero margin).
                    valid = (col + ow >= 0) & (col + ow < W)
                    window = jnp.where(valid, window, 0.0)
                tap = dh * KW + dw
                slab_ref[tap * cmax:(tap + 1) * cmax, :] = window

        # --- one big-K matmul on the MXU: (Cout, K) @ (K, HW) --------------
        acc = jnp.dot(w_ref[...], slab_ref[...],
                      preferred_element_type=jnp.float32)   # (cout, HW)
        acc = acc + b_ref[...]                               # (cout, 1) bcast

        # --- per-channel normalization (lane-axis reduce, lane-dense) ------
        if norms[l]:
            mean = jnp.sum(acc, axis=1, keepdims=True) * (1.0 / HW)
            centered = acc - mean
            var = jnp.sum(centered * centered, axis=1,
                          keepdims=True) * (1.0 / (HW - 1))  # unbiased
            inv_std = 1.0 / (jnp.sqrt(var) + 1e-7)           # tiny (cout, 1)
            acc = centered * inv_std

        if l == n_layers - 1:
            o_ref[...] = acc                                  # (Cout_last, HW)
        else:
            act_ref[0:cout, margin:margin + HW] = acc         # next layer input


def pack_params(params, cmax):
    """(Cout, Cin, KH, KW) torch-style weights -> (Cout, KH*KW*Cmax), Cin zero-padded."""
    packed = []
    for w, b in params:
        cout, cin, kh, kw = w.shape
        wt = jnp.transpose(w, (0, 2, 3, 1))                        # (Cout, KH, KW, Cin)
        wt = jnp.pad(wt, ((0, 0), (0, 0), (0, 0), (0, cmax - cin)))
        packed.append((wt.reshape(cout, kh * kw * cmax), b.reshape(cout, 1)))
    return packed


def basic_decoder2_forward(x_nchw, params, kernel_size, last_norm):
    """x_nchw: (1, 3, H, W) f32 -> (1, data_depth, H, W) f32."""
    assert x_nchw.shape[0] == 1, "normLayer requires batch == 1"
    _, c0, H, W = x_nchw.shape
    HW = H * W
    KH = KW = kernel_size
    pad = kernel_size // 2
    n_layers = len(params)

    couts = [w.shape[0] for w, _ in params]
    cins = [c0] + couts[:-1]
    norms = tuple([True] * (n_layers - 1) + [bool(last_norm)])

    cmax = max(cins)
    cmax = ((cmax + 7) // 8) * 8                       # sublane-aligned channel slots
    margin = ((pad * W + pad + 127) // 128) * 128      # lane-aligned zero halo

    packed = pack_params(params, cmax)
    x2d = x_nchw[0].reshape(c0, HW)                    # free C-contiguous reshape

    inputs = [x2d]
    for w2, b2 in packed:
        inputs += [w2, b2]

    # Advisory cost estimate so XLA can schedule around the custom call.
    flops = 0
    transcendentals = 0
    bytes_accessed = x2d.size * 4 + couts[-1] * HW * 4
    for l in range(n_layers):
        flops += 2 * HW * (KH * KW * cins[l]) * couts[l]
        bytes_accessed += packed[l][0].size * 4 + packed[l][1].size * 4
        if norms[l]:
            flops += 6 * HW * couts[l]
            transcendentals += couts[l]

    kern = functools.partial(_decoder_kernel, H=H, W=W, KH=KH, KW=KW,
                             c_in0=c0, margin=margin, norms=norms)

    out2d = pl.pallas_call(
        kern,
        out_shape=jax.ShapeDtypeStruct((couts[-1], HW), jnp.float32),
        in_specs=[pl.BlockSpec(memory_space=pltpu.MemorySpace.VMEM)] * len(inputs),
        out_specs=pl.BlockSpec(memory_space=pltpu.MemorySpace.VMEM),
        scratch_shapes=[
            pltpu.VMEM((cmax, HW + 2 * margin), jnp.float32),   # padded activation
            pltpu.VMEM((KH * KW * cmax, HW), jnp.float32),      # im2col slab
        ],
        cost_estimate=pl.CostEstimate(flops=flops,
                                      transcendentals=transcendentals,
                                      bytes_accessed=bytes_accessed),
    )(*inputs)

    return out2d.reshape(couts[-1], H, W)[None]        # back to NCHW, free reshape


def init_params(key, data_depth, hidden_size, num_layers, kernel_size):
    """Deterministic synthetic parameters, torch Conv2d (OIHW) layout."""
    plan = [(3, hidden_size)]
    plan += [(hidden_size, hidden_size)] * (num_layers - 1)
    plan += [(hidden_size, data_depth)]
    params = []
    for cin, cout in plan:
        key, kw, kb = jax.random.split(key, 3)
        fan_in = cin * kernel_size * kernel_size
        scale = 1.0 / jnp.sqrt(jnp.float32(fan_in))
        w = jax.random.uniform(kw, (cout, cin, kernel_size, kernel_size),
                               jnp.float32, -scale, scale)
        b = jax.random.uniform(kb, (cout,), jnp.float32, -scale, scale)
        params.append((w, b))
    return params


def reference_forward(x_nchw, params, kernel_size, last_norm):
    """Pure-JAX reference (lax.conv) for correctness check."""
    x = x_nchw
    pad = kernel_size // 2
    n_layers = len(params)
    for i, (w, b) in enumerate(params):
        x = lax.conv_general_dilated(
            x, w, window_strides=(1, 1),
            padding=[(pad, pad), (pad, pad)],
            dimension_numbers=("NCHW", "OIHW", "NCHW"))
        x = x + b.reshape(1, -1, 1, 1)
        if (i < n_layers - 1) or last_norm:
            c = x.shape[1]
            flat = x.reshape(c, -1)
            mean = flat.mean(-1)
            var = jnp.sum((flat - mean[:, None]) ** 2, axis=-1) / (flat.shape[-1] - 1)
            std = jnp.sqrt(var)
            x = (x - mean.reshape(1, c, 1, 1)) / (std + 1e-7).reshape(1, c, 1, 1)
    return x


if __name__ == "__main__":
    # module config
    data_depth = 2
    hidden_size = 32
    num_layers = 3
    kernel_size = 3
    last_norm = True

    key = jax.random.PRNGKey(0)
    key, kx = jax.random.split(key)
    x = jax.random.normal(kx, (1, 3, 16, 16), jnp.float32)

    params = init_params(key, data_depth, hidden_size, num_layers, kernel_size)

    fwd = jax.jit(functools.partial(basic_decoder2_forward,
                                    kernel_size=kernel_size,
                                    last_norm=last_norm))
    out = jax.block_until_ready(fwd(x, params))
    assert out.shape == (1, data_depth, 16, 16), out.shape

    ref = jax.block_until_ready(reference_forward(x, params, kernel_size, last_norm))
    assert jnp.allclose(out, ref, rtol=1e-3, atol=1e-3), (
        float(jnp.max(jnp.abs(out - ref))))

    print("KERNEL_OK")
</pallas_src>

<mosaic_0001>
module attributes {stable_mosaic.version = 11 : i64} {
  func.func @_decoder_kernel(%arg0: memref<3x256xf32, #tpu.memory_space<vmem>>, %arg1: memref<32x288xf32, #tpu.memory_space<vmem>>, %arg2: memref<32x1xf32, #tpu.memory_space<vmem>>, %arg3: memref<32x288xf32, #tpu.memory_space<vmem>>, %arg4: memref<32x1xf32, #tpu.memory_space<vmem>>, %arg5: memref<32x288xf32, #tpu.memory_space<vmem>>, %arg6: memref<32x1xf32, #tpu.memory_space<vmem>>, %arg7: memref<2x288xf32, #tpu.memory_space<vmem>>, %arg8: memref<2x1xf32, #tpu.memory_space<vmem>>, %arg9: memref<2x256xf32, #tpu.memory_space<vmem>>, %arg10: memref<32x512xf32, #tpu.memory_space<vmem>>, %arg11: memref<288x256xf32, #tpu.memory_space<vmem>>) attributes {dimension_semantics = [], scalar_prefetch = 0 : i64, scratch_operands = 2 : i64, tpu.core_type = #tpu.core_type<tc>} {
    %cst = arith.constant 0.000000e+00 : f32
    %0 = vector.broadcast %cst : f32 to vector<32x512xf32>
    %c0 = arith.constant 0 : index
    %c0_0 = arith.constant 0 : index
    %1 = vector.load %arg10[%c0, %c0_0] : memref<32x512xf32, #tpu.memory_space<vmem>>, vector<32x512xf32>
    tpu.vector_store %arg10[%c0, %c0_0], %0 {strides = array<i32>} : memref<32x512xf32, #tpu.memory_space<vmem>>, vector<32x512xf32>,
    %c0_1 = arith.constant 0 : index
    %c0_2 = arith.constant 0 : index
    %2 = vector.load %arg0[%c0_1, %c0_2] : memref<3x256xf32, #tpu.memory_space<vmem>>, vector<3x256xf32>
    %c0_3 = arith.constant 0 : index
    %c128 = arith.constant 128 : index
    %3 = vector.load %arg10[%c0_3, %c128] : memref<32x512xf32, #tpu.memory_space<vmem>>, vector<3x256xf32>
    tpu.vector_store %arg10[%c0_3, %c128], %2 {strides = array<i32>} : memref<32x512xf32, #tpu.memory_space<vmem>>, vector<3x256xf32>,
    %4 = tpu.iota {dimensions = array<i32: 1>} : vector<1x256xi32>
    %c16_i32 = arith.constant 16 : i32
    %c0_i32 = arith.constant 0 : i32
    %5 = arith.cmpi eq, %c16_i32, %c0_i32 : i32
    %c1_i32 = arith.constant 1 : i32
    %6 = arith.select %5, %c1_i32, %c16_i32 : i32
    %7 = vector.broadcast %6 : i32 to vector<1x256xi32>
    %8 = arith.remsi %4, %7 : vector<1x256xi32>
    %c0_i32_4 = arith.constant 0 : i32
    %9 = vector.broadcast %c0_i32_4 : i32 to vector<1x256xi32>
    %10 = arith.cmpi ne, %8, %9 : vector<1x256xi32>
    %c0_i32_5 = arith.constant 0 : i32
    %11 = vector.broadcast %c0_i32_5 : i32 to vector<1x256xi32>
    %12 = arith.cmpi slt, %8, %11 : vector<1x256xi32>
    %c0_i32_6 = arith.constant 0 : i32
    %13 = arith.cmpi slt, %6, %c0_i32_6 : i32
    %14 = vector.broadcast %13 : i1 to vector<1x256xi1>
    %15 = vector.broadcast %14 : vector<1x256xi1> to vector<1x256xi1>
    %16 = arith.xori %12, %15 : vector<1x256xi1>
    %17 = arith.andi %16, %10 : vector<1x256xi1>
    %18 = vector.broadcast %6 : i32 to vector<1x256xi32>
    %19 = arith.addi %8, %18 : vector<1x256xi32>
    %20 = arith.select %17, %19, %8 : vector<1x256xi1>, vector<1x256xi32>
    %c0_7 = arith.constant 0 : index
    %c111 = arith.constant 111 : index
    %21 = vector.load %arg10[%c0_7, %c111] : memref<32x512xf32, #tpu.memory_space<vmem>>, vector<32x256xf32>
    %c-1_i32 = arith.constant -1 : i32
    %22 = vector.broadcast %c-1_i32 : i32 to vector<1x256xi32>
    %23 = arith.addi %20, %22 : vector<1x256xi32>
    %c0_i32_8 = arith.constant 0 : i32
    %24 = vector.broadcast %c0_i32_8 : i32 to vector<1x256xi32>
    %25 = arith.cmpi sge, %23, %24 : vector<1x256xi32>
    %c-1_i32_9 = arith.constant -1 : i32
    %26 = vector.broadcast %c-1_i32_9 : i32 to vector<1x256xi32>
    %27 = arith.addi %20, %26 : vector<1x256xi32>
    %c16_i32_10 = arith.constant 16 : i32
    %28 = vector.broadcast %c16_i32_10 : i32 to vector<1x256xi32>
    %29 = arith.cmpi slt, %27, %28 : vector<1x256xi32>
    %30 = arith.andi %25, %29 : vector<1x256xi1>
    %cst_11 = arith.constant 0.000000e+00 : f32
    %31 = vector.shape_cast %30 : vector<1x256xi1> to vector<1x256xi1>
    %32 = vector.broadcast %31 : vector<1x256xi1> to vector<32x256xi1>
    %33 = vector.broadcast %cst_11 : f32 to vector<32x256xf32>
    %34 = arith.select %32, %21, %33 : vector<32x256xi1>, vector<32x256xf32>
    %c0_12 = arith.constant 0 : index
    %c0_13 = arith.constant 0 : index
    %35 = vector.load %arg11[%c0_12, %c0_13] : memref<288x256xf32, #tpu.memory_space<vmem>>, vector<32x256xf32>
    tpu.vector_store %arg11[%c0_12, %c0_13], %34 {strides = array<i32>} : memref<288x256xf32, #tpu.memory_space<vmem>>, vector<32x256xf32>,
    %c0_14 = arith.constant 0 : index
    %c112 = arith.constant 112 : index
    %36 = vector.load %arg10[%c0_14, %c112] : memref<32x512xf32, #tpu.memory_space<vmem>>, vector<32x256xf32>
    %c32 = arith.constant 32 : index
    %c0_15 = arith.constant 0 : index
    %37 = vector.load %arg11[%c32, %c0_15] : memref<288x256xf32, #tpu.memory_space<vmem>>, vector<32x256xf32>
    tpu.vector_store %arg11[%c32, %c0_15], %36 {strides = array<i32>} : memref<288x256xf32, #tpu.memory_space<vmem>>, vector<32x256xf32>,
    %c0_16 = arith.constant 0 : index
    %c113 = arith.constant 113 : index
    %38 = vector.load %arg10[%c0_16, %c113] : memref<32x512xf32, #tpu.memory_space<vmem>>, vector<32x256xf32>
    %c1_i32_17 = arith.constant 1 : i32
    %39 = vector.broadcast %c1_i32_17 : i32 to vector<1x256xi32>
    %40 = arith.addi %20, %39 : vector<1x256xi32>
    %c0_i32_18 = arith.constant 0 : i32
    %41 = vector.broadcast %c0_i32_18 : i32 to vector<1x256xi32>
    %42 = arith.cmpi sge, %40, %41 : vector<1x256xi32>
    %c1_i32_19 = arith.constant 1 : i32
    %43 = vector.broadcast %c1_i32_19 : i32 to vector<1x256xi32>
    %44 = arith.addi %20, %43 : vector<1x256xi32>
    %c16_i32_20 = arith.constant 16 : i32
    %45 = vector.broadcast %c16_i32_20 : i32 to vector<1x256xi32>
    %46 = arith.cmpi slt, %44, %45 : vector<1x256xi32>
    %47 = arith.andi %42, %46 : vector<1x256xi1>
    %cst_21 = arith.constant 0.000000e+00 : f32
    %48 = vector.shape_cast %47 : vector<1x256xi1> to vector<1x256xi1>
    %49 = vector.broadcast %48 : vector<1x256xi1> to vector<32x256xi1>
    %50 = vector.broadcast %cst_21 : f32 to vector<32x256xf32>
    %51 = arith.select %49, %38, %50 : vector<32x256xi1>, vector<32x256xf32>
    %c64 = arith.constant 64 : index
    %c0_22 = arith.constant 0 : index
    %52 = vector.load %arg11[%c64, %c0_22] : memref<288x256xf32, #tpu.memory_space<vmem>>, vector<32x256xf32>
    tpu.vector_store %arg11[%c64, %c0_22], %51 {strides = array<i32>} : memref<288x256xf32, #tpu.memory_space<vmem>>, vector<32x256xf32>,
    %c0_23 = arith.constant 0 : index
    %c127 = arith.constant 127 : index
    %53 = vector.load %arg10[%c0_23, %c127] : memref<32x512xf32, #tpu.memory_space<vmem>>, vector<32x256xf32>
    %c-1_i32_24 = arith.constant -1 : i32
    %54 = vector.broadcast %c-1_i32_24 : i32 to vector<1x256xi32>
    %55 = arith.addi %20, %54 : vector<1x256xi32>
    %c0_i32_25 = arith.constant 0 : i32
    %56 = vector.broadcast %c0_i32_25 : i32 to vector<1x256xi32>
    %57 = arith.cmpi sge, %55, %56 : vector<1x256xi32>
    %c-1_i32_26 = arith.constant -1 : i32
    %58 = vector.broadcast %c-1_i32_26 : i32 to vector<1x256xi32>
    %59 = arith.addi %20, %58 : vector<1x256xi32>
    %c16_i32_27 = arith.constant 16 : i32
    %60 = vector.broadcast %c16_i32_27 : i32 to vector<1x256xi32>
    %61 = arith.cmpi slt, %59, %60 : vector<1x256xi32>
    %62 = arith.andi %57, %61 : vector<1x256xi1>
    %cst_28 = arith.constant 0.000000e+00 : f32
    %63 = vector.shape_cast %62 : vector<1x256xi1> to vector<1x256xi1>
    %64 = vector.broadcast %63 : vector<1x256xi1> to vector<32x256xi1>
    %65 = vector.broadcast %cst_28 : f32 to vector<32x256xf32>
    %66 = arith.select %64, %53, %65 : vector<32x256xi1>, vector<32x256xf32>
    %c96 = arith.constant 96 : index
    %c0_29 = arith.constant 0 : index
    %67 = vector.load %arg11[%c96, %c0_29] : memref<288x256xf32, #tpu.memory_space<vmem>>, vector<32x256xf32>
    tpu.vector_store %arg11[%c96, %c0_29], %66 {strides = array<i32>} : memref<288x256xf32, #tpu.memory_space<vmem>>, vector<32x256xf32>,
    %c0_30 = arith.constant 0 : index
    %c128_31 = arith.constant 128 : index
    %68 = vector.load %arg10[%c0_30, %c128_31] : memref<32x512xf32, #tpu.memory_space<vmem>>, vector<32x256xf32>
    %c128_32 = arith.constant 128 : index
    %c0_33 = arith.constant 0 : index
    %69 = vector.load %arg11[%c128_32, %c0_33] : memref<288x256xf32, #tpu.memory_space<vmem>>, vector<32x256xf32>
    tpu.vector_store %arg11[%c128_32, %c0_33], %68 {strides = array<i32>} : memref<288x256xf32, #tpu.memory_space<vmem>>, vector<32x256xf32>,
    %c0_34 = arith.constant 0 : index
    %c129 = arith.constant 129 : index
    %70 = vector.load %arg10[%c0_34, %c129] : memref<32x512xf32, #tpu.memory_space<vmem>>, vector<32x256xf32>
    %c1_i32_35 = arith.constant 1 : i32
    %71 = vector.broadcast %c1_i32_35 : i32 to vector<1x256xi32>
    %72 = arith.addi %20, %71 : vector<1x256xi32>
    %c0_i32_36 = arith.constant 0 : i32
    %73 = vector.broadcast %c0_i32_36 : i32 to vector<1x256xi32>
    %74 = arith.cmpi sge, %72, %73 : vector<1x256xi32>
    %c1_i32_37 = arith.constant 1 : i32
    %75 = vector.broadcast %c1_i32_37 : i32 to vector<1x256xi32>
    %76 = arith.addi %20, %75 : vector<1x256xi32>
    %c16_i32_38 = arith.constant 16 : i32
    %77 = vector.broadcast %c16_i32_38 : i32 to vector<1x256xi32>
    %78 = arith.cmpi slt, %76, %77 : vector<1x256xi32>
    %79 = arith.andi %74, %78 : vector<1x256xi1>
    %cst_39 = arith.constant 0.000000e+00 : f32
    %80 = vector.shape_cast %79 : vector<1x256xi1> to vector<1x256xi1>
    %81 = vector.broadcast %80 : vector<1x256xi1> to vector<32x256xi1>
    %82 = vector.broadcast %cst_39 : f32 to vector<32x256xf32>
    %83 = arith.select %81, %70, %82 : vector<32x256xi1>, vector<32x256xf32>
    %c160 = arith.constant 160 : index
    %c0_40 = arith.constant 0 : index
    %84 = vector.load %arg11[%c160, %c0_40] : memref<288x256xf32, #tpu.memory_space<vmem>>, vector<32x256xf32>
    tpu.vector_store %arg11[%c160, %c0_40], %83 {strides = array<i32>} : memref<288x256xf32, #tpu.memory_space<vmem>>, vector<32x256xf32>,
    %c0_41 = arith.constant 0 : index
    %c143 = arith.constant 143 : index
    %85 = vector.load %arg10[%c0_41, %c143] : memref<32x512xf32, #tpu.memory_space<vmem>>, vector<32x256xf32>
    %c-1_i32_42 = arith.constant -1 : i32
    %86 = vector.broadcast %c-1_i32_42 : i32 to vector<1x256xi32>
    %87 = arith.addi %20, %86 : vector<1x256xi32>
    %c0_i32_43 = arith.constant 0 : i32
    %88 = vector.broadcast %c0_i32_43 : i32 to vector<1x256xi32>
    %89 = arith.cmpi sge, %87, %88 : vector<1x256xi32>
    %c-1_i32_44 = arith.constant -1 : i32
    %90 = vector.broadcast %c-1_i32_44 : i32 to vector<1x256xi32>
    %91 = arith.addi %20, %90 : vector<1x256xi32>
    %c16_i32_45 = arith.constant 16 : i32
    %92 = vector.broadcast %c16_i32_45 : i32 to vector<1x256xi32>
    %93 = arith.cmpi slt, %91, %92 : vector<1x256xi32>
    %94 = arith.andi %89, %93 : vector<1x256xi1>
    %cst_46 = arith.constant 0.000000e+00 : f32
    %95 = vector.shape_cast %94 : vector<1x256xi1> to vector<1x256xi1>
    %96 = vector.broadcast %95 : vector<1x256xi1> to vector<32x256xi1>
    %97 = vector.broadcast %cst_46 : f32 to vector<32x256xf32>
    %98 = arith.select %96, %85, %97 : vector<32x256xi1>, vector<32x256xf32>
    %c192 = arith.constant 192 : index
    %c0_47 = arith.constant 0 : index
    %99 = vector.load %arg11[%c192, %c0_47] : memref<288x256xf32, #tpu.memory_space<vmem>>, vector<32x256xf32>
    tpu.vector_store %arg11[%c192, %c0_47], %98 {strides = array<i32>} : memref<288x256xf32, #tpu.memory_space<vmem>>, vector<32x256xf32>,
    %c0_48 = arith.constant 0 : index
    %c144 = arith.constant 144 : index
    %100 = vector.load %arg10[%c0_48, %c144] : memref<32x512xf32, #tpu.memory_space<vmem>>, vector<32x256xf32>
    %c224 = arith.constant 224 : index
    %c0_49 = arith.constant 0 : index
    %101 = vector.load %arg11[%c224, %c0_49] : memref<288x256xf32, #tpu.memory_space<vmem>>, vector<32x256xf32>
    tpu.vector_store %arg11[%c224, %c0_49], %100 {strides = array<i32>} : memref<288x256xf32, #tpu.memory_space<vmem>>, vector<32x256xf32>,
    %c0_50 = arith.constant 0 : index
    %c145 = arith.constant 145 : index
    %102 = vector.load %arg10[%c0_50, %c145] : memref<32x512xf32, #tpu.memory_space<vmem>>, vector<32x256xf32>
    %c1_i32_51 = arith.constant 1 : i32
    %103 = vector.broadcast %c1_i32_51 : i32 to vector<1x256xi32>
    %104 = arith.addi %20, %103 : vector<1x256xi32>
    %c0_i32_52 = arith.constant 0 : i32
    %105 = vector.broadcast %c0_i32_52 : i32 to vector<1x256xi32>
    %106 = arith.cmpi sge, %104, %105 : vector<1x256xi32>
    %c1_i32_53 = arith.constant 1 : i32
    %107 = vector.broadcast %c1_i32_53 : i32 to vector<1x256xi32>
    %108 = arith.addi %20, %107 : vector<1x256xi32>
    %c16_i32_54 = arith.constant 16 : i32
    %109 = vector.broadcast %c16_i32_54 : i32 to vector<1x256xi32>
    %110 = arith.cmpi slt, %108, %109 : vector<1x256xi32>
    %111 = arith.andi %106, %110 : vector<1x256xi1>
    %cst_55 = arith.constant 0.000000e+00 : f32
    %112 = vector.shape_cast %111 : vector<1x256xi1> to vector<1x256xi1>
    %113 = vector.broadcast %112 : vector<1x256xi1> to vector<32x256xi1>
    %114 = vector.broadcast %cst_55 : f32 to vector<32x256xf32>
    %115 = arith.select %113, %102, %114 : vector<32x256xi1>, vector<32x256xf32>
    %c256 = arith.constant 256 : index
    %c0_56 = arith.constant 0 : index
    %116 = vector.load %arg11[%c256, %c0_56] : memref<288x256xf32, #tpu.memory_space<vmem>>, vector<32x256xf32>
    tpu.vector_store %arg11[%c256, %c0_56], %115 {strides = array<i32>} : memref<288x256xf32, #tpu.memory_space<vmem>>, vector<32x256xf32>,
    %c0_57 = arith.constant 0 : index
    %c0_58 = arith.constant 0 : index
    %117 = vector.load %arg1[%c0_57, %c0_58] : memref<32x288xf32, #tpu.memory_space<vmem>>, vector<32x288xf32>
    %c0_59 = arith.constant 0 : index
    %c0_60 = arith.constant 0 : index
    %118 = vector.load %arg11[%c0_59, %c0_60] : memref<288x256xf32, #tpu.memory_space<vmem>>, vector<288x256xf32>
    %cst_61 = arith.constant dense<0.000000e+00> : vector<32x256xf32>
    %119 = tpu.matmul %117, %118, %cst_61 {dimension_numbers = #tpu.dot_dimension_numbers<[1], [0], [0], [1], [0, 0, 1, 1], [], []>} : vector<32x288xf32>, vector<288x256xf32>, vector<32x256xf32> -> vector<32x256xf32>
    %c0_62 = arith.constant 0 : index
    %c0_63 = arith.constant 0 : index
    %120 = vector.load %arg2[%c0_62, %c0_63] : memref<32x1xf32, #tpu.memory_space<vmem>>, vector<32x1xf32>
    %121 = vector.broadcast %120 : vector<32x1xf32> to vector<32x256xf32>
    %122 = arith.addf %119, %121 : vector<32x256xf32>
    %cst_64 = arith.constant dense<0.000000e+00> : vector<32xf32>
    %123 = vector.multi_reduction <add>, %122, %cst_64 [1] : vector<32x256xf32> to vector<32xf32>
    %124 = vector.shape_cast %123 : vector<32xf32> to vector<32x1xf32>
    %cst_65 = arith.constant 3.906250e-03 : f32
    %125 = vector.broadcast %cst_65 : f32 to vector<32x1xf32>
    %126 = arith.mulf %124, %125 : vector<32x1xf32>
    %127 = vector.broadcast %126 : vector<32x1xf32> to vector<32x256xf32>
    %128 = arith.subf %122, %127 : vector<32x256xf32>
    %129 = arith.mulf %128, %128 : vector<32x256xf32>
    %cst_66 = arith.constant dense<0.000000e+00> : vector<32xf32>
    %130 = vector.multi_reduction <add>, %129, %cst_66 [1] : vector<32x256xf32> to vector<32xf32>
    %131 = vector.shape_cast %130 : vector<32xf32> to vector<32x1xf32>
    %cst_67 = arith.constant 0.00392156886 : f32
    %132 = vector.broadcast %cst_67 : f32 to vector<32x1xf32>
    %133 = arith.mulf %131, %132 : vector<32x1xf32>
    %134 = math.sqrt %133 : vector<32x1xf32>
    %cst_68 = arith.constant 1.000000e-07 : f32
    %135 = vector.broadcast %cst_68 : f32 to vector<32x1xf32>
    %136 = arith.addf %134, %135 : vector<32x1xf32>
    %cst_69 = arith.constant 1.000000e+00 : f32
    %137 = vector.broadcast %cst_69 : f32 to vector<32x1xf32>
    %138 = arith.divf %137, %136 : vector<32x1xf32>
    %139 = vector.broadcast %138 : vector<32x1xf32> to vector<32x256xf32>
    %140 = arith.mulf %128, %139 : vector<32x256xf32>
    %c0_70 = arith.constant 0 : index
    %c128_71 = arith.constant 128 : index
    %141 = vector.load %arg10[%c0_70, %c128_71] : memref<32x512xf32, #tpu.memory_space<vmem>>, vector<32x256xf32>
    tpu.vector_store %arg10[%c0_70, %c128_71], %140 {strides = array<i32>} : memref<32x512xf32, #tpu.memory_space<vmem>>, vector<32x256xf32>,
    %c0_72 = arith.constant 0 : index
    %c111_73 = arith.constant 111 : index
    %142 = vector.load %arg10[%c0_72, %c111_73] : memref<32x512xf32, #tpu.memory_space<vmem>>, vector<32x256xf32>
    %c-1_i32_74 = arith.constant -1 : i32
    %143 = vector.broadcast %c-1_i32_74 : i32 to vector<1x256xi32>
    %144 = arith.addi %20, %143 : vector<1x256xi32>
    %c0_i32_75 = arith.constant 0 : i32
    %145 = vector.broadcast %c0_i32_75 : i32 to vector<1x256xi32>
    %146 = arith.cmpi sge, %144, %145 : vector<1x256xi32>
    %c-1_i32_76 = arith.constant -1 : i32
    %147 = vector.broadcast %c-1_i32_76 : i32 to vector<1x256xi32>
    %148 = arith.addi %20, %147 : vector<1x256xi32>
    %c16_i32_77 = arith.constant 16 : i32
    %149 = vector.broadcast %c16_i32_77 : i32 to vector<1x256xi32>
    %150 = arith.cmpi slt, %148, %149 : vector<1x256xi32>
    %151 = arith.andi %146, %150 : vector<1x256xi1>
    %cst_78 = arith.constant 0.000000e+00 : f32
    %152 = vector.shape_cast %151 : vector<1x256xi1> to vector<1x256xi1>
    %153 = vector.broadcast %152 : vector<1x256xi1> to vector<32x256xi1>
    %154 = vector.broadcast %cst_78 : f32 to vector<32x256xf32>
    %155 = arith.select %153, %142, %154 : vector<32x256xi1>, vector<32x256xf32>
    %c0_79 = arith.constant 0 : index
    %c0_80 = arith.constant 0 : index
    %156 = vector.load %arg11[%c0_79, %c0_80] : memref<288x256xf32, #tpu.memory_space<vmem>>, vector<32x256xf32>
    tpu.vector_store %arg11[%c0_79, %c0_80], %155 {strides = array<i32>} : memref<288x256xf32, #tpu.memory_space<vmem>>, vector<32x256xf32>,
    %c0_81 = arith.constant 0 : index
    %c112_82 = arith.constant 112 : index
    %157 = vector.load %arg10[%c0_81, %c112_82] : memref<32x512xf32, #tpu.memory_space<vmem>>, vector<32x256xf32>
    %c32_83 = arith.constant 32 : index
    %c0_84 = arith.constant 0 : index
    %158 = vector.load %arg11[%c32_83, %c0_84] : memref<288x256xf32, #tpu.memory_space<vmem>>, vector<32x256xf32>
    tpu.vector_store %arg11[%c32_83, %c0_84], %157 {strides = array<i32>} : memref<288x256xf32, #tpu.memory_space<vmem>>, vector<32x256xf32>,
    %c0_85 = arith.constant 0 : index
    %c113_86 = arith.constant 113 : index
    %159 = vector.load %arg10[%c0_85, %c113_86] : memref<32x512xf32, #tpu.memory_space<vmem>>, vector<32x256xf32>
    %c1_i32_87 = arith.constant 1 : i32
    %160 = vector.broadcast %c1_i32_87 : i32 to vector<1x256xi32>
    %161 = arith.addi %20, %160 : vector<1x256xi32>
    %c0_i32_88 = arith.constant 0 : i32
    %162 = vector.broadcast %c0_i32_88 : i32 to vector<1x256xi32>
    %163 = arith.cmpi sge, %161, %162 : vector<1x256xi32>
    %c1_i32_89 = arith.constant 1 : i32
    %164 = vector.broadcast %c1_i32_89 : i32 to vector<1x256xi32>
    %165 = arith.addi %20, %164 : vector<1x256xi32>
    %c16_i32_90 = arith.constant 16 : i32
    %166 = vector.broadcast %c16_i32_90 : i32 to vector<1x256xi32>
    %167 = arith.cmpi slt, %165, %166 : vector<1x256xi32>
    %168 = arith.andi %163, %167 : vector<1x256xi1>
    %cst_91 = arith.constant 0.000000e+00 : f32
    %169 = vector.shape_cast %168 : vector<1x256xi1> to vector<1x256xi1>
    %170 = vector.broadcast %169 : vector<1x256xi1> to vector<32x256xi1>
    %171 = vector.broadcast %cst_91 : f32 to vector<32x256xf32>
    %172 = arith.select %170, %159, %171 : vector<32x256xi1>, vector<32x256xf32>
    %c64_92 = arith.constant 64 : index
    %c0_93 = arith.constant 0 : index
    %173 = vector.load %arg11[%c64_92, %c0_93] : memref<288x256xf32, #tpu.memory_space<vmem>>, vector<32x256xf32>
    tpu.vector_store %arg11[%c64_92, %c0_93], %172 {strides = array<i32>} : memref<288x256xf32, #tpu.memory_space<vmem>>, vector<32x256xf32>,
    %c0_94 = arith.constant 0 : index
    %c127_95 = arith.constant 127 : index
    %174 = vector.load %arg10[%c0_94, %c127_95] : memref<32x512xf32, #tpu.memory_space<vmem>>, vector<32x256xf32>
    %c-1_i32_96 = arith.constant -1 : i32
    %175 = vector.broadcast %c-1_i32_96 : i32 to vector<1x256xi32>
    %176 = arith.addi %20, %175 : vector<1x256xi32>
    %c0_i32_97 = arith.constant 0 : i32
    %177 = vector.broadcast %c0_i32_97 : i32 to vector<1x256xi32>
    %178 = arith.cmpi sge, %176, %177 : vector<1x256xi32>
    %c-1_i32_98 = arith.constant -1 : i32
    %179 = vector.broadcast %c-1_i32_98 : i32 to vector<1x256xi32>
    %180 = arith.addi %20, %179 : vector<1x256xi32>
    %c16_i32_99 = arith.constant 16 : i32
    %181 = vector.broadcast %c16_i32_99 : i32 to vector<1x256xi32>
    %182 = arith.cmpi slt, %180, %181 : vector<1x256xi32>
    %183 = arith.andi %178, %182 : vector<1x256xi1>
    %cst_100 = arith.constant 0.000000e+00 : f32
    %184 = vector.shape_cast %183 : vector<1x256xi1> to vector<1x256xi1>
    %185 = vector.broadcast %184 : vector<1x256xi1> to vector<32x256xi1>
    %186 = vector.broadcast %cst_100 : f32 to vector<32x256xf32>
    %187 = arith.select %185, %174, %186 : vector<32x256xi1>, vector<32x256xf32>
    %c96_101 = arith.constant 96 : index
    %c0_102 = arith.constant 0 : index
    %188 = vector.load %arg11[%c96_101, %c0_102] : memref<288x256xf32, #tpu.memory_space<vmem>>, vector<32x256xf32>
    tpu.vector_store %arg11[%c96_101, %c0_102], %187 {strides = array<i32>} : memref<288x256xf32, #tpu.memory_space<vmem>>, vector<32x256xf32>,
    %c0_103 = arith.constant 0 : index
    %c128_104 = arith.constant 128 : index
    %189 = vector.load %arg10[%c0_103, %c128_104] : memref<32x512xf32, #tpu.memory_space<vmem>>, vector<32x256xf32>
    %c128_105 = arith.constant 128 : index
    %c0_106 = arith.constant 0 : index
    %190 = vector.load %arg11[%c128_105, %c0_106] : memref<288x256xf32, #tpu.memory_space<vmem>>, vector<32x256xf32>
    tpu.vector_store %arg11[%c128_105, %c0_106], %189 {strides = array<i32>} : memref<288x256xf32, #tpu.memory_space<vmem>>, vector<32x256xf32>,
    %c0_107 = arith.constant 0 : index
    %c129_108 = arith.constant 129 : index
    %191 = vector.load %arg10[%c0_107, %c129_108] : memref<32x512xf32, #tpu.memory_space<vmem>>, vector<32x256xf32>
    %c1_i32_109 = arith.constant 1 : i32
    %192 = vector.broadcast %c1_i32_109 : i32 to vector<1x256xi32>
    %193 = arith.addi %20, %192 : vector<1x256xi32>
    %c0_i32_110 = arith.constant 0 : i32
    %194 = vector.broadcast %c0_i32_110 : i32 to vector<1x256xi32>
    %195 = arith.cmpi sge, %193, %194 : vector<1x256xi32>
    %c1_i32_111 = arith.constant 1 : i32
    %196 = vector.broadcast %c1_i32_111 : i32 to vector<1x256xi32>
    %197 = arith.addi %20, %196 : vector<1x256xi32>
    %c16_i32_112 = arith.constant 16 : i32
    %198 = vector.broadcast %c16_i32_112 : i32 to vector<1x256xi32>
    %199 = arith.cmpi slt, %197, %198 : vector<1x256xi32>
    %200 = arith.andi %195, %199 : vector<1x256xi1>
    %cst_113 = arith.constant 0.000000e+00 : f32
    %201 = vector.shape_cast %200 : vector<1x256xi1> to vector<1x256xi1>
    %202 = vector.broadcast %201 : vector<1x256xi1> to vector<32x256xi1>
    %203 = vector.broadcast %cst_113 : f32 to vector<32x256xf32>
    %204 = arith.select %202, %191, %203 : vector<32x256xi1>, vector<32x256xf32>
    %c160_114 = arith.constant 160 : index
    %c0_115 = arith.constant 0 : index
    %205 = vector.load %arg11[%c160_114, %c0_115] : memref<288x256xf32, #tpu.memory_space<vmem>>, vector<32x256xf32>
    tpu.vector_store %arg11[%c160_114, %c0_115], %204 {strides = array<i32>} : memref<288x256xf32, #tpu.memory_space<vmem>>, vector<32x256xf32>,
    %c0_116 = arith.constant 0 : index
    %c143_117 = arith.constant 143 : index
    %206 = vector.load %arg10[%c0_116, %c143_117] : memref<32x512xf32, #tpu.memory_space<vmem>>, vector<32x256xf32>
    %c-1_i32_118 = arith.constant -1 : i32
    %207 = vector.broadcast %c-1_i32_118 : i32 to vector<1x256xi32>
    %208 = arith.addi %20, %207 : vector<1x256xi32>
    %c0_i32_119 = arith.constant 0 : i32
    %209 = vector.broadcast %c0_i32_119 : i32 to vector<1x256xi32>
    %210 = arith.cmpi sge, %208, %209 : vector<1x256xi32>
    %c-1_i32_120 = arith.constant -1 : i32
    %211 = vector.broadcast %c-1_i32_120 : i32 to vector<1x256xi32>
    %212 = arith.addi %20, %211 : vector<1x256xi32>
    %c16_i32_121 = arith.constant 16 : i32
    %213 = vector.broadcast %c16_i32_121 : i32 to vector<1x256xi32>
    %214 = arith.cmpi slt, %212, %213 : vector<1x256xi32>
    %215 = arith.andi %210, %214 : vector<1x256xi1>
    %cst_122 = arith.constant 0.000000e+00 : f32
    %216 = vector.shape_cast %215 : vector<1x256xi1> to vector<1x256xi1>
    %217 = vector.broadcast %216 : vector<1x256xi1> to vector<32x256xi1>
    %218 = vector.broadcast %cst_122 : f32 to vector<32x256xf32>
    %219 = arith.select %217, %206, %218 : vector<32x256xi1>, vector<32x256xf32>
    %c192_123 = arith.constant 192 : index
    %c0_124 = arith.constant 0 : index
    %220 = vector.load %arg11[%c192_123, %c0_124] : memref<288x256xf32, #tpu.memory_space<vmem>>, vector<32x256xf32>
    tpu.vector_store %arg11[%c192_123, %c0_124], %219 {strides = array<i32>} : memref<288x256xf32, #tpu.memory_space<vmem>>, vector<32x256xf32>,
    %c0_125 = arith.constant 0 : index
    %c144_126 = arith.constant 144 : index
    %221 = vector.load %arg10[%c0_125, %c144_126] : memref<32x512xf32, #tpu.memory_space<vmem>>, vector<32x256xf32>
    %c224_127 = arith.constant 224 : index
    %c0_128 = arith.constant 0 : index
    %222 = vector.load %arg11[%c224_127, %c0_128] : memref<288x256xf32, #tpu.memory_space<vmem>>, vector<32x256xf32>
    tpu.vector_store %arg11[%c224_127, %c0_128], %221 {strides = array<i32>} : memref<288x256xf32, #tpu.memory_space<vmem>>, vector<32x256xf32>,
    %c0_129 = arith.constant 0 : index
    %c145_130 = arith.constant 145 : index
    %223 = vector.load %arg10[%c0_129, %c145_130] : memref<32x512xf32, #tpu.memory_space<vmem>>, vector<32x256xf32>
    %c1_i32_131 = arith.constant 1 : i32
    %224 = vector.broadcast %c1_i32_131 : i32 to vector<1x256xi32>
    %225 = arith.addi %20, %224 : vector<1x256xi32>
    %c0_i32_132 = arith.constant 0 : i32
    %226 = vector.broadcast %c0_i32_132 : i32 to vector<1x256xi32>
    %227 = arith.cmpi sge, %225, %226 : vector<1x256xi32>
    %c1_i32_133 = arith.constant 1 : i32
    %228 = vector.broadcast %c1_i32_133 : i32 to vector<1x256xi32>
    %229 = arith.addi %20, %228 : vector<1x256xi32>
    %c16_i32_134 = arith.constant 16 : i32
    %230 = vector.broadcast %c16_i32_134 : i32 to vector<1x256xi32>
    %231 = arith.cmpi slt, %229, %230 : vector<1x256xi32>
    %232 = arith.andi %227, %231 : vector<1x256xi1>
    %cst_135 = arith.constant 0.000000e+00 : f32
    %233 = vector.shape_cast %232 : vector<1x256xi1> to vector<1x256xi1>
    %234 = vector.broadcast %233 : vector<1x256xi1> to vector<32x256xi1>
    %235 = vector.broadcast %cst_135 : f32 to vector<32x256xf32>
    %236 = arith.select %234, %223, %235 : vector<32x256xi1>, vector<32x256xf32>
    %c256_136 = arith.constant 256 : index
    %c0_137 = arith.constant 0 : index
    %237 = vector.load %arg11[%c256_136, %c0_137] : memref<288x256xf32, #tpu.memory_space<vmem>>, vector<32x256xf32>
    tpu.vector_store %arg11[%c256_136, %c0_137], %236 {strides = array<i32>} : memref<288x256xf32, #tpu.memory_space<vmem>>, vector<32x256xf32>,
    %c0_138 = arith.constant 0 : index
    %c0_139 = arith.constant 0 : index
    %238 = vector.load %arg3[%c0_138, %c0_139] : memref<32x288xf32, #tpu.memory_space<vmem>>, vector<32x288xf32>
    %c0_140 = arith.constant 0 : index
    %c0_141 = arith.constant 0 : index
    %239 = vector.load %arg11[%c0_140, %c0_141] : memref<288x256xf32, #tpu.memory_space<vmem>>, vector<288x256xf32>
    %cst_142 = arith.constant dense<0.000000e+00> : vector<32x256xf32>
    %240 = tpu.matmul %238, %239, %cst_142 {dimension_numbers = #tpu.dot_dimension_numbers<[1], [0], [0], [1], [0, 0, 1, 1], [], []>} : vector<32x288xf32>, vector<288x256xf32>, vector<32x256xf32> -> vector<32x256xf32>
    %c0_143 = arith.constant 0 : index
    %c0_144 = arith.constant 0 : index
    %241 = vector.load %arg4[%c0_143, %c0_144] : memref<32x1xf32, #tpu.memory_space<vmem>>, vector<32x1xf32>
    %242 = vector.broadcast %241 : vector<32x1xf32> to vector<32x256xf32>
    %243 = arith.addf %240, %242 : vector<32x256xf32>
    %cst_145 = arith.constant dense<0.000000e+00> : vector<32xf32>
    %244 = vector.multi_reduction <add>, %243, %cst_145 [1] : vector<32x256xf32> to vector<32xf32>
    %245 = vector.shape_cast %244 : vector<32xf32> to vector<32x1xf32>
    %cst_146 = arith.constant 3.906250e-03 : f32
    %246 = vector.broadcast %cst_146 : f32 to vector<32x1xf32>
    %247 = arith.mulf %245, %246 : vector<32x1xf32>
    %248 = vector.broadcast %247 : vector<32x1xf32> to vector<32x256xf32>
    %249 = arith.subf %243, %248 : vector<32x256xf32>
    %250 = arith.mulf %249, %249 : vector<32x256xf32>
    %cst_147 = arith.constant dense<0.000000e+00> : vector<32xf32>
    %251 = vector.multi_reduction <add>, %250, %cst_147 [1] : vector<32x256xf32> to vector<32xf32>
    %252 = vector.shape_cast %251 : vector<32xf32> to vector<32x1xf32>
    %cst_148 = arith.constant 0.00392156886 : f32
    %253 = vector.broadcast %cst_148 : f32 to vector<32x1xf32>
    %254 = arith.mulf %252, %253 : vector<32x1xf32>
    %255 = math.sqrt %254 : vector<32x1xf32>
    %cst_149 = arith.constant 1.000000e-07 : f32
    %256 = vector.broadcast %cst_149 : f32 to vector<32x1xf32>
    %257 = arith.addf %255, %256 : vector<32x1xf32>
    %cst_150 = arith.constant 1.000000e+00 : f32
    %258 = vector.broadcast %cst_150 : f32 to vector<32x1xf32>
    %259 = arith.divf %258, %257 : vector<32x1xf32>
    %260 = vector.broadcast %259 : vector<32x1xf32> to vector<32x256xf32>
    %261 = arith.mulf %249, %260 : vector<32x256xf32>
    %c0_151 = arith.constant 0 : index
    %c128_152 = arith.constant 128 : index
    %262 = vector.load %arg10[%c0_151, %c128_152] : memref<32x512xf32, #tpu.memory_space<vmem>>, vector<32x256xf32>
    tpu.vector_store %arg10[%c0_151, %c128_152], %261 {strides = array<i32>} : memref<32x512xf32, #tpu.memory_space<vmem>>, vector<32x256xf32>,
    %c0_153 = arith.constant 0 : index
    %c111_154 = arith.constant 111 : index
    %263 = vector.load %arg10[%c0_153, %c111_154] : memref<32x512xf32, #tpu.memory_space<vmem>>, vector<32x256xf32>
    %c-1_i32_155 = arith.constant -1 : i32
    %264 = vector.broadcast %c-1_i32_155 : i32 to vector<1x256xi32>
    %265 = arith.addi %20, %264 : vector<1x256xi32>
    %c0_i32_156 = arith.constant 0 : i32
    %266 = vector.broadcast %c0_i32_156 : i32 to vector<1x256xi32>
    %267 = arith.cmpi sge, %265, %266 : vector<1x256xi32>
    %c-1_i32_157 = arith.constant -1 : i32
    %268 = vector.broadcast %c-1_i32_157 : i32 to vector<1x256xi32>
    %269 = arith.addi %20, %268 : vector<1x256xi32>
    %c16_i32_158 = arith.constant 16 : i32
    %270 = vector.broadcast %c16_i32_158 : i32 to vector<1x256xi32>
    %271 = arith.cmpi slt, %269, %270 : vector<1x256xi32>
    %272 = arith.andi %267, %271 : vector<1x256xi1>
    %cst_159 = arith.constant 0.000000e+00 : f32
    %273 = vector.shape_cast %272 : vector<1x256xi1> to vector<1x256xi1>
    %274 = vector.broadcast %273 : vector<1x256xi1> to vector<32x256xi1>
    %275 = vector.broadcast %cst_159 : f32 to vector<32x256xf32>
    %276 = arith.select %274, %263, %275 : vector<32x256xi1>, vector<32x256xf32>
    %c0_160 = arith.constant 0 : index
    %c0_161 = arith.constant 0 : index
    %277 = vector.load %arg11[%c0_160, %c0_161] : memref<288x256xf32, #tpu.memory_space<vmem>>, vector<32x256xf32>
    tpu.vector_store %arg11[%c0_160, %c0_161], %276 {strides = array<i32>} : memref<288x256xf32, #tpu.memory_space<vmem>>, vector<32x256xf32>,
    %c0_162 = arith.constant 0 : index
    %c112_163 = arith.constant 112 : index
    %278 = vector.load %arg10[%c0_162, %c112_163] : memref<32x512xf32, #tpu.memory_space<vmem>>, vector<32x256xf32>
    %c32_164 = arith.constant 32 : index
    %c0_165 = arith.constant 0 : index
    %279 = vector.load %arg11[%c32_164, %c0_165] : memref<288x256xf32, #tpu.memory_space<vmem>>, vector<32x256xf32>
    tpu.vector_store %arg11[%c32_164, %c0_165], %278 {strides = array<i32>} : memref<288x256xf32, #tpu.memory_space<vmem>>, vector<32x256xf32>,
    %c0_166 = arith.constant 0 : index
    %c113_167 = arith.constant 113 : index
    %280 = vector.load %arg10[%c0_166, %c113_167] : memref<32x512xf32, #tpu.memory_space<vmem>>, vector<32x256xf32>
    %c1_i32_168 = arith.constant 1 : i32
    %281 = vector.broadcast %c1_i32_168 : i32 to vector<1x256xi32>
    %282 = arith.addi %20, %281 : vector<1x256xi32>
    %c0_i32_169 = arith.constant 0 : i32
    %283 = vector.broadcast %c0_i32_169 : i32 to vector<1x256xi32>
    %284 = arith.cmpi sge, %282, %283 : vector<1x256xi32>
    %c1_i32_170 = arith.constant 1 : i32
    %285 = vector.broadcast %c1_i32_170 : i32 to vector<1x256xi32>
    %286 = arith.addi %20, %285 : vector<1x256xi32>
    %c16_i32_171 = arith.constant 16 : i32
    %287 = vector.broadcast %c16_i32_171 : i32 to vector<1x256xi32>
    %288 = arith.cmpi slt, %286, %287 : vector<1x256xi32>
    %289 = arith.andi %284, %288 : vector<1x256xi1>
    %cst_172 = arith.constant 0.000000e+00 : f32
    %290 = vector.shape_cast %289 : vector<1x256xi1> to vector<1x256xi1>
    %291 = vector.broadcast %290 : vector<1x256xi1> to vector<32x256xi1>
    %292 = vector.broadcast %cst_172 : f32 to vector<32x256xf32>
    %293 = arith.select %291, %280, %292 : vector<32x256xi1>, vector<32x256xf32>
    %c64_173 = arith.constant 64 : index
    %c0_174 = arith.constant 0 : index
    %294 = vector.load %arg11[%c64_173, %c0_174] : memref<288x256xf32, #tpu.memory_space<vmem>>, vector<32x256xf32>
    tpu.vector_store %arg11[%c64_173, %c0_174], %293 {strides = array<i32>} : memref<288x256xf32, #tpu.memory_space<vmem>>, vector<32x256xf32>,
    %c0_175 = arith.constant 0 : index
    %c127_176 = arith.constant 127 : index
    %295 = vector.load %arg10[%c0_175, %c127_176] : memref<32x512xf32, #tpu.memory_space<vmem>>, vector<32x256xf32>
    %c-1_i32_177 = arith.constant -1 : i32
    %296 = vector.broadcast %c-1_i32_177 : i32 to vector<1x256xi32>
    %297 = arith.addi %20, %296 : vector<1x256xi32>
    %c0_i32_178 = arith.constant 0 : i32
    %298 = vector.broadcast %c0_i32_178 : i32 to vector<1x256xi32>
    %299 = arith.cmpi sge, %297, %298 : vector<1x256xi32>
    %c-1_i32_179 = arith.constant -1 : i32
    %300 = vector.broadcast %c-1_i32_179 : i32 to vector<1x256xi32>
    %301 = arith.addi %20, %300 : vector<1x256xi32>
    %c16_i32_180 = arith.constant 16 : i32
    %302 = vector.broadcast %c16_i32_180 : i32 to vector<1x256xi32>
    %303 = arith.cmpi slt, %301, %302 : vector<1x256xi32>
    %304 = arith.andi %299, %303 : vector<1x256xi1>
    %cst_181 = arith.constant 0.000000e+00 : f32
    %305 = vector.shape_cast %304 : vector<1x256xi1> to vector<1x256xi1>
    %306 = vector.broadcast %305 : vector<1x256xi1> to vector<32x256xi1>
    %307 = vector.broadcast %cst_181 : f32 to vector<32x256xf32>
    %308 = arith.select %306, %295, %307 : vector<32x256xi1>, vector<32x256xf32>
    %c96_182 = arith.constant 96 : index
    %c0_183 = arith.constant 0 : index
    %309 = vector.load %arg11[%c96_182, %c0_183] : memref<288x256xf32, #tpu.memory_space<vmem>>, vector<32x256xf32>
    tpu.vector_store %arg11[%c96_182, %c0_183], %308 {strides = array<i32>} : memref<288x256xf32, #tpu.memory_space<vmem>>, vector<32x256xf32>,
    %c0_184 = arith.constant 0 : index
    %c128_185 = arith.constant 128 : index
    %310 = vector.load %arg10[%c0_184, %c128_185] : memref<32x512xf32, #tpu.memory_space<vmem>>, vector<32x256xf32>
    %c128_186 = arith.constant 128 : index
    %c0_187 = arith.constant 0 : index
    %311 = vector.load %arg11[%c128_186, %c0_187] : memref<288x256xf32, #tpu.memory_space<vmem>>, vector<32x256xf32>
    tpu.vector_store %arg11[%c128_186, %c0_187], %310 {strides = array<i32>} : memref<288x256xf32, #tpu.memory_space<vmem>>, vector<32x256xf32>,
    %c0_188 = arith.constant 0 : index
    %c129_189 = arith.constant 129 : index
    %312 = vector.load %arg10[%c0_188, %c129_189] : memref<32x512xf32, #tpu.memory_space<vmem>>, vector<32x256xf32>
    %c1_i32_190 = arith.constant 1 : i32
    %313 = vector.broadcast %c1_i32_190 : i32 to vector<1x256xi32>
    %314 = arith.addi %20, %313 : vector<1x256xi32>
    %c0_i32_191 = arith.constant 0 : i32
    %315 = vector.broadcast %c0_i32_191 : i32 to vector<1x256xi32>
    %316 = arith.cmpi sge, %314, %315 : vector<1x256xi32>
    %c1_i32_192 = arith.constant 1 : i32
    %317 = vector.broadcast %c1_i32_192 : i32 to vector<1x256xi32>
    %318 = arith.addi %20, %317 : vector<1x256xi32>
    %c16_i32_193 = arith.constant 16 : i32
    %319 = vector.broadcast %c16_i32_193 : i32 to vector<1x256xi32>
    %320 = arith.cmpi slt, %318, %319 : vector<1x256xi32>
    %321 = arith.andi %316, %320 : vector<1x256xi1>
    %cst_194 = arith.constant 0.000000e+00 : f32
    %322 = vector.shape_cast %321 : vector<1x256xi1> to vector<1x256xi1>
    %323 = vector.broadcast %322 : vector<1x256xi1> to vector<32x256xi1>
    %324 = vector.broadcast %cst_194 : f32 to vector<32x256xf32>
    %325 = arith.select %323, %312, %324 : vector<32x256xi1>, vector<32x256xf32>
    %c160_195 = arith.constant 160 : index
    %c0_196 = arith.constant 0 : index
    %326 = vector.load %arg11[%c160_195, %c0_196] : memref<288x256xf32, #tpu.memory_space<vmem>>, vector<32x256xf32>
    tpu.vector_store %arg11[%c160_195, %c0_196], %325 {strides = array<i32>} : memref<288x256xf32, #tpu.memory_space<vmem>>, vector<32x256xf32>,
    %c0_197 = arith.constant 0 : index
    %c143_198 = arith.constant 143 : index
    %327 = vector.load %arg10[%c0_197, %c143_198] : memref<32x512xf32, #tpu.memory_space<vmem>>, vector<32x256xf32>
    %c-1_i32_199 = arith.constant -1 : i32
    %328 = vector.broadcast %c-1_i32_199 : i32 to vector<1x256xi32>
    %329 = arith.addi %20, %328 : vector<1x256xi32>
    %c0_i32_200 = arith.constant 0 : i32
    %330 = vector.broadcast %c0_i32_200 : i32 to vector<1x256xi32>
    %331 = arith.cmpi sge, %329, %330 : vector<1x256xi32>
    %c-1_i32_201 = arith.constant -1 : i32
    %332 = vector.broadcast %c-1_i32_201 : i32 to vector<1x256xi32>
    %333 = arith.addi %20, %332 : vector<1x256xi32>
    %c16_i32_202 = arith.constant 16 : i32
    %334 = vector.broadcast %c16_i32_202 : i32 to vector<1x256xi32>
    %335 = arith.cmpi slt, %333, %334 : vector<1x256xi32>
    %336 = arith.andi %331, %335 : vector<1x256xi1>
    %cst_203 = arith.constant 0.000000e+00 : f32
    %337 = vector.shape_cast %336 : vector<1x256xi1> to vector<1x256xi1>
    %338 = vector.broadcast %337 : vector<1x256xi1> to vector<32x256xi1>
    %339 = vector.broadcast %cst_203 : f32 to vector<32x256xf32>
    %340 = arith.select %338, %327, %339 : vector<32x256xi1>, vector<32x256xf32>
    %c192_204 = arith.constant 192 : index
    %c0_205 = arith.constant 0 : index
    %341 = vector.load %arg11[%c192_204, %c0_205] : memref<288x256xf32, #tpu.memory_space<vmem>>, vector<32x256xf32>
    tpu.vector_store %arg11[%c192_204, %c0_205], %340 {strides = array<i32>} : memref<288x256xf32, #tpu.memory_space<vmem>>, vector<32x256xf32>,
    %c0_206 = arith.constant 0 : index
    %c144_207 = arith.constant 144 : index
    %342 = vector.load %arg10[%c0_206, %c144_207] : memref<32x512xf32, #tpu.memory_space<vmem>>, vector<32x256xf32>
    %c224_208 = arith.constant 224 : index
    %c0_209 = arith.constant 0 : index
    %343 = vector.load %arg11[%c224_208, %c0_209] : memref<288x256xf32, #tpu.memory_space<vmem>>, vector<32x256xf32>
    tpu.vector_store %arg11[%c224_208, %c0_209], %342 {strides = array<i32>} : memref<288x256xf32, #tpu.memory_space<vmem>>, vector<32x256xf32>,
    %c0_210 = arith.constant 0 : index
    %c145_211 = arith.constant 145 : index
    %344 = vector.load %arg10[%c0_210, %c145_211] : memref<32x512xf32, #tpu.memory_space<vmem>>, vector<32x256xf32>
    %c1_i32_212 = arith.constant 1 : i32
    %345 = vector.broadcast %c1_i32_212 : i32 to vector<1x256xi32>
    %346 = arith.addi %20, %345 : vector<1x256xi32>
    %c0_i32_213 = arith.constant 0 : i32
    %347 = vector.broadcast %c0_i32_213 : i32 to vector<1x256xi32>
    %348 = arith.cmpi sge, %346, %347 : vector<1x256xi32>
    %c1_i32_214 = arith.constant 1 : i32
    %349 = vector.broadcast %c1_i32_214 : i32 to vector<1x256xi32>
    %350 = arith.addi %20, %349 : vector<1x256xi32>
    %c16_i32_215 = arith.constant 16 : i32
    %351 = vector.broadcast %c16_i32_215 : i32 to vector<1x256xi32>
    %352 = arith.cmpi slt, %350, %351 : vector<1x256xi32>
    %353 = arith.andi %348, %352 : vector<1x256xi1>
    %cst_216 = arith.constant 0.000000e+00 : f32
    %354 = vector.shape_cast %353 : vector<1x256xi1> to vector<1x256xi1>
    %355 = vector.broadcast %354 : vector<1x256xi1> to vector<32x256xi1>
    %356 = vector.broadcast %cst_216 : f32 to vector<32x256xf32>
    %357 = arith.select %355, %344, %356 : vector<32x256xi1>, vector<32x256xf32>
    %c256_217 = arith.constant 256 : index
    %c0_218 = arith.constant 0 : index
    %358 = vector.load %arg11[%c256_217, %c0_218] : memref<288x256xf32, #tpu.memory_space<vmem>>, vector<32x256xf32>
    tpu.vector_store %arg11[%c256_217, %c0_218], %357 {strides = array<i32>} : memref<288x256xf32, #tpu.memory_space<vmem>>, vector<32x256xf32>,
    %c0_219 = arith.constant 0 : index
    %c0_220 = arith.constant 0 : index
    %359 = vector.load %arg5[%c0_219, %c0_220] : memref<32x288xf32, #tpu.memory_space<vmem>>, vector<32x288xf32>
    %c0_221 = arith.constant 0 : index
    %c0_222 = arith.constant 0 : index
    %360 = vector.load %arg11[%c0_221, %c0_222] : memref<288x256xf32, #tpu.memory_space<vmem>>, vector<288x256xf32>
    %cst_223 = arith.constant dense<0.000000e+00> : vector<32x256xf32>
    %361 = tpu.matmul %359, %360, %cst_223 {dimension_numbers = #tpu.dot_dimension_numbers<[1], [0], [0], [1], [0, 0, 1, 1], [], []>} : vector<32x288xf32>, vector<288x256xf32>, vector<32x256xf32> -> vector<32x256xf32>
    %c0_224 = arith.constant 0 : index
    %c0_225 = arith.constant 0 : index
    %362 = vector.load %arg6[%c0_224, %c0_225] : memref<32x1xf32, #tpu.memory_space<vmem>>, vector<32x1xf32>
    %363 = vector.broadcast %362 : vector<32x1xf32> to vector<32x256xf32>
    %364 = arith.addf %361, %363 : vector<32x256xf32>
    %cst_226 = arith.constant dense<0.000000e+00> : vector<32xf32>
    %365 = vector.multi_reduction <add>, %364, %cst_226 [1] : vector<32x256xf32> to vector<32xf32>
    %366 = vector.shape_cast %365 : vector<32xf32> to vector<32x1xf32>
    %cst_227 = arith.constant 3.906250e-03 : f32
    %367 = vector.broadcast %cst_227 : f32 to vector<32x1xf32>
    %368 = arith.mulf %366, %367 : vector<32x1xf32>
    %369 = vector.broadcast %368 : vector<32x1xf32> to vector<32x256xf32>
    %370 = arith.subf %364, %369 : vector<32x256xf32>
    %371 = arith.mulf %370, %370 : vector<32x256xf32>
    %cst_228 = arith.constant dense<0.000000e+00> : vector<32xf32>
    %372 = vector.multi_reduction <add>, %371, %cst_228 [1] : vector<32x256xf32> to vector<32xf32>
    %373 = vector.shape_cast %372 : vector<32xf32> to vector<32x1xf32>
    %cst_229 = arith.constant 0.00392156886 : f32
    %374 = vector.broadcast %cst_229 : f32 to vector<32x1xf32>
    %375 = arith.mulf %373, %374 : vector<32x1xf32>
    %376 = math.sqrt %375 : vector<32x1xf32>
    %cst_230 = arith.constant 1.000000e-07 : f32
    %377 = vector.broadcast %cst_230 : f32 to vector<32x1xf32>
    %378 = arith.addf %376, %377 : vector<32x1xf32>
    %cst_231 = arith.constant 1.000000e+00 : f32
    %379 = vector.broadcast %cst_231 : f32 to vector<32x1xf32>
    %380 = arith.divf %379, %378 : vector<32x1xf32>
    %381 = vector.broadcast %380 : vector<32x1xf32> to vector<32x256xf32>
    %382 = arith.mulf %370, %381 : vector<32x256xf32>
    %c0_232 = arith.constant 0 : index
    %c128_233 = arith.constant 128 : index
    %383 = vector.load %arg10[%c0_232, %c128_233] : memref<32x512xf32, #tpu.memory_space<vmem>>, vector<32x256xf32>
    tpu.vector_store %arg10[%c0_232, %c128_233], %382 {strides = array<i32>} : memref<32x512xf32, #tpu.memory_space<vmem>>, vector<32x256xf32>,
    %c0_234 = arith.constant 0 : index
    %c111_235 = arith.constant 111 : index
    %384 = vector.load %arg10[%c0_234, %c111_235] : memref<32x512xf32, #tpu.memory_space<vmem>>, vector<32x256xf32>
    %c-1_i32_236 = arith.constant -1 : i32
    %385 = vector.broadcast %c-1_i32_236 : i32 to vector<1x256xi32>
    %386 = arith.addi %20, %385 : vector<1x256xi32>
    %c0_i32_237 = arith.constant 0 : i32
    %387 = vector.broadcast %c0_i32_237 : i32 to vector<1x256xi32>
    %388 = arith.cmpi sge, %386, %387 : vector<1x256xi32>
    %c-1_i32_238 = arith.constant -1 : i32
    %389 = vector.broadcast %c-1_i32_238 : i32 to vector<1x256xi32>
    %390 = arith.addi %20, %389 : vector<1x256xi32>
    %c16_i32_239 = arith.constant 16 : i32
    %391 = vector.broadcast %c16_i32_239 : i32 to vector<1x256xi32>
    %392 = arith.cmpi slt, %390, %391 : vector<1x256xi32>
    %393 = arith.andi %388, %392 : vector<1x256xi1>
    %cst_240 = arith.constant 0.000000e+00 : f32
    %394 = vector.shape_cast %393 : vector<1x256xi1> to vector<1x256xi1>
    %395 = vector.broadcast %394 : vector<1x256xi1> to vector<32x256xi1>
    %396 = vector.broadcast %cst_240 : f32 to vector<32x256xf32>
    %397 = arith.select %395, %384, %396 : vector<32x256xi1>, vector<32x256xf32>
    %c0_241 = arith.constant 0 : index
    %c0_242 = arith.constant 0 : index
    %398 = vector.load %arg11[%c0_241, %c0_242] : memref<288x256xf32, #tpu.memory_space<vmem>>, vector<32x256xf32>
    tpu.vector_store %arg11[%c0_241, %c0_242], %397 {strides = array<i32>} : memref<288x256xf32, #tpu.memory_space<vmem>>, vector<32x256xf32>,
    %c0_243 = arith.constant 0 : index
    %c112_244 = arith.constant 112 : index
    %399 = vector.load %arg10[%c0_243, %c112_244] : memref<32x512xf32, #tpu.memory_space<vmem>>, vector<32x256xf32>
    %c32_245 = arith.constant 32 : index
    %c0_246 = arith.constant 0 : index
    %400 = vector.load %arg11[%c32_245, %c0_246] : memref<288x256xf32, #tpu.memory_space<vmem>>, vector<32x256xf32>
    tpu.vector_store %arg11[%c32_245, %c0_246], %399 {strides = array<i32>} : memref<288x256xf32, #tpu.memory_space<vmem>>, vector<32x256xf32>,
    %c0_247 = arith.constant 0 : index
    %c113_248 = arith.constant 113 : index
    %401 = vector.load %arg10[%c0_247, %c113_248] : memref<32x512xf32, #tpu.memory_space<vmem>>, vector<32x256xf32>
    %c1_i32_249 = arith.constant 1 : i32
    %402 = vector.broadcast %c1_i32_249 : i32 to vector<1x256xi32>
    %403 = arith.addi %20, %402 : vector<1x256xi32>
    %c0_i32_250 = arith.constant 0 : i32
    %404 = vector.broadcast %c0_i32_250 : i32 to vector<1x256xi32>
    %405 = arith.cmpi sge, %403, %404 : vector<1x256xi32>
    %c1_i32_251 = arith.constant 1 : i32
    %406 = vector.broadcast %c1_i32_251 : i32 to vector<1x256xi32>
    %407 = arith.addi %20, %406 : vector<1x256xi32>
    %c16_i32_252 = arith.constant 16 : i32
    %408 = vector.broadcast %c16_i32_252 : i32 to vector<1x256xi32>
    %409 = arith.cmpi slt, %407, %408 : vector<1x256xi32>
    %410 = arith.andi %405, %409 : vector<1x256xi1>
    %cst_253 = arith.constant 0.000000e+00 : f32
    %411 = vector.shape_cast %410 : vector<1x256xi1> to vector<1x256xi1>
    %412 = vector.broadcast %411 : vector<1x256xi1> to vector<32x256xi1>
    %413 = vector.broadcast %cst_253 : f32 to vector<32x256xf32>
    %414 = arith.select %412, %401, %413 : vector<32x256xi1>, vector<32x256xf32>
    %c64_254 = arith.constant 64 : index
    %c0_255 = arith.constant 0 : index
    %415 = vector.load %arg11[%c64_254, %c0_255] : memref<288x256xf32, #tpu.memory_space<vmem>>, vector<32x256xf32>
    tpu.vector_store %arg11[%c64_254, %c0_255], %414 {strides = array<i32>} : memref<288x256xf32, #tpu.memory_space<vmem>>, vector<32x256xf32>,
    %c0_256 = arith.constant 0 : index
    %c127_257 = arith.constant 127 : index
    %416 = vector.load %arg10[%c0_256, %c127_257] : memref<32x512xf32, #tpu.memory_space<vmem>>, vector<32x256xf32>
    %c-1_i32_258 = arith.constant -1 : i32
    %417 = vector.broadcast %c-1_i32_258 : i32 to vector<1x256xi32>
    %418 = arith.addi %20, %417 : vector<1x256xi32>
    %c0_i32_259 = arith.constant 0 : i32
    %419 = vector.broadcast %c0_i32_259 : i32 to vector<1x256xi32>
    %420 = arith.cmpi sge, %418, %419 : vector<1x256xi32>
    %c-1_i32_260 = arith.constant -1 : i32
    %421 = vector.broadcast %c-1_i32_260 : i32 to vector<1x256xi32>
    %422 = arith.addi %20, %421 : vector<1x256xi32>
    %c16_i32_261 = arith.constant 16 : i32
    %423 = vector.broadcast %c16_i32_261 : i32 to vector<1x256xi32>
    %424 = arith.cmpi slt, %422, %423 : vector<1x256xi32>
    %425 = arith.andi %420, %424 : vector<1x256xi1>
    %cst_262 = arith.constant 0.000000e+00 : f32
    %426 = vector.shape_cast %425 : vector<1x256xi1> to vector<1x256xi1>
    %427 = vector.broadcast %426 : vector<1x256xi1> to vector<32x256xi1>
    %428 = vector.broadcast %cst_262 : f32 to vector<32x256xf32>
    %429 = arith.select %427, %416, %428 : vector<32x256xi1>, vector<32x256xf32>
    %c96_263 = arith.constant 96 : index
    %c0_264 = arith.constant 0 : index
    %430 = vector.load %arg11[%c96_263, %c0_264] : memref<288x256xf32, #tpu.memory_space<vmem>>, vector<32x256xf32>
    tpu.vector_store %arg11[%c96_263, %c0_264], %429 {strides = array<i32>} : memref<288x256xf32, #tpu.memory_space<vmem>>, vector<32x256xf32>,
    %c0_265 = arith.constant 0 : index
    %c128_266 = arith.constant 128 : index
    %431 = vector.load %arg10[%c0_265, %c128_266] : memref<32x512xf32, #tpu.memory_space<vmem>>, vector<32x256xf32>
    %c128_267 = arith.constant 128 : index
    %c0_268 = arith.constant 0 : index
    %432 = vector.load %arg11[%c128_267, %c0_268] : memref<288x256xf32, #tpu.memory_space<vmem>>, vector<32x256xf32>
    tpu.vector_store %arg11[%c128_267, %c0_268], %431 {strides = array<i32>} : memref<288x256xf32, #tpu.memory_space<vmem>>, vector<32x256xf32>,
    %c0_269 = arith.constant 0 : index
    %c129_270 = arith.constant 129 : index
    %433 = vector.load %arg10[%c0_269, %c129_270] : memref<32x512xf32, #tpu.memory_space<vmem>>, vector<32x256xf32>
    %c1_i32_271 = arith.constant 1 : i32
    %434 = vector.broadcast %c1_i32_271 : i32 to vector<1x256xi32>
    %435 = arith.addi %20, %434 : vector<1x256xi32>
    %c0_i32_272 = arith.constant 0 : i32
    %436 = vector.broadcast %c0_i32_272 : i32 to vector<1x256xi32>
    %437 = arith.cmpi sge, %435, %436 : vector<1x256xi32>
    %c1_i32_273 = arith.constant 1 : i32
    %438 = vector.broadcast %c1_i32_273 : i32 to vector<1x256xi32>
    %439 = arith.addi %20, %438 : vector<1x256xi32>
    %c16_i32_274 = arith.constant 16 : i32
    %440 = vector.broadcast %c16_i32_274 : i32 to vector<1x256xi32>
    %441 = arith.cmpi slt, %439, %440 : vector<1x256xi32>
    %442 = arith.andi %437, %441 : vector<1x256xi1>
    %cst_275 = arith.constant 0.000000e+00 : f32
    %443 = vector.shape_cast %442 : vector<1x256xi1> to vector<1x256xi1>
    %444 = vector.broadcast %443 : vector<1x256xi1> to vector<32x256xi1>
    %445 = vector.broadcast %cst_275 : f32 to vector<32x256xf32>
    %446 = arith.select %444, %433, %445 : vector<32x256xi1>, vector<32x256xf32>
    %c160_276 = arith.constant 160 : index
    %c0_277 = arith.constant 0 : index
    %447 = vector.load %arg11[%c160_276, %c0_277] : memref<288x256xf32, #tpu.memory_space<vmem>>, vector<32x256xf32>
    tpu.vector_store %arg11[%c160_276, %c0_277], %446 {strides = array<i32>} : memref<288x256xf32, #tpu.memory_space<vmem>>, vector<32x256xf32>,
    %c0_278 = arith.constant 0 : index
    %c143_279 = arith.constant 143 : index
    %448 = vector.load %arg10[%c0_278, %c143_279] : memref<32x512xf32, #tpu.memory_space<vmem>>, vector<32x256xf32>
    %c-1_i32_280 = arith.constant -1 : i32
    %449 = vector.broadcast %c-1_i32_280 : i32 to vector<1x256xi32>
    %450 = arith.addi %20, %449 : vector<1x256xi32>
    %c0_i32_281 = arith.constant 0 : i32
    %451 = vector.broadcast %c0_i32_281 : i32 to vector<1x256xi32>
    %452 = arith.cmpi sge, %450, %451 : vector<1x256xi32>
    %c-1_i32_282 = arith.constant -1 : i32
    %453 = vector.broadcast %c-1_i32_282 : i32 to vector<1x256xi32>
    %454 = arith.addi %20, %453 : vector<1x256xi32>
    %c16_i32_283 = arith.constant 16 : i32
    %455 = vector.broadcast %c16_i32_283 : i32 to vector<1x256xi32>
    %456 = arith.cmpi slt, %454, %455 : vector<1x256xi32>
    %457 = arith.andi %452, %456 : vector<1x256xi1>
    %cst_284 = arith.constant 0.000000e+00 : f32
    %458 = vector.shape_cast %457 : vector<1x256xi1> to vector<1x256xi1>
    %459 = vector.broadcast %458 : vector<1x256xi1> to vector<32x256xi1>
    %460 = vector.broadcast %cst_284 : f32 to vector<32x256xf32>
    %461 = arith.select %459, %448, %460 : vector<32x256xi1>, vector<32x256xf32>
    %c192_285 = arith.constant 192 : index
    %c0_286 = arith.constant 0 : index
    %462 = vector.load %arg11[%c192_285, %c0_286] : memref<288x256xf32, #tpu.memory_space<vmem>>, vector<32x256xf32>
    tpu.vector_store %arg11[%c192_285, %c0_286], %461 {strides = array<i32>} : memref<288x256xf32, #tpu.memory_space<vmem>>, vector<32x256xf32>,
    %c0_287 = arith.constant 0 : index
    %c144_288 = arith.constant 144 : index
    %463 = vector.load %arg10[%c0_287, %c144_288] : memref<32x512xf32, #tpu.memory_space<vmem>>, vector<32x256xf32>
    %c224_289 = arith.constant 224 : index
    %c0_290 = arith.constant 0 : index
    %464 = vector.load %arg11[%c224_289, %c0_290] : memref<288x256xf32, #tpu.memory_space<vmem>>, vector<32x256xf32>
    tpu.vector_store %arg11[%c224_289, %c0_290], %463 {strides = array<i32>} : memref<288x256xf32, #tpu.memory_space<vmem>>, vector<32x256xf32>,
    %c0_291 = arith.constant 0 : index
    %c145_292 = arith.constant 145 : index
    %465 = vector.load %arg10[%c0_291, %c145_292] : memref<32x512xf32, #tpu.memory_space<vmem>>, vector<32x256xf32>
    %c1_i32_293 = arith.constant 1 : i32
    %466 = vector.broadcast %c1_i32_293 : i32 to vector<1x256xi32>
    %467 = arith.addi %20, %466 : vector<1x256xi32>
    %c0_i32_294 = arith.constant 0 : i32
    %468 = vector.broadcast %c0_i32_294 : i32 to vector<1x256xi32>
    %469 = arith.cmpi sge, %467, %468 : vector<1x256xi32>
    %c1_i32_295 = arith.constant 1 : i32
    %470 = vector.broadcast %c1_i32_295 : i32 to vector<1x256xi32>
    %471 = arith.addi %20, %470 : vector<1x256xi32>
    %c16_i32_296 = arith.constant 16 : i32
    %472 = vector.broadcast %c16_i32_296 : i32 to vector<1x256xi32>
    %473 = arith.cmpi slt, %471, %472 : vector<1x256xi32>
    %474 = arith.andi %469, %473 : vector<1x256xi1>
    %cst_297 = arith.constant 0.000000e+00 : f32
    %475 = vector.shape_cast %474 : vector<1x256xi1> to vector<1x256xi1>
    %476 = vector.broadcast %475 : vector<1x256xi1> to vector<32x256xi1>
    %477 = vector.broadcast %cst_297 : f32 to vector<32x256xf32>
    %478 = arith.select %476, %465, %477 : vector<32x256xi1>, vector<32x256xf32>
    %c256_298 = arith.constant 256 : index
    %c0_299 = arith.constant 0 : index
    %479 = vector.load %arg11[%c256_298, %c0_299] : memref<288x256xf32, #tpu.memory_space<vmem>>, vector<32x256xf32>
    tpu.vector_store %arg11[%c256_298, %c0_299], %478 {strides = array<i32>} : memref<288x256xf32, #tpu.memory_space<vmem>>, vector<32x256xf32>,
    %c0_300 = arith.constant 0 : index
    %c0_301 = arith.constant 0 : index
    %480 = vector.load %arg7[%c0_300, %c0_301] : memref<2x288xf32, #tpu.memory_space<vmem>>, vector<2x288xf32>
    %c0_302 = arith.constant 0 : index
    %c0_303 = arith.constant 0 : index
    %481 = vector.load %arg11[%c0_302, %c0_303] : memref<288x256xf32, #tpu.memory_space<vmem>>, vector<288x256xf32>
    %cst_304 = arith.constant dense<0.000000e+00> : vector<2x256xf32>
    %482 = tpu.matmul %480, %481, %cst_304 {dimension_numbers = #tpu.dot_dimension_numbers<[1], [0], [0], [1], [0, 0, 1, 1], [], []>} : vector<2x288xf32>, vector<288x256xf32>, vector<2x256xf32> -> vector<2x256xf32>
    %c0_305 = arith.constant 0 : index
    %c0_306 = arith.constant 0 : index
    %483 = vector.load %arg8[%c0_305, %c0_306] : memref<2x1xf32, #tpu.memory_space<vmem>>, vector<2x1xf32>
    %484 = vector.broadcast %483 : vector<2x1xf32> to vector<2x256xf32>
    %485 = arith.addf %482, %484 : vector<2x256xf32>
    %cst_307 = arith.constant dense<0.000000e+00> : vector<2xf32>
    %486 = vector.multi_reduction <add>, %485, %cst_307 [1] : vector<2x256xf32> to vector<2xf32>
    %487 = vector.shape_cast %486 : vector<2xf32> to vector<2x1xf32>
    %cst_308 = arith.constant 3.906250e-03 : f32
    %488 = vector.broadcast %cst_308 : f32 to vector<2x1xf32>
    %489 = arith.mulf %487, %488 : vector<2x1xf32>
    %490 = vector.broadcast %489 : vector<2x1xf32> to vector<2x256xf32>
    %491 = arith.subf %485, %490 : vector<2x256xf32>
    %492 = arith.mulf %491, %491 : vector<2x256xf32>
    %cst_309 = arith.constant dense<0.000000e+00> : vector<2xf32>
    %493 = vector.multi_reduction <add>, %492, %cst_309 [1] : vector<2x256xf32> to vector<2xf32>
    %494 = vector.shape_cast %493 : vector<2xf32> to vector<2x1xf32>
    %cst_310 = arith.constant 0.00392156886 : f32
    %495 = vector.broadcast %cst_310 : f32 to vector<2x1xf32>
    %496 = arith.mulf %494, %495 : vector<2x1xf32>
    %497 = math.sqrt %496 : vector<2x1xf32>
    %cst_311 = arith.constant 1.000000e-07 : f32
    %498 = vector.broadcast %cst_311 : f32 to vector<2x1xf32>
    %499 = arith.addf %497, %498 : vector<2x1xf32>
    %cst_312 = arith.constant 1.000000e+00 : f32
    %500 = vector.broadcast %cst_312 : f32 to vector<2x1xf32>
    %501 = arith.divf %500, %499 : vector<2x1xf32>
    %502 = vector.broadcast %501 : vector<2x1xf32> to vector<2x256xf32>
    %503 = arith.mulf %491, %502 : vector<2x256xf32>
    %c0_313 = arith.constant 0 : index
    %c0_314 = arith.constant 0 : index
    %504 = vector.load %arg9[%c0_313, %c0_314] : memref<2x256xf32, #tpu.memory_space<vmem>>, vector<2x256xf32>
    tpu.vector_store %arg9[%c0_313, %c0_314], %503 {strides = array<i32>} : memref<2x256xf32, #tpu.memory_space<vmem>>, vector<2x256xf32>,
    return
  }
}

</mosaic_0001>

<bundles_post_ra>
// kernel: squeeze.1
= control target key start
LH: loop header
LB: loop body
LE: loop exit
PB: predicated region body
PF: predicated region fallthrough
CT: control target
= control target key end

     0   :  { %vm5_vm0 = vcmask 1045508   ;;  %s14_s6 = smov 3  ;;  %s17_s7 = smov 12  ;;  %vm19_vm1 = vcmask 1043458   ;;  %vm7_vm2 = vcmask 130048   ;;  %vm28_vm3 = vcmask 1048448   ;;  %s296_s0 = inlined_call_operand.vmem [shape: f32[1,3,16,16], index: 0, kind: input, shape index: {}]   ;;  %s297_s1 = inlined_call_operand.vmem [shape: f32[3,256], index: 1, kind: output, shape index: {}]  }
   0x1   :  { %v157_v0 = vld [vmem:[%s296_s0 + $0x7] ss:$16 sm:%s14_s6]   ;;  %s22_s12 = smov 48  ;;  %s52_s15 = smov 3  ;;  %vm47_vm4 = vcmask 917248   ;;  %vm66_vm5 = vcmask 786048  }
   0x2   :  { %v158_v1 = vld [vmem:[%s296_s0 + $0x57] ss:$-24 sm:%s17_s7]   ;;  %s55_s16 = smov 12  ;;  %v163_v5 = vld [vmem:[%s296_s0 + $0x5] ss:$16 sm:%s52_s15]   ;;  %s60_s21 = smov 48 }
   0x3   :  { %v20_v2 = vsel %vm19_vm1, %v158_v1, %v157_v0  ;;  %v159_v3 = vld [vmem:[%s296_s0 - $0x21] ss:$16 sm:%s22_s12]   ;;  %v164_v6 = vld [vmem:[%s296_s0 + $0x55] ss:$-24 sm:%s55_s16]   ;;  %s186_s22 = smov 112   ;;  %s33_s25 = smov 3 }
   0x4   :  { %v25_v4 = vsel %vm5_vm0, %v159_v3, %v20_v2  ;;  %v58_v7 = vsel %vm19_vm1, %v164_v6, %v163_v5  ;;  %v165_v8 = vld [vmem:[%s296_s0 - $0x23] ss:$16 sm:%s60_s21]   ;;  %s36_s26 = smov 12  ;;  %v160_v10 = vld [vmem:[%s296_s0 + $0x6] ss:$16 sm:%s33_s25]   ;;  %s41_s2 = smov 48 }
   0x5   :  { %26 = vrot.lane.b32.xlu0 %v25_v4, %s186_s22  ;;  %v63_v9 = vsel %vm5_vm0, %v165_v8, %v58_v7  ;;  %v161_v11 = vld [vmem:[%s296_s0 + $0x56] ss:$-24 sm:%s36_s26]   ;;  %s187_s3 = smov 80   ;;  %s71_s6 = smov 3  ;;  %vm85_vm6 = vcmask 654848   ;;  %vm104_vm7 = vcmask 523648  }
   0x6   :  { %64 = vrot.lane.b32.xlu1 %v63_v9, %s187_s3  ;;  %v39_v12 = vsel %vm19_vm1, %v161_v11, %v160_v10  ;;  %v162_v13 = vld [vmem:[%s296_s0 - $0x22] ss:$16 sm:%s41_s2]   ;;  %s74_s7 = smov 12  ;;  %s79_s12 = smov 48  ;;  %vm123_vm8 = vcmask 392448   ;;  %vm142_vm9 = vcmask 261248  }
   0x7   :  { %v44_v14 = vsel %vm5_vm0, %v162_v13, %v39_v12  ;;  %v166_v15 = vld [vmem:[%s296_s0 + $0x4] ss:$16 sm:%s71_s6]   ;;  %s188_s13 = smov 96   ;;  %v168_v18 = vld [vmem:[%s296_s0 - $0x24] ss:$16 sm:%s79_s12]   ;;  %s90_s16 = smov 3 }
   0x8   :  { %v167_v16 = vld [vmem:[%s296_s0 + $0x54] ss:$-24 sm:%s74_s7]   ;;  %s93_s17 = smov 12  ;;  %v169_v20 = vld [vmem:[%s296_s0 + $0x3] ss:$16 sm:%s90_s16]   ;;  %s98_s22 = smov 48 }
   0x9   :  { %45 = vrot.lane.b32.xlu0 %v44_v14, %s188_s13  ;;  %v77_v17 = vsel %vm19_vm1, %v167_v16, %v166_v15  ;;  %v170_v21 = vld [vmem:[%s296_s0 + $0x53] ss:$-24 sm:%s93_s17]   ;;  %s189_s23 = smov 64   ;;  %s109_s26 = smov 3 }
   0xa   :  { %v82_v19 = vsel %vm5_vm0, %v168_v18, %v77_v17  ;;  %v96_v22 = vsel %vm19_vm1, %v170_v21, %v169_v20  ;;  %v171_v23 = vld [vmem:[%s296_s0 - $0x25] ss:$16 sm:%s98_s22]   ;;  %s112_s27 = smov 12  ;;  %v172_v25 = vld [vmem:[%s296_s0 + $0x2] ss:$16 sm:%s109_s26]   ;;  %s117_s3 = smov 48 }
   0xb   :  { %83 = vrot.lane.b32.xlu1 %v82_v19, %s189_s23  ;;  %v101_v24 = vsel %vm5_vm0, %v171_v23, %v96_v22  ;;  %v173_v26 = vld [vmem:[%s296_s0 + $0x52] ss:$-24 sm:%s112_s27]   ;;  %s190_s4 = smov 48   ;;  %s128_s7 = smov 3 }
   0xc   :  { %v115_v27 = vsel %vm19_vm1, %v173_v26, %v172_v25  ;;  %v174_v28 = vld [vmem:[%s296_s0 - $0x26] ss:$16 sm:%s117_s3]   ;;  %s131_s8 = smov 12  ;;  %v175_v30 = vld [vmem:[%s296_s0 + $0x1] ss:$16 sm:%s128_s7]   ;;  %s136_s13 = smov 48 }
   0xd   :  { %102 = vrot.lane.b32.xlu0 %v101_v24, %s190_s4  ;;  %v120_v29 = vsel %vm5_vm0, %v174_v28, %v115_v27  ;;  %v176_v31 = vld [vmem:[%s296_s0 + $0x51] ss:$-24 sm:%s131_s8]   ;;  %s191_s14 = smov 32   ;;  %v2_v34 = vld [vmem:[%s296_s0] ss:$8 sm:$0xf]  }
   0xe   :  { %v134_v32 = vsel %vm19_vm1, %v176_v31, %v175_v30  ;;  %v177_v33 = vld [vmem:[%s296_s0 - $0x27] ss:$16 sm:%s136_s13]   ;;  %s3_s19 = smov 48 }
   0xf   :  { %121 = vrot.lane.b32.xlu1 %v120_v29, %s191_s14  ;;  %v139_v35 = vsel %vm5_vm0, %v177_v33, %v134_v32  ;;  %v4_v36 = vld [vmem:[%s296_s0] ss:$8 sm:%s3_s19]   ;;  %s192_s0 = smov 16  }
  0x10   :  { %v6_v37 = vsel %vm5_vm0, %v4_v36, %v2_v34 }
  0x11   :  { %140 = vrot.lane.b32.xlu0 %v139_v35, %s192_s0  ;;  %8 = vst.msk [vmem:[#allocation0] ss:$8 sm:$0x3] %vm7_vm2, %v6_v37   ;;  %10 = vst.msk [vmem:[#allocation0 - $0xf] ss:$8 sm:$0xc] %vm7_vm2, %v6_v37  }
  0x12   :  { %12 = vst.msk [vmem:[#allocation0 - $0x1e] ss:$8 sm:$0x30] %vm7_vm2, %v6_v37  }
  0x77   :  { %v27_v38 = vpop.permute.xlu0 %26  }
  0x78   :  { %29 = vst.msk [vmem:[#allocation0] sm:$0x7] %vm28_vm3, %v27_v38   ;;  %31 = vst.msk [vmem:[#allocation0 + $0x5] sm:$0x38] %vm28_vm3, %v27_v38   ;;  %v65_v39 = vpop.permute.xlu1 %64  }
  0x7b   :  { %v46_v40 = vpop.permute.xlu0 %45  }
  0x7c   :  { %48 = vst.msk [vmem:[#allocation0] sm:$0x7] %vm47_vm4, %v46_v40   ;;  %50 = vst.msk [vmem:[#allocation0 + $0x5] sm:$0x38] %vm47_vm4, %v46_v40  }
  0x7d   :  { %67 = vst.msk [vmem:[#allocation0] sm:$0x7] %vm66_vm5, %v65_v39   ;;  %69 = vst.msk [vmem:[#allocation0 + $0x5] sm:$0x38] %vm66_vm5, %v65_v39   ;;  %v84_v41 = vpop.permute.xlu1 %83  }
  0x7e   :  { %86 = vst.msk [vmem:[#allocation0] sm:$0x7] %vm85_vm6, %v84_v41   ;;  %88 = vst.msk [vmem:[#allocation0 + $0x5] sm:$0x38] %vm85_vm6, %v84_v41  }
  0x7f   :  { %v103_v42 = vpop.permute.xlu0 %102  }
  0x80   :  { %105 = vst.msk [vmem:[#allocation0] sm:$0x7] %vm104_vm7, %v103_v42   ;;  %107 = vst.msk [vmem:[#allocation0 + $0x5] sm:$0x38] %vm104_vm7, %v103_v42  }
  0x81   :  { %v122_v43 = vpop.permute.xlu1 %121  }
  0x82   :  { %124 = vst.msk [vmem:[#allocation0] sm:$0x7] %vm123_vm8, %v122_v43   ;;  %126 = vst.msk [vmem:[#allocation0 + $0x5] sm:$0x38] %vm123_vm8, %v122_v43  }
  0x83   :  { %v141_v44 = vpop.permute.xlu0 %140  }
  0x84   :  { %143 = vst.msk [vmem:[#allocation0] sm:$0x7] %vm142_vm9, %v141_v44   ;;  %145 = vst.msk [vmem:[#allocation0 + $0x5] sm:$0x38] %vm142_vm9, %v141_v44  }
  0x8b   :  { %v149_v45 = vld [vmem:[#allocation0] sm:$0xf]  ;;  %v153_v46 = vld [vmem:[#allocation0 + $0x8] sm:$0xf] }
  0x8c   :  { %151 = vst [vmem:[%s297_s1] sm:$0xf] %v149_v45  ;;  %178 = vst [vmem:[%s297_s1 + $0x4] sm:$0xf] %v153_v46 }

// kernel: basic_decoder2_forward.1
= control target key start
LH: loop header
LB: loop body
LE: loop exit
PB: predicated region body
PF: predicated region fallthrough
CT: control target
= control target key end

     0   :  { %v5838_v0 = vmov 0.0   ;;  %s5839_s11 = smov 17   ;;  %s5841_s12 = smov 15   ;;  %v5847_v9 = vmov 0   ;;  %v54_v12 = vlaneseq  ;;  %vm141_vm0 = vcmask 138240   ;;  %s7240_s0 = inlined_call_operand.vmem [shape: f32[3,256], index: 0, kind: input, shape index: {}]   ;;  %s7241_s1 = inlined_call_operand.vmem [shape: f32[32,288], index: 1, kind: input, shape index: {}]   ;;  %s7242_s2 = inlined_call_operand.vmem [shape: f32[32,1], index: 2, kind: input, shape index: {}]   ;;  %s7243_s3 = inlined_call_operand.vmem [shape: f32[32,288], index: 3, kind: input, shape index: {}]   ;;  %s7244_s4 = inlined_call_operand.vmem [shape: f32[32,1], index: 4, kind: input, shape index: {}]   ;;  %s7245_s5 = inlined_call_operand.vmem [shape: f32[32,288], index: 5, kind: input, shape index: {}]   ;;  %s7246_s6 = inlined_call_operand.vmem [shape: f32[32,1], index: 6, kind: input, shape index: {}]   ;;  %s7247_s7 = inlined_call_operand.vmem [shape: f32[2,288], index: 7, kind: input, shape index: {}]   ;;  %s7248_s8 = inlined_call_operand.vmem [shape: f32[2,1], index: 8, kind: input, shape index: {}]   ;;  %s7249_s9 = inlined_call_operand.vmem [shape: f32[2,256], index: 9, kind: output, shape index: {}]  }
   0x1   :  { %32 = vst [vmem:[#allocation2] sm:$0xff] %v5838_v0  ;;  %33 = vst [vmem:[#allocation2 + $0x8] sm:$0xff] %v5838_v0  ;;  %v48_v1 = vld [vmem:[%s7240_s0] sm:$0x77]  ;;  %1027 = vmatprep.mubr.f32.mxu1 %v5838_v0  ;;  %4821 = vrot.lane.b32.xlu0 %v5838_v0, %s5839_s11  ;;  %s5840_s0 = smov 16   ;;  %s5842_s13 = smov 1  }
   0x2   :  { %34 = vst [vmem:[#allocation2 + $0x10] sm:$0xff] %v5838_v0  ;;  %v50_v2 = vcombine.high %v48_v1, %v48_v1  ;;  %52 = vst [vmem:[#allocation2 + $0x8] sm:$0x7] %v48_v1  ;;  %4826 = vrot.lane.b32.xlu1 %v5838_v0, %s5839_s11  ;;  %s5843_s14 = smov 127   ;;  %s5844_s15 = smov 113   ;;  %v754_v8 = vld [vmem:[%s7241_s1 + $0x8] sm:$0xff]  ;;  %5060 = vset.pattern.permute.xlu0 %v5847_v9 }
   0x3   :  { %s5845_s16 = smov 112   ;;  %s5846_s17 = smov 111   ;;  %938 = vmatprep.mubr.f32.mxu0 %v754_v8  ;;  %v837_v10 = vld [vmem:[%s7242_s2] sm:$0xff]  ;;  %5061 = vset.pattern.permute.xlu1 %v5847_v9  ;;  %v838_v11 = vld [vmem:[%s7242_s2 + $0x8] sm:$0xff]  ;;  %v840_v13 = vld [vmem:[%s7242_s2 + $0x18] sm:$0xff]  ;;  %v6017_v15 = vand.u32 127, %v54_v12 }
   0x4   :  { %53 = vst [vmem:[#allocation2 + $0x10] sm:$0x7] %v50_v2  ;;  %v839_v14 = vld [vmem:[%s7242_s2 + $0x10] sm:$0xff]  ;;  %vm222_vm5 = vcmask 130048   ;;  %vm307_vm6 = vcmask 121856   ;;  %vm388_vm11 = vcmask 7168  }
   0x5   :  { %4836 = vrot.lane.b32.xlu0 %v5838_v0, %s5839_s11  ;;  %v6020_v16 = vadd.s32 128, %v6017_v15  ;;  %v61_v20 = vand.u32 15, %v6017_v15  ;;  %vm485_vm12 = vcmask 1039360   ;;  %vm566_vm13 = vcmask 924672  }
   0x6   :  { %4831 = vrot.lane.b32.xlu1 %v5838_v0, %s5839_s11  ;;  %vm7252_vm14 = vcmask 916480   ;;  %vm7251_vm15 = vcmask 908288  }
   0x7   :  { %v68_v19 = vand.u32 15, %v6020_v16  ;;  %v93_v24 = vadd.s32 4294967295, %v61_v20  ;;  %v259_v16 = vadd.s32 1, %v61_v20 }
   0x9   :  { %v5915_v3 = vld [vmem:[#allocation2 + $0x8] sm:$0xff]  ;;  %v94_v23 = vadd.s32 4294967295, %v68_v19  ;;  %vm95_vm2 = vcmp.ge.s32.totalorder %v93_v24, 0  ;;  %vm263_vm9 = vcmp.lt.s32.totalorder %v259_v16, 16 }
   0xa   :  { %4841 = vrot.lane.b32.xlu1 %v5838_v0, %s5839_s11  ;;  %v4950_v7 = vpack.i.bf16 %v5838_v0, %v5915_v3  ;;  %vm6040_vm4 = vmpackc.low %vm95_vm2, %vm95_vm2 }
   0xb   :  { %v5919_v4 = vld [vmem:[#allocation2 + $0x10] sm:$0xff]  ;;  %vm96_vm1 = vcmp.ge.s32.totalorder %v94_v23, 0  ;;  %vm6076_vm10 = vmpackc.low %vm263_vm9, %vm263_vm9 }
   0xc   :  { %v4850_v5 = vpack.i.bf16 %v5919_v4, %v5915_v3  ;;  %v4940_v6 = vpack.i.bf16 %v5838_v0, %v5919_v4  ;;  %vm6033_vm3 = vmpackc.low %vm96_vm1, %vm96_vm1  ;;  %vm7250_vm1 = vcmask 261120  }
   0xe   :  { %4851 = vrot.lane.b32.xlu0 %v4850_v5, %s5839_s11  ;;  %4846 = vrot.lane.b32.xlu1 %v5838_v0, %s5840_s0 }
  0x12   :  { %4856 = vrot.lane.b32.xlu0 %v4850_v5, %s5840_s0  ;;  %4866 = vrot.lane.b32.xlu1 %v5838_v0, %s5840_s0 }
  0x16   :  { %4861 = vrot.lane.b32.xlu0 %v5838_v0, %s5840_s0  ;;  %4876 = vrot.lane.b32.xlu1 %v5838_v0, %s5840_s0 }
  0x1a   :  { %4871 = vrot.lane.b32.xlu0 %v5838_v0, %s5840_s0  ;;  %4886 = vrot.lane.b32.xlu1 %v5838_v0, %s5841_s12 }
  0x1e   :  { %4881 = vrot.lane.b32.xlu0 %v4850_v5, %s5841_s12  ;;  %4896 = vrot.lane.b32.xlu1 %v5838_v0, %s5841_s12 }
  0x22   :  { %4891 = vrot.lane.b32.xlu0 %v5838_v0, %s5841_s12  ;;  %4906 = vrot.lane.b32.xlu1 %v5838_v0, %s5841_s12 }
  0x26   :  { %4901 = vrot.lane.b32.xlu0 %v5838_v0, %s5841_s12  ;;  %4916 = vrot.lane.b32.xlu1 %v5838_v0, %s5842_s13 }
  0x2a   :  { %4911 = vrot.lane.b32.xlu0 %v4850_v5, %s5842_s13  ;;  %4926 = vrot.lane.b32.xlu1 %v5838_v0, %s5842_s13 }
  0x2e   :  { %4921 = vrot.lane.b32.xlu0 %v5838_v0, %s5842_s13  ;;  %4936 = vrot.lane.b32.xlu1 %v5838_v0, %s5842_s13 }
  0x32   :  { %4931 = vrot.lane.b32.xlu0 %v5838_v0, %s5842_s13  ;;  %4946 = vrot.lane.b32.xlu1 %v5838_v0, %s5843_s14 }
  0x36   :  { %4941 = vrot.lane.b32.xlu0 %v4940_v6, %s5843_s14  ;;  %4956 = vrot.lane.b32.xlu1 %v5838_v0, %s5843_s14 }
  0x3a   :  { %4951 = vrot.lane.b32.xlu0 %v4950_v7, %s5843_s14  ;;  %4966 = vrot.lane.b32.xlu1 %v5838_v0, %s5843_s14 }
  0x3e   :  { %4961 = vrot.lane.b32.xlu0 %v5838_v0, %s5843_s14  ;;  %4976 = vrot.lane.b32.xlu1 %v5838_v0, %s5844_s15 }
  0x42   :  { %4971 = vrot.lane.b32.xlu0 %v4940_v6, %s5844_s15  ;;  %4986 = vrot.lane.b32.xlu1 %v5838_v0, %s5844_s15 }
  0x46   :  { %4981 = vrot.lane.b32.xlu0 %v4950_v7, %s5844_s15  ;;  %4996 = vrot.lane.b32.xlu1 %v5838_v0, %s5844_s15 }
  0x4a   :  { %4991 = vrot.lane.b32.xlu0 %v5838_v0, %s5844_s15  ;;  %5006 = vrot.lane.b32.xlu1 %v5838_v0, %s5845_s16 }
  0x4e   :  { %5001 = vrot.lane.b32.xlu0 %v4940_v6, %s5845_s16  ;;  %5016 = vrot.lane.b32.xlu1 %v4940_v6, %s5846_s17 }
  0x52   :  { %5011 = vrot.lane.b32.xlu0 %v4950_v7, %s5845_s16  ;;  %5026 = vrot.lane.b32.xlu1 %v4950_v7, %s5846_s17 }
  0x56   :  { %5021 = vrot.lane.b32.xlu0 %v5838_v0, %s5846_s17  ;;  %5036 = vrot.lane.b32.xlu1 %v5838_v0, %s5845_s16 }
  0x5a   :  { %5031 = vrot.lane.b32.xlu0 %v5838_v0, %s5845_s16  ;;  %5046 = vrot.lane.b32.xlu1 %v5838_v0, %s5846_s17 }
  0x5e   :  { %5041 = vrot.lane.b32.xlu0 %v5838_v0, %s5845_s16  ;;  %5056 = vrot.lane.b32.xlu1 %v5838_v0, %s5846_s17 }
  0x62   :  { %5051 = vrot.lane.b32.xlu0 %v5838_v0, %s5846_s17  ;;  %848 = vperm.xlu1 %5061, %v838_v11  }
  0x66   :  { %843 = vperm.xlu0 %5060, %v837_v10   ;;  %853 = vperm.xlu1 %5061, %v839_v14  }
  0x6a   :  { %858 = vperm.xlu0 %5060, %v840_v13  }
  0x73   :  { %v4822_v17 = vpop.permute.xlu0 %4821 }
  0x74   :  { %v4827_v18 = vpop.permute.xlu1 %4826  ;;  %v4824_v25 = vunpack.i.h.bf16 %v4822_v17  ;;  %v4823_v26 = vunpack.i.l.bf16 %v4822_v17  ;;  %v260_v17 = vadd.s32 1, %v68_v19 }
  0x75   :  { %v4829_v27 = vunpack.i.h.bf16 %v4827_v18  ;;  %v4828_v33 = vunpack.i.l.bf16 %v4827_v18 }
  0x76   :  { %v145_v38 = vsel %vm141_vm0, %v4823_v26, %v4824_v25  ;;  %vm264_vm7 = vcmp.lt.s32.totalorder %v260_v17, 16 }
  0x77   :  { %v4837_v22 = vpop.permute.xlu0 %4836  ;;  %v144_v39 = vsel %vm141_vm0, %v4829_v27, %v4823_v26  ;;  %vm6068_vm8 = vmpackc.low %vm264_vm7, %vm264_vm7 }
  0x78   :  { %v4832_v21 = vpop.permute.xlu1 %4831  ;;  %v4839_v29 = vunpack.i.h.bf16 %v4837_v22  ;;  %v4838_v30 = vunpack.i.l.bf16 %v4837_v22 }
  0x79   :  { %v4834_v31 = vunpack.i.h.bf16 %v4832_v21  ;;  %v4833_v32 = vunpack.i.l.bf16 %v4832_v21 }
  0x7a   :  { %v149_v40 = vsel %vm141_vm0, %v4838_v30, %v4839_v29 }
  0x7b   :  { %v147_v41 = vsel %vm141_vm0, %v4833_v32, %v4834_v31 }
  0x7c   :  { %v4842_v28 = vpop.permute.xlu1 %4841  ;;  %v4379_v58 = vpack.c.bf16 %v149_v40, %v147_v41 }
  0x7d   :  { %v4844_v42 = vunpack.i.h.bf16 %v4842_v28  ;;  %v4843_v43 = vunpack.i.l.bf16 %v4842_v28 }
  0x7f   :  { %v148_v56 = vsel %vm141_vm0, %v4844_v42, %v4838_v30  ;;  %v146_v57 = vsel %vm141_vm0, %v4843_v43, %v4833_v32 }
  0x80   :  { %v4852_v34 = vpop.permute.xlu0 %4851  ;;  %v4847_v37 = vpop.permute.xlu1 %4846  ;;  %v4382_v1 = vpack.c.bf16 %v148_v56, %v146_v57 }
  0x81   :  { %v4854_v35 = vunpack.i.h.bf16 %v4852_v34  ;;  %v4853_v36 = vunpack.i.l.bf16 %v4852_v34  ;;  %v4849_v44 = vunpack.i.h.bf16 %v4847_v37  ;;  %v4848_v45 = vunpack.i.l.bf16 %v4847_v37 }
  0x83   :  { %v143_v46 = vsel %vm141_vm0, %v4853_v36, %v4854_v35  ;;  %v142_v48 = vsel %vm141_vm0, %v4828_v33, %v4853_v36  ;;  %v226_v60 = vsel %vm222_vm5, %v4848_v45, %v4849_v44 }
  0x84   :  { %v4857_v49 = vpop.permute.xlu0 %4856  ;;  %v4373_v50 = vpack.c.bf16 %v145_v38, %v143_v46  ;;  %v4376_v51 = vpack.c.bf16 %v144_v39, %v142_v48  ;;  %v4867_v55 = vpop.permute.xlu1 %4866 }
  0x85   :  { %v4859_v53 = vunpack.i.h.bf16 %v4857_v49  ;;  %v4858_v54 = vunpack.i.l.bf16 %v4857_v49  ;;  %v4869_v5 = vunpack.i.h.bf16 %v4867_v55  ;;  %v4868_v6 = vunpack.i.l.bf16 %v4867_v55 }
  0x86   :  { %4375 = vmatprep.subr.msk.bf16.mxu0 %vm6033_vm3, %v4373_v50 }
  0x87   :  { %4378 = vmatpush1.bf16.msk.msra.mxu0 %vm6040_vm4, %v4376_v51  ;;  %v224_v59 = vsel %vm222_vm5, %v4858_v54, %v4859_v53  ;;  %v228_v25 = vsel %vm222_vm5, %v4868_v6, %v4869_v5 }
  0x88   :  { %v4862_v61 = vpop.permute.xlu0 %4861  ;;  %4381 = vmatprep.subr.msk.bf16.mxu0 %vm6033_vm3, %v4379_v58  ;;  %v4877_v2 = vpop.permute.xlu1 %4876  ;;  %v4385_v7 = vpack.c.bf16 %v226_v60, %v224_v59 }
  0x89   :  { %v4864_v62 = vunpack.i.h.bf16 %v4862_v61  ;;  %v4863_v63 = vunpack.i.l.bf16 %v4862_v61  ;;  %v4879_v8 = vunpack.i.h.bf16 %v4877_v2  ;;  %v4878_v9 = vunpack.i.l.bf16 %v4877_v2 }
  0x8b   :  { %4384 = vmatpush1.bf16.msk.msra.mxu0 %vm6040_vm4, %v4382_v1  ;;  %v223_v10 = vsel %vm222_vm5, %v4863_v63, %v4858_v54  ;;  %v225_v11 = vsel %vm222_vm5, %v4864_v62, %v4848_v45  ;;  %v227_v27 = vsel %vm222_vm5, %v4878_v9, %v4868_v6 }
  0x8c   :  { %v4872_v13 = vpop.permute.xlu0 %4871  ;;  %4386 = vmatprep.subr.bf16.mxu0 %v4385_v7  ;;  %v4387_v14 = vpack.c.bf16 %v225_v11, %v223_v10  ;;  %v4887_v22 = vpop.permute.xlu1 %4886 }
  0x8d   :  { %v4874_v18 = vunpack.i.h.bf16 %v4872_v13  ;;  %v4873_v21 = vunpack.i.l.bf16 %v4872_v13  ;;  %v4889_v23 = vunpack.i.h.bf16 %v4887_v22  ;;  %v4888_v24 = vunpack.i.l.bf16 %v4887_v22 }
  0x8f   :  { %4388 = vmatpush1.bf16.msra.mxu0 %v4387_v14  ;;  %v230_v26 = vsel %vm222_vm5, %v4873_v21, %v4874_v18  ;;  %v229_v28 = vsel %vm222_vm5, %v4879_v8, %v4873_v21  ;;  %v311_v19 = vsel %vm307_vm6, %v4888_v24, %v4889_v23 }
  0x90   :  { %v4882_v29 = vpop.permute.xlu0 %4881  ;;  %v4389_v30 = vpack.c.bf16 %v230_v26, %v228_v25  ;;  %v4391_v31 = vpack.c.bf16 %v229_v28, %v227_v27  ;;  %v4897_v34 = vpop.permute.xlu1 %4896 }
  0x91   :  { %v4884_v32 = vunpack.i.h.bf16 %v4882_v29  ;;  %v4883_v33 = vunpack.i.l.bf16 %v4882_v29  ;;  %v4899_v20 = vunpack.i.h.bf16 %v4897_v34  ;;  %v4898_v41 = vunpack.i.l.bf16 %v4897_v34 }
  0x92   :  { %4390 = vmatprep.subr.bf16.mxu0 %v4389_v30 }
  0x93   :  { %v309_v35 = vsel %vm307_vm6, %v4883_v33, %v4884_v32  ;;  %4392 = vmatpush1.bf16.msra.mxu0 %v4391_v31  ;;  %v313_v56 = vsel %vm307_vm6, %v4898_v41, %v4899_v20 }
  0x94   :  { %v4892_v37 = vpop.permute.xlu0 %4891  ;;  %v4393_v38 = vpack.c.bf16 %v311_v19, %v309_v35  ;;  %v4907_v15 = vpop.permute.xlu1 %4906  ;;  %v4419_v35 = vpack.c.bf16 %v5838_v0, %v5915_v3  ;;  %v5848_v3 = vmov 0.0|0.0  }
  0x95   :  { %v4894_v39 = vunpack.i.h.bf16 %v4892_v37  ;;  %v4893_v40 = vunpack.i.l.bf16 %v4892_v37  ;;  %v4909_v44 = vunpack.i.h.bf16 %v4907_v15  ;;  %v4908_v45 = vunpack.i.l.bf16 %v4907_v15 }
  0x96   :  { %4395 = vmatprep.subr.msk.bf16.mxu0 %vm6068_vm8, %v4393_v38 }
  0x97   :  { %v310_v42 = vsel %vm307_vm6, %v4894_v39, %v4888_v24  ;;  %v308_v43 = vsel %vm307_vm6, %v4893_v40, %v4883_v33  ;;  %v312_v57 = vsel %vm307_vm6, %v4908_v45, %v4898_v41  ;;  %v4417_v33 = vpack.c.bf16 %v5838_v0, %v5919_v4 }
  0x98   :  { %v4902_v48 = vpop.permute.xlu0 %4901  ;;  %v4396_v49 = vpack.c.bf16 %v310_v42, %v308_v43  ;;  %v4917_v53 = vpop.permute.xlu1 %4916 }
  0x99   :  { %v4904_v50 = vunpack.i.h.bf16 %v4902_v48  ;;  %v4903_v51 = vunpack.i.l.bf16 %v4902_v48  ;;  %v4919_v54 = vunpack.i.h.bf16 %v4917_v53  ;;  %v4918_v55 = vunpack.i.l.bf16 %v4917_v53 }
  0x9a   :  { %4398 = vmatpush1.bf16.msk.msra.mxu0 %vm6076_vm10, %v4396_v49 }
  0x9b   :  { %v314_v58 = vsel %vm307_vm6, %v4909_v44, %v4903_v51  ;;  %v315_v59 = vsel %vm307_vm6, %v4903_v51, %v4904_v50  ;;  %v392_v63 = vsel %vm388_vm11, %v4918_v55, %v4919_v54 }
  0x9c   :  { %v4912_v60 = vpop.permute.xlu0 %4911  ;;  %v4399_v61 = vpack.c.bf16 %v315_v59, %v313_v56  ;;  %v4402_v62 = vpack.c.bf16 %v314_v58, %v312_v57  ;;  %v4927_v5 = vpop.permute.xlu1 %4926 }
  0x9d   :  { %v4914_v1 = vunpack.i.h.bf16 %v4912_v60  ;;  %v4913_v2 = vunpack.i.l.bf16 %v4912_v60  ;;  %v4929_v13 = vunpack.i.h.bf16 %v4927_v5  ;;  %v4928_v14 = vunpack.i.l.bf16 %v4927_v5 }
  0x9e   :  { %4401 = vmatprep.subr.msk.bf16.mxu0 %vm6068_vm8, %v4399_v61 }
  0x9f   :  { %v390_v6 = vsel %vm388_vm11, %v4913_v2, %v4914_v1  ;;  %4404 = vmatpush1.bf16.msk.msra.mxu0 %vm6076_vm10, %v4402_v62  ;;  %v394_v28 = vsel %vm388_vm11, %v4928_v14, %v4929_v13 }
  0xa0   :  { %v4922_v7 = vpop.permute.xlu0 %4921  ;;  %v4405_v8 = vpack.c.bf16 %v392_v63, %v390_v6  ;;  %v4937_v11 = vpop.permute.xlu1 %4936 }
  0xa1   :  { %v4924_v9 = vunpack.i.h.bf16 %v4922_v7  ;;  %v4923_v10 = vunpack.i.l.bf16 %v4922_v7  ;;  %v4939_v21 = vunpack.i.h.bf16 %v4937_v11  ;;  %v4938_v22 = vunpack.i.l.bf16 %v4937_v11 }
  0xa2   :  { %4407 = vmatprep.subr.msk.bf16.mxu0 %vm6033_vm3, %v4405_v8 }
  0xa3   :  { %v391_v17 = vsel %vm388_vm11, %v4924_v9, %v4918_v55  ;;  %v389_v18 = vsel %vm388_vm11, %v4923_v10, %v4913_v2  ;;  %v393_v29 = vsel %vm388_vm11, %v4938_v22, %v4928_v14 }
  0xa4   :  { %v4932_v23 = vpop.permute.xlu0 %4931  ;;  %v4408_v24 = vpack.c.bf16 %v391_v17, %v389_v18  ;;  %v4947_v27 = vpop.permute.xlu1 %4946 }
  0xa5   :  { %v4934_v25 = vunpack.i.h.bf16 %v4932_v23  ;;  %v4933_v26 = vunpack.i.l.bf16 %v4932_v23  ;;  %v4949_v37 = vunpack.i.h.bf16 %v4947_v27  ;;  %v4948_v38 = vunpack.i.l.bf16 %v4947_v27 }
  0xa6   :  { %4410 = vmatpush1.bf16.msk.msra.mxu0 %vm6040_vm4, %v4408_v24 }
  0xa7   :  { %v395_v30 = vsel %vm388_vm11, %v4939_v21, %v4933_v26  ;;  %v396_v31 = vsel %vm388_vm11, %v4933_v26, %v4934_v25  ;;  %v489_v42 = vsel %vm485_vm12, %v4948_v38, %v4949_v37 }
  0xa8   :  { %v4942_v16 = vpop.permute.xlu0 %4941  ;;  %v4411_v19 = vpack.c.bf16 %v396_v31, %v394_v28  ;;  %v4414_v32 = vpack.c.bf16 %v395_v30, %v393_v29  ;;  %v4957_v34 = vpop.permute.xlu1 %4956 }
  0xa9   :  { %v4944_v39 = vunpack.i.h.bf16 %v4942_v16  ;;  %v4943_v40 = vunpack.i.l.bf16 %v4942_v16  ;;  %v4959_v45 = vunpack.i.h.bf16 %v4957_v34  ;;  %v4958_v48 = vunpack.i.l.bf16 %v4957_v34 }
  0xaa   :  { %4413 = vmatprep.subr.msk.bf16.mxu0 %vm6033_vm3, %v4411_v19 }
  0xab   :  { %4416 = vmatpush1.bf16.msk.msra.mxu0 %vm6040_vm4, %v4414_v32  ;;  %v487_v43 = vsel %vm485_vm12, %v4943_v40, %v4944_v39  ;;  %v491_v62 = vsel %vm485_vm12, %v4958_v48, %v4959_v45 }
  0xac   :  { %v4952_v15 = vpop.permute.xlu0 %4951  ;;  %4418 = vmatprep.subr.bf16.mxu0 %v4417_v33  ;;  %v4967_v20 = vpop.permute.xlu1 %4966  ;;  %v4425_v56 = vpack.c.bf16 %v489_v42, %v487_v43 }
  0xad   :  { %v4954_v41 = vunpack.i.h.bf16 %v4952_v15  ;;  %v4953_v4 = vunpack.i.l.bf16 %v4952_v15  ;;  %v4969_v55 = vunpack.i.h.bf16 %v4967_v20  ;;  %v4968_v60 = vunpack.i.l.bf16 %v4967_v20 }
  0xaf   :  { %4420 = vmatpush1.bf16.msra.mxu0 %v4419_v35  ;;  %v488_v53 = vsel %vm485_vm12, %v4954_v41, %v4948_v38  ;;  %v486_v54 = vsel %vm485_vm12, %v4953_v4, %v4943_v40  ;;  %v490_v10 = vsel %vm485_vm12, %v4968_v60, %v4958_v48 }
  0xb0   :  { %v4962_v44 = vpop.permute.xlu0 %4961  ;;  %4422 = vmatprep.subr.bf16.mxu0 %v5848_v3  ;;  %v4977_v51 = vpop.permute.xlu1 %4976  ;;  %v4428_v2 = vpack.c.bf16 %v488_v53, %v486_v54 }
  0xb1   :  { %v4964_v49 = vunpack.i.h.bf16 %v4962_v44  ;;  %v4963_v50 = vunpack.i.l.bf16 %v4962_v44  ;;  %v4979_v58 = vunpack.i.h.bf16 %v4977_v51  ;;  %v4978_v59 = vunpack.i.l.bf16 %v4977_v51 }
  0xb3   :  { %v493_v57 = vsel %vm485_vm12, %v4963_v50, %v4964_v49  ;;  %4424 = vmatpush1.bf16.msra.mxu0 %v5848_v3  ;;  %v492_v6 = vsel %vm485_vm12, %v4969_v55, %v4963_v50  ;;  %v570_v8 = vsel %vm566_vm13, %v4978_v59, %v4979_v58 }
  0xb4   :  { %v4972_v61 = vpop.permute.xlu0 %4971  ;;  %4427 = vmatprep.subr.msk.bf16.mxu0 %vm6068_vm8, %v4425_v56  ;;  %v4987_v5 = vpop.permute.xlu1 %4986  ;;  %v4431_v7 = vpack.c.bf16 %v493_v57, %v491_v62  ;;  %v4434_v17 = vpack.c.bf16 %v492_v6, %v490_v10 }
  0xb5   :  { %v4974_v63 = vunpack.i.h.bf16 %v4972_v61  ;;  %v4973_v1 = vunpack.i.l.bf16 %v4972_v61  ;;  %v4989_v21 = vunpack.i.h.bf16 %v4987_v5  ;;  %v4988_v22 = vunpack.i.l.bf16 %v4987_v5 }
  0xb7   :  { %v568_v9 = vsel %vm566_vm13, %v4973_v1, %v4974_v63  ;;  %4430 = vmatpush1.bf16.msk.msra.mxu0 %vm6076_vm10, %v4428_v2  ;;  %v572_v33 = vsel %vm566_vm13, %v4988_v22, %v4989_v21 }
  0xb8   :  { %v4982_v11 = vpop.permute.xlu0 %4981  ;;  %4433 = vmatprep.subr.msk.bf16.mxu0 %vm6068_vm8, %v4431_v7  ;;  %v4997_v18 = vpop.permute.xlu1 %4996  ;;  %v4437_v23 = vpack.c.bf16 %v570_v8, %v568_v9 }
  0xb9   :  { %v4984_v13 = vunpack.i.h.bf16 %v4982_v11  ;;  %v4983_v14 = vunpack.i.l.bf16 %v4982_v11  ;;  %v4999_v26 = vunpack.i.h.bf16 %v4997_v18  ;;  %v4998_v27 = vunpack.i.l.bf16 %v4997_v18 }
  0xbb   :  { %v569_v24 = vsel %vm566_vm13, %v4984_v13, %v4978_v59  ;;  %v567_v25 = vsel %vm566_vm13, %v4983_v14, %v4973_v1  ;;  %4436 = vmatpush1.bf16.msk.msra.mxu0 %vm6076_vm10, %v4434_v17  ;;  %v571_v34 = vsel %vm566_vm13, %v4998_v27, %v4988_v22 }
  0xbc   :  { %v4992_v28 = vpop.permute.xlu0 %4991  ;;  %4439 = vmatprep.subr.msk.bf16.mxu0 %vm6033_vm3, %v4437_v23  ;;  %v4440_v29 = vpack.c.bf16 %v569_v24, %v567_v25  ;;  %v5007_v16 = vpop.permute.xlu1 %5006 }
  0xbd   :  { %v4994_v30 = vunpack.i.h.bf16 %v4992_v28  ;;  %v4993_v31 = vunpack.i.l.bf16 %v4992_v28  ;;  %v5009_v19 = vunpack.i.h.bf16 %v5007_v16  ;;  %v5008_v32 = vunpack.i.l.bf16 %v5007_v16 }
  0xbf   :  { %v573_v35 = vsel %vm566_vm13, %v4999_v26, %v4993_v31  ;;  %v574_v37 = vsel %vm566_vm13, %v4993_v31, %v4994_v30  ;;  %4442 = vmatpush1.bf16.msk.msra.mxu0 %vm6040_vm4, %v4440_v29  ;;  %v651_v4 = vsel %vm7252_vm14, %v5008_v32, %v5009_v19 }
  0xc0   :  { %v5002_v38 = vpop.permute.xlu0 %5001  ;;  %v4443_v39 = vpack.c.bf16 %v574_v37, %v572_v33  ;;  %v4446_v40 = vpack.c.bf16 %v573_v35, %v571_v34  ;;  %v5017_v41 = vpop.permute.xlu1 %5016 }
  0xc1   :  { %v5004_v15 = vunpack.i.h.bf16 %v5002_v38  ;;  %v5003_v20 = vunpack.i.l.bf16 %v5002_v38  ;;  %v5019_v49 = vunpack.i.h.bf16 %v5017_v41  ;;  %v5018_v50 = vunpack.i.l.bf16 %v5017_v41  ;;  %v757_v38 = vld [vmem:[%s7241_s1 + $0x20] sm:$0xff]  ;;  %v760_v41 = vld [vmem:[%s7241_s1 + $0x38] sm:$0xff] }
  0xc2   :  { %4445 = vmatprep.subr.msk.bf16.mxu0 %vm6033_vm3, %v4443_v39 }
  0xc3   :  { %4448 = vmatpush1.bf16.msk.msra.mxu0 %vm6040_vm4, %v4446_v40  ;;  %v649_v42 = vsel %vm7252_vm14, %v5003_v20, %v5004_v15  ;;  %v722_v63 = vsel %vm7251_vm15, %v5018_v50, %v5019_v49  ;;  %v756_v15 = vld [vmem:[%s7241_s1 + $0x18] sm:$0xff] }
  0xc4   :  { %v5012_v43 = vpop.permute.xlu0 %5011  ;;  %v4449_v44 = vpack.c.bf16 %v651_v4, %v649_v42  ;;  %v5027_v48 = vpop.permute.xlu1 %5026  ;;  %v759_v4 = vld [vmem:[%s7241_s1 + $0x30] sm:$0xff]  ;;  %v758_v42 = vld [vmem:[%s7241_s1 + $0x28] sm:$0xff] }
  0xc5   :  { %v5014_v3 = vunpack.i.h.bf16 %v5012_v43  ;;  %v5013_v45 = vunpack.i.l.bf16 %v5012_v43  ;;  %v5029_v51 = vunpack.i.h.bf16 %v5027_v48  ;;  %v5028_v53 = vunpack.i.l.bf16 %v5027_v48  ;;  %v763_v43 = vld [vmem:[%s7241_s1 + $0x50] sm:$0xff] }
  0xc6   :  { %4450 = vmatprep.subr.bf16.mxu0 %v4449_v44  ;;  %v762_v44 = vld [vmem:[%s7241_s1 + $0x48] sm:$0xff] }
  0xc7   :  { %v648_v54 = vsel %vm7252_vm14, %v5013_v45, %v5003_v20  ;;  %v650_v55 = vsel %vm7252_vm14, %v5014_v3, %v5008_v32  ;;  %v721_v2 = vsel %vm7251_vm15, %v5028_v53, %v5018_v50  ;;  %v753_v32 = vld [vmem:[%s7241_s1] sm:$0xff]  ;;  %v755_v20 = vld [vmem:[%s7241_s1 + $0x10] sm:$0xff]  ;;  %v764_v45 = vld [vmem:[%s7241_s1 + $0x58] sm:$0xff] }
  0xc8   :  { %v5022_v56 = vpop.permute.xlu0 %5021  ;;  %v4451_v57 = vpack.c.bf16 %v650_v55, %v648_v54  ;;  %v5037_v60 = vpop.permute.xlu1 %5036  ;;  %v761_v3 = vld [vmem:[%s7241_s1 + $0x40] sm:$0xff] }
  0xc9   :  { %v5024_v58 = vunpack.i.h.bf16 %v5022_v56  ;;  %v5023_v59 = vunpack.i.l.bf16 %v5022_v56  ;;  %v5039_v61 = vunpack.i.h.bf16 %v5037_v60  ;;  %v5038_v62 = vunpack.i.l.bf16 %v5037_v60 }
  0xca   :  { %4452 = vmatpush1.bf16.msra.mxu0 %v4451_v57 }
  0xcb   :  { %v724_v1 = vsel %vm7251_vm15, %v5023_v59, %v5024_v58  ;;  %v723_v5 = vsel %vm7251_vm15, %v5029_v51, %v5023_v59  ;;  %v655_v13 = vsel %vm7252_vm14, %v5038_v62, %v5039_v61 }
  0xcc   :  { %v5032_v6 = vpop.permute.xlu0 %5031  ;;  %v4457_v7 = vpack.c.bf16 %v724_v1, %v722_v63  ;;  %v4460_v8 = vpack.c.bf16 %v723_v5, %v721_v2  ;;  %v5047_v11 = vpop.permute.xlu1 %5046 }
  0xcd   :  { %v5034_v9 = vunpack.i.h.bf16 %v5032_v6  ;;  %v5033_v10 = vunpack.i.l.bf16 %v5032_v6  ;;  %v5049_v24 = vunpack.i.h.bf16 %v5047_v11  ;;  %v5048_v25 = vunpack.i.l.bf16 %v5047_v11 }
  0xce   :  { %4459 = vmatprep.subr.msk.bf16.mxu1 %vm6068_vm8, %v4457_v7 }
  0xcf   :  { %4462 = vmatpush1.bf16.msk.msra.mxu1 %vm6076_vm10, %v4460_v8  ;;  %v653_v14 = vsel %vm7252_vm14, %v5033_v10, %v5034_v9  ;;  %v726_v33 = vsel %vm7251_vm15, %v5048_v25, %v5049_v24 }
  0xd0   :  { %v5042_v17 = vpop.permute.xlu0 %5041  ;;  %v4453_v18 = vpack.c.bf16 %v655_v13, %v653_v14  ;;  %v5057_v23 = vpop.permute.xlu1 %5056 }
  0xd1   :  { %v5044_v21 = vunpack.i.h.bf16 %v5042_v17  ;;  %v5043_v22 = vunpack.i.l.bf16 %v5042_v17  ;;  %v5059_v26 = vunpack.i.h.bf16 %v5057_v23  ;;  %v5058_v27 = vunpack.i.l.bf16 %v5057_v23 }
  0xd2   :  { %4454 = vmatprep.subr.bf16.mxu0 %v4453_v18 }
  0xd3   :  { %v652_v28 = vsel %vm7252_vm14, %v5043_v22, %v5033_v10  ;;  %v654_v29 = vsel %vm7252_vm14, %v5044_v21, %v5038_v62  ;;  %v725_v34 = vsel %vm7251_vm15, %v5058_v27, %v5048_v25 }
  0xd4   :  { %v5052_v30 = vpop.permute.xlu0 %5051  ;;  %v4455_v31 = vpack.c.bf16 %v654_v29, %v652_v28 }
  0xd5   :  { %v5054_v16 = vunpack.i.h.bf16 %v5052_v30  ;;  %v5053_v19 = vunpack.i.l.bf16 %v5052_v30 }
  0xd6   :  { %4456 = vmatpush1.bf16.msra.mxu0 %v4455_v31 }
  0xd7   :  { %v727_v35 = vsel %vm7251_vm15, %v5059_v26, %v5053_v19  ;;  %v728_v37 = vsel %vm7251_vm15, %v5053_v19, %v5054_v16 }
  0xd8   :  { %v4463_v39 = vpack.c.bf16 %v728_v37, %v726_v33  ;;  %v4466_v40 = vpack.c.bf16 %v727_v35, %v725_v34 }
  0xd9   :  { %939 = vmatmul.mubr.f32.vlgmr.msra.gmra.mrb[0].mxu0 %v753_v32 }
  0xda   :  { %4465 = vmatprep.subr.msk.bf16.mxu1 %vm6068_vm8, %v4463_v39  ;;  %944 = vmatprep.mubr.f32.mxu0 %v757_v38 }
  0xdb   :  { %4468 = vmatpush1.bf16.msk.msra.mxu1 %vm6076_vm10, %v4466_v40 }
  0xdd   :  { %945 = vmatmul.mubr.f32.gmra.mrb[2].mxu0 %v756_v15 }
  0xde   :  { %4167 = vmatmul.mubr.msk.f32.vlgmr.msra.gmra.mrb[0].mxu1 %vm7250_vm1, %v755_v20  ;;  %950 = vmatprep.mubr.f32.mxu0 %v760_v41 }
  0xdf   :  { %1033 = vmatprep.mubr.f32.mxu1 %v5838_v0 }
  0xe1   :  { %951 = vmatmul.mubr.f32.gmra.mrb[4].mxu0 %v759_v4  ;;  %v849_v53 = vpop.permute.xlu1 %848 }
  0xe2   :  { %4168 = vmatmul.mubr.msk.f32.gmra.mrb[2].mxu1 %vm7250_vm1, %v758_v42  ;;  %956 = vmatprep.mubr.f32.mxu0 %v763_v43 }
  0xe3   :  { %1039 = vmatprep.mubr.f32.mxu1 %v5838_v0 }
  0xe5   :  { %957 = vmatmul.mubr.f32.gmra.mrb[6].mxu0 %v762_v44  ;;  %v844_v49 = vpop.permute.xlu0 %843  ;;  %v854_v63 = vpop.permute.xlu1 %853 }
  0xe6   :  { %4169 = vmatmul.mubr.msk.f32.gmra.mrb[4].mxu1 %vm7250_vm1, %v761_v3 }
  0xe7   :  { %1045 = vmatprep.mubr.f32.mxu1 %v5838_v0 }
  0xe9   :  { %v859_v23 = vpop.permute.xlu0 %858 }
  0xea   :  { %4170 = vmatmul.mubr.msk.f32.gmra.mrb[6].mxu1 %vm7250_vm1, %v764_v45 }
 0x1ac   :  { %v940_v48 = vpop.f32.mrb[0].mxu0 }
 0x1ad   :  { %v942_v50 = vpop.f32.mrb[1].mxu0  ;;  %v941_v51 = vadd.f32 %v940_v48, %v844_v49 }
 0x1ae   :  { %v943_v54 = vadd.f32 %v942_v50, %v844_v49 }
 0x1b0   :  { %v946_v55 = vpop.f32.mrb[2].mxu0 }
 0x1b1   :  { %v1029_v56 = vpop.f32.mrb[0].mxu1  ;;  %v948_v57 = vpop.f32.mrb[3].mxu0  ;;  %v947_v59 = vadd.f32 %v946_v55, %v849_v53 }
 0x1b2   :  { %v1030_v58 = vadd.f32 %v1029_v56, %v941_v51  ;;  %v1031_v60 = vpop.f32.mrb[1].mxu1  ;;  %v949_v62 = vadd.f32 %v948_v57, %v849_v53 }
 0x1b3   :  { %v1032_v61 = vadd.f32 %v1031_v60, %v943_v54 }
 0x1b4   :  { %v952_v1 = vpop.f32.mrb[4].mxu0 }
 0x1b5   :  { %v954_v2 = vpop.f32.mrb[5].mxu0  ;;  %v1035_v5 = vpop.f32.mrb[2].mxu1  ;;  %v1052_v6 = vadd.f32 %v1032_v61, %v1030_v58  ;;  %v953_v10 = vadd.f32 %v952_v1, %v854_v63 }
 0x1b6   :  { %v1036_v7 = vadd.f32 %v1035_v5, %v947_v59  ;;  %v1037_v8 = vpop.f32.mrb[3].mxu1  ;;  %v955_v13 = vadd.f32 %v954_v2, %v854_v63 }
 0x1b7   :  { %v1038_v9 = vadd.f32 %v1037_v8, %v949_v62  ;;  %1053 = vadd.xlane.f32.xlu1 %v1052_v6 }
 0x1b8   :  { %v958_v11 = vpop.f32.mrb[6].mxu0 }
 0x1b9   :  { %v960_v14 = vpop.f32.mrb[7].mxu0  ;;  %v1041_v17 = vpop.f32.mrb[4].mxu1  ;;  %v1055_v18 = vadd.f32 %v1038_v9, %v1036_v7  ;;  %v959_v25 = vadd.f32 %v958_v11, %v859_v23 }
 0x1ba   :  { %v1042_v21 = vadd.f32 %v1041_v17, %v953_v10  ;;  %v1043_v22 = vpop.f32.mrb[5].mxu1  ;;  %v961_v26 = vadd.f32 %v960_v14, %v859_v23 }
 0x1bb   :  { %v1044_v24 = vadd.f32 %v1043_v22, %v955_v13  ;;  %1056 = vadd.xlane.f32.xlu0 %v1055_v18 }
 0x1bd   :  { %v1047_v27 = vpop.f32.mrb[6].mxu1  ;;  %v1058_v28 = vadd.f32 %v1044_v24, %v1042_v21 }
 0x1be   :  { %v1048_v29 = vadd.f32 %v1047_v27, %v959_v25  ;;  %v1049_v30 = vpop.f32.mrb[7].mxu1 }
 0x1bf   :  { %v1050_v31 = vadd.f32 %v1049_v30, %v961_v26  ;;  %1059 = vadd.xlane.f32.xlu0 %v1058_v28 }
 0x1c1   :  { %v1061_v16 = vadd.f32 %v1050_v31, %v1048_v29 }
 0x1c3   :  { %1062 = vadd.xlane.f32.xlu1 %v1061_v16 }
 0x244   :  { %v1054_v19 = vpop.xlane.xlu1 %1053 }
 0x245   :  { %v1064_v32 = vmul.f32 0.00390625, %v1054_v19 }
 0x247   :  { %v6206_v33 = vsub.f32 %v1030_v58, %v1064_v32  ;;  %v6208_v34 = vsub.f32 %v1032_v61, %v1064_v32 }
 0x248   :  { %v1057_v35 = vpop.xlane.xlu0 %1056 }
 0x249   :  { %v1065_v37 = vmul.f32 0.00390625, %v1057_v35  ;;  %v1076_v38 = vmul.f32 %v6206_v33, %v6206_v33  ;;  %v1077_v39 = vmul.f32 %v6208_v34, %v6208_v34 }
 0x24b   :  { %v6214_v40 = vsub.f32 %v1036_v7, %v1065_v37  ;;  %v6216_v15 = vsub.f32 %v1038_v9, %v1065_v37  ;;  %v1084_v20 = vadd.f32 %v1077_v39, %v1076_v38 }
 0x24c   :  { %v1060_v41 = vpop.xlane.xlu0 %1059 }
 0x24d   :  { %v1066_v4 = vmul.f32 0.00390625, %v1060_v41  ;;  %1085 = vadd.xlane.f32.xlu0 %v1084_v20  ;;  %v1078_v42 = vmul.f32 %v6214_v40, %v6214_v40  ;;  %v1079_v43 = vmul.f32 %v6216_v15, %v6216_v15 }
 0x24f   :  { %v6222_v44 = vsub.f32 %v1042_v21, %v1066_v4  ;;  %v6224_v3 = vsub.f32 %v1044_v24, %v1066_v4  ;;  %v1087_v45 = vadd.f32 %v1079_v43, %v1078_v42 }
 0x250   :  { %v1063_v48 = vpop.xlane.xlu1 %1062 }
 0x251   :  { %v1067_v49 = vmul.f32 0.00390625, %v1063_v48  ;;  %1088 = vadd.xlane.f32.xlu1 %v1087_v45  ;;  %v1080_v50 = vmul.f32 %v6222_v44, %v6222_v44  ;;  %v1081_v51 = vmul.f32 %v6224_v3, %v6224_v3 }
 0x253   :  { %v6230_v53 = vsub.f32 %v1048_v29, %v1067_v49  ;;  %v6232_v54 = vsub.f32 %v1050_v31, %v1067_v49  ;;  %v1090_v55 = vadd.f32 %v1081_v51, %v1080_v50 }
 0x255   :  { %1091 = vadd.xlane.f32.xlu0 %v1090_v55  ;;  %v1082_v56 = vmul.f32 %v6230_v53, %v6230_v53  ;;  %v1083_v57 = vmul.f32 %v6232_v54, %v6232_v54 }
 0x257   :  { %v1093_v58 = vadd.f32 %v1083_v57, %v1082_v56 }
 0x259   :  { %1094 = vadd.xlane.f32.xlu1 %v1093_v58 }
 0x26a   :  { %5063 = vrot.lane.b32.xlu1 %v5838_v0, %s5839_s11 }
 0x26b   :  { %5068 = vrot.lane.b32.xlu0 %v5838_v0, %s5839_s11 }
 0x26e   :  { %5073 = vrot.lane.b32.xlu1 %v5838_v0, %s5840_s0 }
 0x26f   :  { %5078 = vrot.lane.b32.xlu0 %v5838_v0, %s5840_s0 }
 0x272   :  { %5083 = vrot.lane.b32.xlu1 %v5838_v0, %s5841_s12 }
 0x2da   :  { %v1086_v59 = vpop.xlane.xlu0 %1085 }
 0x2db   :  { %v1096_v60 = vmul.f32 0.003921569, %v1086_v59  ;;  %v1797_v59 = vld [vmem:[%s7243_s3 + $0x8] sm:$0xff] }
 0x2dc   :  { %1980 = vmatprep.mubr.f32.mxu1 %v1797_v59 }
 0x2dd   :  { %5784 = vrsqrt.f32 %v1096_v60  ;;  %vm1102_vm2 = vcmp.eq.f32.partialorder %v1096_v60, inf  ;;  %v1105_v8 = vand.u32 2147483648, %v1096_v60  ;;  %vm1104_vm7 = vcmp.eq.f32.partialorder %v1096_v60, 0.0 }
 0x2de   :  { %v1089_v61 = vpop.xlane.xlu1 %1088 }
 0x2df   :  { %v1097_v62 = vmul.f32 0.003921569, %v1089_v61  ;;  %v1881_v61 = vld [vmem:[%s7244_s4 + $0x8] sm:$0xff] }
 0x2e1   :  { %5786 = vrsqrt.f32 %v1097_v62  ;;  %vm1109_vm9 = vcmp.eq.f32.partialorder %v1097_v62, inf  ;;  %v1112_v17 = vand.u32 2147483648, %v1097_v62  ;;  %vm1111_vm1 = vcmp.eq.f32.partialorder %v1097_v62, 0.0 }
 0x2e2   :  { %v1092_v63 = vpop.xlane.xlu0 %1091 }
 0x2e3   :  { %v1098_v1 = vmul.f32 0.003921569, %v1092_v63  ;;  %v1883_v63 = vld [vmem:[%s7244_s4 + $0x18] sm:$0xff] }
 0x2e5   :  { %5788 = vrsqrt.f32 %v1098_v1  ;;  %vm1116_vm15 = vcmp.eq.f32.partialorder %v1098_v1, inf  ;;  %v1119_v25 = vand.u32 2147483648, %v1098_v1  ;;  %vm1118_vm14 = vcmp.eq.f32.partialorder %v1098_v1, 0.0 }
 0x2e6   :  { %v1095_v2 = vpop.xlane.xlu1 %1094 }
 0x2e7   :  { %v5785_v5 = vpop.eup %5784  ;;  %v1099_v6 = vmul.f32 0.003921569, %v1095_v2  ;;  %v5069_v2 = vpop.permute.xlu0 %5068 }
 0x2e8   :  { %v1101_v7 = vmul.f32 %v5785_v5, %v1096_v60 }
 0x2e9   :  { %5790 = vrsqrt.f32 %v1099_v6  ;;  %v1126_v31 = vand.u32 2147483648, %v1099_v6 }
 0x2ea   :  { %v1103_v9 = vsel %vm1102_vm2, %v1096_v60, %v1101_v7  ;;  %vm1123_vm2 = vcmp.eq.f32.partialorder %v1099_v6, inf  ;;  %v1880_v60 = vld [vmem:[%s7244_s4] sm:$0xff] }
 0x2eb   :  { %v5787_v10 = vpop.eup %5786  ;;  %v1106_v11 = vsel %vm1104_vm7, %v1105_v8, %v1103_v9  ;;  %vm1125_vm7 = vcmp.eq.f32.partialorder %v1099_v6, 0.0 }
 0x2ec   :  { %v1128_v13 = vadd.f32 1e-07, %v1106_v11  ;;  %v1108_v14 = vmul.f32 %v5787_v10, %v1097_v62 }
 0x2ee   :  { %5792 = vrcp.f32 %v1128_v13  ;;  %v1110_v18 = vsel %vm1109_vm9, %v1097_v62, %v1108_v14  ;;  %v1882_v62 = vld [vmem:[%s7244_s4 + $0x10] sm:$0xff] }
 0x2ef   :  { %v5789_v21 = vpop.eup %5788  ;;  %v1113_v22 = vsel %vm1111_vm1, %v1112_v17, %v1110_v18 }
 0x2f0   :  { %v1129_v23 = vadd.f32 1e-07, %v1113_v22  ;;  %v1115_v24 = vmul.f32 %v5789_v21, %v1098_v1 }
 0x2f2   :  { %5794 = vrcp.f32 %v1129_v23  ;;  %v1117_v26 = vsel %vm1116_vm15, %v1098_v1, %v1115_v24  ;;  %v5064_v1 = vpop.permute.xlu1 %5063 }
 0x2f3   :  { %v5791_v27 = vpop.eup %5790  ;;  %v1120_v28 = vsel %vm1118_vm14, %v1119_v25, %v1117_v26  ;;  %v5066_v21 = vunpack.i.h.bf16 %v5064_v1  ;;  %v5065_v22 = vunpack.i.l.bf16 %v5064_v1  ;;  %v5071_v25 = vunpack.i.h.bf16 %v5069_v2 }
 0x2f4   :  { %v1130_v29 = vadd.f32 1e-07, %v1120_v28  ;;  %v1122_v30 = vmul.f32 %v5791_v27, %v1099_v6  ;;  %v5070_v26 = vunpack.i.l.bf16 %v5069_v2  ;;  %vm7261_vm14 = vcmask 916480  }
 0x2f5   :  { %vm7262_vm15 = vmmov %vm7261_vm14 }
 0x2f6   :  { %5796 = vrcp.f32 %v1130_v29  ;;  %v1124_v16 = vsel %vm1123_vm2, %v1099_v6, %v1122_v30  ;;  %v5074_v5 = vpop.permute.xlu1 %5073  ;;  %v6363_v6 = vpop.permute.xlu0 %5078  ;;  %vm7263_vm1 = vmmov %vm7261_vm14 }
 0x2f7   :  { %v1127_v19 = vsel %vm1125_vm7, %v1126_v31, %v1124_v16  ;;  %vm7264_vm9 = vmmov %vm7263_vm1 }
 0x2f8   :  { %v5793_v32 = vpop.eup %5792  ;;  %v1131_v35 = vadd.f32 1e-07, %v1127_v19  ;;  %vm7265_vm2 = vmmov %vm7263_vm1 }
 0x2f9   :  { %v6249_v37 = vmul.f32 %v5793_v32, %v6206_v33  ;;  %v6252_v38 = vmul.f32 %v5793_v32, %v6208_v34  ;;  %vm7266_vm7 = vmmov %vm7263_vm1 }
 0x2fa   :  { %5798 = vrcp.f32 %v1131_v35  ;;  %v6365_v7 = vpop.permute.xlu1 %5083 }
 0x2fb   :  { %v5087_v39 = vpack.i.bf16 %v6252_v38, %v6249_v37 }
 0x2fc   :  { %v5795_v20 = vpop.eup %5794 }
 0x2fd   :  { %v6257_v41 = vmul.f32 %v5795_v20, %v6214_v40  ;;  %v6260_v4 = vmul.f32 %v5795_v20, %v6216_v15  ;;  %5088 = vrot.lane.b32.xlu0 %v5087_v39, %s5839_s11  ;;  %5093 = vrot.lane.b32.xlu1 %v5087_v39, %s5840_s0 }
 0x2ff   :  { %v5107_v33 = vpack.i.bf16 %v6260_v4, %v6257_v41  ;;  %v4513_v34 = vpack.c.bf16 %v6260_v4, %v6252_v38  ;;  %v4515_v43 = vpack.c.bf16 %v6257_v41, %v6249_v37  ;;  %v5192_v56 = vpack.i.bf16 %v6257_v41, %v6249_v37 }
 0x300   :  { %v5797_v42 = vpop.eup %5796 }
 0x301   :  { %5098 = vrot.lane.b32.xlu1 %v5087_v39, %s5841_s12  ;;  %5108 = vrot.lane.b32.xlu0 %v5107_v33, %s5840_s0  ;;  %v6273_v40 = vmul.f32 %v5797_v42, %v6222_v44  ;;  %v6276_v15 = vmul.f32 %v5797_v42, %v6224_v3 }
 0x303   :  { %v5117_v50 = vpack.i.bf16 %v6276_v15, %v6273_v40 }
 0x304   :  { %v5799_v45 = vpop.eup %5798 }
 0x305   :  { %v6279_v48 = vmul.f32 %v5799_v45, %v6230_v53  ;;  %v6282_v49 = vmul.f32 %v5799_v45, %v6232_v54  ;;  %5113 = vrot.lane.b32.xlu0 %v5107_v33, %s5841_s12  ;;  %5103 = vrot.lane.b32.xlu1 %v5107_v33, %s5839_s11  ;;  %v6306_v53 = vld [vmem:[#allocation2] sm:$0xff] }
 0x306   :  { %v5177_v54 = vpack.i.bf16 %v6306_v53, %v6252_v38  ;;  %v5182_v55 = vpack.i.bf16 %v6306_v53, %v6260_v4  ;;  %v5197_v57 = vpack.i.bf16 %v6306_v53, %v6276_v15 }
 0x307   :  { %v5137_v44 = vpack.i.bf16 %v6282_v49, %v6279_v48  ;;  %v4517_v3 = vpack.c.bf16 %v6282_v49, %v6276_v15  ;;  %v4519_v51 = vpack.c.bf16 %v6279_v48, %v6273_v40  ;;  %v5232_v58 = vpack.i.bf16 %v6279_v48, %v6273_v40 }
 0x309   :  { %5118 = vrot.lane.b32.xlu0 %v5117_v50, %s5839_s11  ;;  %5138 = vrot.lane.b32.xlu1 %v5137_v44, %s5839_s11 }
 0x30d   :  { %5123 = vrot.lane.b32.xlu0 %v5838_v0, %s5841_s12  ;;  %5143 = vrot.lane.b32.xlu1 %v5087_v39, %s5842_s13 }
 0x311   :  { %5128 = vrot.lane.b32.xlu0 %v5117_v50, %s5840_s0  ;;  %5153 = vrot.lane.b32.xlu1 %v5137_v44, %s5840_s0 }
 0x315   :  { %5133 = vrot.lane.b32.xlu0 %v5117_v50, %s5841_s12  ;;  %5158 = vrot.lane.b32.xlu1 %v5838_v0, %s5842_s13 }
 0x319   :  { %5148 = vrot.lane.b32.xlu0 %v5107_v33, %s5842_s13  ;;  %5173 = vrot.lane.b32.xlu1 %v5137_v44, %s5841_s12 }
 0x31d   :  { %5163 = vrot.lane.b32.xlu0 %v5117_v50, %s5842_s13  ;;  %5178 = vrot.lane.b32.xlu1 %v5177_v54, %s5843_s14 }
 0x321   :  { %5168 = vrot.lane.b32.xlu0 %v5838_v0, %s5842_s13  ;;  %5188 = vrot.lane.b32.xlu1 %v5137_v44, %s5842_s13  ;;  %v5222_v0 = vpack.i.bf16 %v6306_v53, %v6282_v49 }
 0x325   :  { %5183 = vrot.lane.b32.xlu0 %v5182_v55, %s5843_s14  ;;  %5193 = vrot.lane.b32.xlu1 %v5192_v56, %s5843_s14 }
 0x329   :  { %5198 = vrot.lane.b32.xlu0 %v5197_v57, %s5843_s14  ;;  %5203 = vrot.lane.b32.xlu1 %v5177_v54, %s5844_s15 }
 0x32d   :  { %5208 = vrot.lane.b32.xlu0 %v5182_v55, %s5844_s15  ;;  %5213 = vrot.lane.b32.xlu1 %v5192_v56, %s5844_s15 }
 0x331   :  { %5218 = vrot.lane.b32.xlu0 %v5197_v57, %s5844_s15  ;;  %5223 = vrot.lane.b32.xlu1 %v5222_v0, %s5843_s14 }
 0x335   :  { %5233 = vrot.lane.b32.xlu0 %v5232_v58, %s5843_s14  ;;  %5228 = vrot.lane.b32.xlu1 %v5177_v54, %s5845_s16 }
 0x339   :  { %5238 = vrot.lane.b32.xlu0 %v5182_v55, %s5845_s16  ;;  %5243 = vrot.lane.b32.xlu1 %v5222_v0, %s5844_s15 }
 0x33d   :  { %5253 = vrot.lane.b32.xlu0 %v5232_v58, %s5844_s15  ;;  %5248 = vrot.lane.b32.xlu1 %v5192_v56, %s5845_s16 }
 0x341   :  { %5258 = vrot.lane.b32.xlu0 %v5197_v57, %s5845_s16  ;;  %5263 = vrot.lane.b32.xlu1 %v5222_v0, %s5845_s16 }
 0x345   :  { %5268 = vrot.lane.b32.xlu0 %v5232_v58, %s5845_s16  ;;  %5273 = vrot.lane.b32.xlu1 %v5177_v54, %s5846_s17  ;;  %v5076_v54 = vunpack.i.h.bf16 %v5074_v5 }
 0x349   :  { %5278 = vrot.lane.b32.xlu0 %v5182_v55, %s5846_s17  ;;  %5283 = vrot.lane.b32.xlu1 %v5192_v56, %s5846_s17 }
 0x34d   :  { %5288 = vrot.lane.b32.xlu0 %v5197_v57, %s5846_s17  ;;  %5293 = vrot.lane.b32.xlu1 %v5222_v0, %s5846_s17 }
 0x351   :  { %5298 = vrot.lane.b32.xlu0 %v5232_v58, %s5846_s17  ;;  %1886 = vperm.xlu1 %5061, %v1880_v60  }
 0x355   :  { %1891 = vperm.xlu0 %5060, %v1881_v61   ;;  %1896 = vperm.xlu1 %5061, %v1882_v62  }
 0x359   :  { %1901 = vperm.xlu0 %5060, %v1883_v63   ;;  %v5075_v63 = vunpack.i.l.bf16 %v5074_v5  ;;  %v5080_v5 = vunpack.i.l.bf16 %v6363_v6 }
 0x36f   :  { %v5089_v8 = vpop.permute.xlu0 %5088  ;;  %v5094_v9 = vpop.permute.xlu1 %5093 }
 0x370   :  { %v5091_v13 = vunpack.i.h.bf16 %v5089_v8  ;;  %v5090_v14 = vunpack.i.l.bf16 %v5089_v8  ;;  %v5096_v19 = vunpack.i.h.bf16 %v5094_v9  ;;  %v5095_v32 = vunpack.i.l.bf16 %v5094_v9 }
 0x372   :  { %v1204_v29 = vsel %vm141_vm0, %v5065_v22, %v5090_v14  ;;  %v1205_v30 = vsel %vm141_vm0, %v5090_v14, %v5091_v13  ;;  %v1285_v2 = vsel %vm222_vm5, %v5095_v32, %v5096_v19  ;;  %v5081_v13 = vunpack.i.h.bf16 %v6363_v6 }
 0x373   :  { %v5109_v10 = vpop.permute.xlu0 %5108  ;;  %v6367_v11 = vpop.permute.xlu1 %5098  ;;  %v1284_v14 = vsel %vm222_vm5, %v5075_v63, %v5095_v32 }
 0x374   :  { %v5111_v27 = vunpack.i.h.bf16 %v5109_v10  ;;  %v5110_v28 = vunpack.i.l.bf16 %v5109_v10 }
 0x376   :  { %v1287_v55 = vsel %vm222_vm5, %v5110_v28, %v5111_v27  ;;  %v1286_v1 = vsel %vm222_vm5, %v5076_v54, %v5110_v28  ;;  %v5086_v28 = vunpack.i.h.bf16 %v6365_v7 }
 0x377   :  { %v6369_v17 = vpop.permute.xlu0 %5113  ;;  %v5104_v18 = vpop.permute.xlu1 %5103  ;;  %v4481_v10 = vpack.c.bf16 %v1287_v55, %v1285_v2 }
 0x378   :  { %v5106_v23 = vunpack.i.h.bf16 %v5104_v18  ;;  %v5105_v24 = vunpack.i.l.bf16 %v5104_v18  ;;  %v5116_v8 = vunpack.i.h.bf16 %v6369_v17  ;;  %v5115_v9 = vunpack.i.l.bf16 %v6369_v17 }
 0x379   :  { %v5101_v18 = vunpack.i.h.bf16 %v6367_v11  ;;  %v4483_v17 = vpack.c.bf16 %v1286_v1, %v1284_v14 }
 0x37a   :  { %v1206_v31 = vsel %vm141_vm0, %v5066_v21, %v5105_v24  ;;  %v1207_v16 = vsel %vm141_vm0, %v5105_v24, %v5106_v23  ;;  %v5100_v21 = vunpack.i.l.bf16 %v6367_v11  ;;  %v1358_v19 = vsel %vm307_vm6, %v5086_v28, %v5115_v9 }
 0x37b   :  { %v4472_v35 = vpack.c.bf16 %v1206_v31, %v1204_v29  ;;  %v5119_v39 = vpop.permute.xlu0 %5118  ;;  %v5139_v20 = vpop.permute.xlu1 %5138  ;;  %v4469_v33 = vpack.c.bf16 %v1207_v16, %v1205_v30  ;;  %v1359_v29 = vsel %vm307_vm6, %v5115_v9, %v5116_v8  ;;  %v5085_v16 = vunpack.i.l.bf16 %v6365_v7 }
 0x37c   :  { %v5121_v42 = vunpack.i.h.bf16 %v5119_v39  ;;  %v5120_v45 = vunpack.i.l.bf16 %v5119_v39  ;;  %v5141_v50 = vunpack.i.h.bf16 %v5139_v20  ;;  %v5140_v44 = vunpack.i.l.bf16 %v5139_v20 }
 0x37d   :  { %4471 = vmatprep.subr.msk.bf16.mxu1 %vm6033_vm3, %v4469_v33  ;;  %v1357_v33 = vsel %vm307_vm6, %v5100_v21, %v5101_v18 }
 0x37e   :  { %v1208_v56 = vsel %vm141_vm0, %v5070_v26, %v5120_v45  ;;  %v1209_v57 = vsel %vm141_vm0, %v5120_v45, %v5121_v42  ;;  %v1210_v0 = vsel %vm141_vm0, %v5071_v25, %v5140_v44  ;;  %v1211_v58 = vsel %vm141_vm0, %v5140_v44, %v5141_v50  ;;  %4474 = vmatpush1.bf16.msk.msra.mxu1 %vm6040_vm4, %v4472_v35 }
 0x37f   :  { %v4478_v59 = vpack.c.bf16 %v1210_v0, %v1208_v56  ;;  %v6384_v60 = vpop.permute.xlu0 %5123  ;;  %v6386_v61 = vpop.permute.xlu1 %5143  ;;  %v4475_v62 = vpack.c.bf16 %v1211_v58, %v1209_v57  ;;  %v1356_v42 = vsel %vm307_vm6, %v5085_v16, %v5100_v21  ;;  %v4489_v50 = vpack.c.bf16 %v1359_v29, %v1357_v33 }
 0x380   :  { %v4492_v44 = vpack.c.bf16 %v1358_v19, %v1356_v42  ;;  %v5126_v54 = vunpack.i.h.bf16 %v6384_v60  ;;  %v5125_v7 = vunpack.i.l.bf16 %v6384_v60  ;;  %v5146_v56 = vunpack.i.h.bf16 %v6386_v61 }
 0x381   :  { %4477 = vmatprep.subr.msk.bf16.mxu1 %vm6033_vm3, %v4475_v62  ;;  %v5145_v57 = vunpack.i.l.bf16 %v6386_v61 }
 0x382   :  { %4480 = vmatpush1.bf16.msk.msra.mxu1 %vm6040_vm4, %v4478_v59 }
 0x383   :  { %v5129_v22 = vpop.permute.xlu0 %5128  ;;  %v5154_v23 = vpop.permute.xlu1 %5153  ;;  %4482 = vmatprep.subr.bf16.mxu1 %v4481_v10 }
 0x384   :  { %v5131_v24 = vunpack.i.h.bf16 %v5129_v22  ;;  %v5130_v25 = vunpack.i.l.bf16 %v5129_v22  ;;  %v5156_v26 = vunpack.i.h.bf16 %v5154_v23  ;;  %v5155_v27 = vunpack.i.l.bf16 %v5154_v23 }
 0x385   :  { %v1437_v22 = vsel %vm388_vm11, %v5145_v57, %v5146_v56 }
 0x386   :  { %v1288_v30 = vsel %vm222_vm5, %v5080_v5, %v5130_v25  ;;  %v1290_v6 = vsel %vm222_vm5, %v5081_v13, %v5155_v27  ;;  %4484 = vmatpush1.bf16.msra.mxu1 %v4483_v17  ;;  %v1289_v31 = vsel %vm222_vm5, %v5130_v25, %v5131_v24  ;;  %v1291_v11 = vsel %vm222_vm5, %v5155_v27, %v5156_v26 }
 0x387   :  { %v5134_v32 = vpop.permute.xlu0 %5133  ;;  %v5159_v35 = vpop.permute.xlu1 %5158  ;;  %v4485_v39 = vpack.c.bf16 %v1291_v11, %v1289_v31  ;;  %v4487_v20 = vpack.c.bf16 %v1290_v6, %v1288_v30 }
 0x388   :  { %v5135_v45 = vunpack.i.l.bf16 %v5134_v32  ;;  %v5136_v55 = vunpack.i.h.bf16 %v5134_v32  ;;  %v5161_v0 = vunpack.i.h.bf16 %v5159_v35  ;;  %v5160_v9 = vunpack.i.l.bf16 %v5159_v35 }
 0x389   :  { %4486 = vmatprep.subr.bf16.mxu1 %v4485_v39 }
 0x38a   :  { %4488 = vmatpush1.bf16.msra.mxu1 %v4487_v20  ;;  %v1360_v8 = vsel %vm307_vm6, %v5125_v7, %v5135_v45  ;;  %v1361_v10 = vsel %vm307_vm6, %v5135_v45, %v5136_v55  ;;  %v1436_v24 = vsel %vm388_vm11, %v5160_v9, %v5145_v57 }
 0x38b   :  { %v5149_v58 = vpop.permute.xlu0 %5148  ;;  %v5174_v59 = vpop.permute.xlu1 %5173  ;;  %4491 = vmatprep.subr.msk.bf16.mxu1 %vm6068_vm8, %v4489_v50 }
 0x38c   :  { %v5151_v62 = vunpack.i.h.bf16 %v5149_v58  ;;  %v5150_v63 = vunpack.i.l.bf16 %v5149_v58  ;;  %v5176_v1 = vunpack.i.h.bf16 %v5174_v59  ;;  %v5175_v2 = vunpack.i.l.bf16 %v5174_v59 }
 0x38e   :  { %v1439_v60 = vsel %vm388_vm11, %v5150_v63, %v5151_v62  ;;  %v1362_v13 = vsel %vm307_vm6, %v5126_v54, %v5175_v2  ;;  %v1363_v61 = vsel %vm307_vm6, %v5175_v2, %v5176_v1  ;;  %4494 = vmatpush1.bf16.msk.msra.mxu1 %vm6076_vm10, %v4492_v44  ;;  %v1438_v23 = vsel %vm388_vm11, %v5161_v0, %v5150_v63 }
 0x38f   :  { %v4498_v14 = vpack.c.bf16 %v1362_v13, %v1360_v8  ;;  %v5164_v5 = vpop.permute.xlu0 %5163  ;;  %v5179_v18 = vpop.permute.xlu1 %5178  ;;  %v4495_v21 = vpack.c.bf16 %v1363_v61, %v1361_v10  ;;  %v4501_v17 = vpack.c.bf16 %v1439_v60, %v1437_v22  ;;  %v4504_v27 = vpack.c.bf16 %v1438_v23, %v1436_v24 }
 0x390   :  { %v5166_v25 = vunpack.i.h.bf16 %v5164_v5  ;;  %v5165_v26 = vunpack.i.l.bf16 %v5164_v5  ;;  %v5181_v55 = vunpack.i.h.bf16 %v5179_v18  ;;  %v5180_v7 = vunpack.i.l.bf16 %v5179_v18 }
 0x391   :  { %4497 = vmatprep.subr.msk.bf16.mxu1 %vm6068_vm8, %v4495_v21 }
 0x392   :  { %4500 = vmatpush1.bf16.msk.msra.mxu1 %vm6076_vm10, %v4498_v14  ;;  %v1441_v16 = vsel %vm388_vm11, %v5165_v26, %v5166_v25  ;;  %v1533_v62 = vsel %vm485_vm12, %v5180_v7, %v5181_v55 }
 0x393   :  { %v5169_v28 = vpop.permute.xlu0 %5168  ;;  %v5189_v29 = vpop.permute.xlu1 %5188  ;;  %4503 = vmatprep.subr.msk.bf16.mxu1 %vm6033_vm3, %v4501_v17 }
 0x394   :  { %v5171_v30 = vunpack.i.h.bf16 %v5169_v28  ;;  %v5170_v6 = vunpack.i.l.bf16 %v5169_v28  ;;  %v5191_v31 = vunpack.i.h.bf16 %v5189_v29  ;;  %v5190_v11 = vunpack.i.l.bf16 %v5189_v29 }
 0x396   :  { %v1440_v19 = vsel %vm388_vm11, %v5170_v6, %v5165_v26  ;;  %v1442_v32 = vsel %vm388_vm11, %v5171_v30, %v5190_v11  ;;  %v1443_v35 = vsel %vm388_vm11, %v5190_v11, %v5191_v31  ;;  %4506 = vmatpush1.bf16.msk.msra.mxu1 %vm6040_vm4, %v4504_v27 }
 0x397   :  { %v4510_v39 = vpack.c.bf16 %v1442_v32, %v1440_v19  ;;  %v5184_v20 = vpop.permute.xlu0 %5183  ;;  %v5194_v33 = vpop.permute.xlu1 %5193  ;;  %v4507_v42 = vpack.c.bf16 %v1443_v35, %v1441_v16 }
 0x398   :  { %v5186_v45 = vunpack.i.h.bf16 %v5184_v20  ;;  %v5185_v50 = vunpack.i.l.bf16 %v5184_v20  ;;  %v5196_v56 = vunpack.i.h.bf16 %v5194_v33  ;;  %v5195_v57 = vunpack.i.l.bf16 %v5194_v33 }
 0x399   :  { %4509 = vmatprep.subr.msk.bf16.mxu1 %vm6033_vm3, %v4507_v42 }
 0x39a   :  { %4512 = vmatpush1.bf16.msk.msra.mxu1 %vm6040_vm4, %v4510_v39  ;;  %v1535_v0 = vsel %vm485_vm12, %v5185_v50, %v5186_v45  ;;  %v1534_v38 = vsel %vm485_vm12, %v5196_v56, %v5185_v50  ;;  %v1532_v4 = vsel %vm485_vm12, %v5195_v57, %v5180_v7 }
 0x39b   :  { %v5199_v44 = vpop.permute.xlu0 %5198  ;;  %v5204_v54 = vpop.permute.xlu1 %5203  ;;  %4514 = vmatprep.subr.bf16.mxu1 %v4513_v34  ;;  %v4521_v34 = vpack.c.bf16 %v1535_v0, %v1533_v62  ;;  %v4524_v37 = vpack.c.bf16 %v1534_v38, %v1532_v4 }
 0x39c   :  { %v5201_v63 = vunpack.i.h.bf16 %v5199_v44  ;;  %v5200_v1 = vunpack.i.l.bf16 %v5199_v44  ;;  %v5206_v8 = vunpack.i.h.bf16 %v5204_v54  ;;  %v5205_v9 = vunpack.i.l.bf16 %v5204_v54 }
 0x39e   :  { %4516 = vmatpush1.bf16.msra.mxu1 %v4515_v43  ;;  %v1537_v10 = vsel %vm485_vm12, %v5200_v1, %v5201_v63  ;;  %v1613_v21 = vsel %vm566_vm13, %v5205_v9, %v5206_v8 }
 0x39f   :  { %v5209_v58 = vpop.permute.xlu0 %5208  ;;  %v5214_v59 = vpop.permute.xlu1 %5213  ;;  %4518 = vmatprep.subr.bf16.mxu1 %v4517_v3 }
 0x3a0   :  { %v5211_v15 = vunpack.i.h.bf16 %v5209_v58  ;;  %v5210_v49 = vunpack.i.l.bf16 %v5209_v58  ;;  %v5216_v40 = vunpack.i.h.bf16 %v5214_v59  ;;  %v5215_v48 = vunpack.i.l.bf16 %v5214_v59 }
 0x3a2   :  { %4520 = vmatpush1.bf16.msra.mxu1 %v4519_v51  ;;  %v1615_v14 = vsel %vm566_vm13, %v5210_v49, %v5211_v15  ;;  %v1614_v25 = vsel %vm566_vm13, %v5216_v40, %v5210_v49  ;;  %v1612_v26 = vsel %vm566_vm13, %v5215_v48, %v5205_v9 }
 0x3a3   :  { %v5219_v41 = vpop.permute.xlu0 %5218  ;;  %v5224_v43 = vpop.permute.xlu1 %5223  ;;  %4523 = vmatprep.subr.msk.bf16.mxu1 %vm6068_vm8, %v4521_v34  ;;  %v4533_v30 = vpack.c.bf16 %v1615_v14, %v1613_v21  ;;  %v4536_v20 = vpack.c.bf16 %v1614_v25, %v1612_v26 }
 0x3a4   :  { %v5226_v3 = vunpack.i.h.bf16 %v5224_v43  ;;  %v5225_v2 = vunpack.i.l.bf16 %v5224_v43  ;;  %v5221_v22 = vunpack.i.h.bf16 %v5219_v41  ;;  %v5220_v23 = vunpack.i.l.bf16 %v5219_v41 }
 0x3a6   :  { %v1539_v60 = vsel %vm485_vm12, %v5225_v2, %v5226_v3  ;;  %4526 = vmatpush1.bf16.msk.msra.mxu1 %vm6076_vm10, %v4524_v37  ;;  %v1617_v19 = vsel %vm566_vm13, %v5220_v23, %v5221_v22 }
 0x3a7   :  { %v5234_v51 = vpop.permute.xlu0 %5233  ;;  %v5229_v13 = vpop.permute.xlu1 %5228  ;;  %v4527_v61 = vpack.c.bf16 %v1539_v60, %v1537_v10 }
 0x3a8   :  { %v5236_v5 = vunpack.i.h.bf16 %v5234_v51  ;;  %v5235_v18 = vunpack.i.l.bf16 %v5234_v51  ;;  %v5231_v32 = vunpack.i.h.bf16 %v5229_v13  ;;  %v5230_v35 = vunpack.i.l.bf16 %v5229_v13 }
 0x3a9   :  { %4529 = vmatprep.subr.msk.bf16.mxu1 %vm6068_vm8, %v4527_v61 }
 0x3aa   :  { %v1536_v17 = vsel %vm485_vm12, %v5235_v18, %v5200_v1  ;;  %v1538_v24 = vsel %vm485_vm12, %v5236_v5, %v5225_v2  ;;  %v1693_v0 = vsel %vm7262_vm15, %v5230_v35, %v5231_v32  ;;  %vm7268_vm15 = vmmov %vm7263_vm1  ;;  %v1799_v32 = vld [vmem:[%s7243_s3 + $0x18] sm:$0xff] }
 0x3ab   :  { %v4530_v27 = vpack.c.bf16 %v1538_v24, %v1536_v17  ;;  %v5239_v28 = vpop.permute.xlu0 %5238  ;;  %v5244_v29 = vpop.permute.xlu1 %5243 }
 0x3ac   :  { %v5241_v6 = vunpack.i.h.bf16 %v5239_v28  ;;  %v5240_v31 = vunpack.i.l.bf16 %v5239_v28  ;;  %v5246_v11 = vunpack.i.h.bf16 %v5244_v29  ;;  %v5245_v16 = vunpack.i.l.bf16 %v5244_v29 }
 0x3ad   :  { %4532 = vmatpush1.bf16.msk.msra.mxu1 %vm6076_vm10, %v4530_v27  ;;  %v1800_v27 = vld [vmem:[%s7243_s3 + $0x20] sm:$0xff] }
 0x3ae   :  { %v1619_v39 = vsel %vm566_vm13, %v5245_v16, %v5246_v11  ;;  %4535 = vmatprep.subr.msk.bf16.mxu1 %vm6033_vm3, %v4533_v30  ;;  %v1695_v50 = vsel %vm7261_vm14, %v5240_v31, %v5241_v6  ;;  %vm7267_vm14 = vmmov %vm7263_vm1 }
 0x3af   :  { %v5254_v33 = vpop.permute.xlu0 %5253  ;;  %v5249_v42 = vpop.permute.xlu1 %5248  ;;  %v4539_v45 = vpack.c.bf16 %v1619_v39, %v1617_v19  ;;  %v4545_v34 = vpack.c.bf16 %v1695_v50, %v1693_v0  ;;  %v1798_v0 = vld [vmem:[%s7243_s3 + $0x10] sm:$0xff] }
 0x3b0   :  { %v5256_v44 = vunpack.i.h.bf16 %v5254_v33  ;;  %v5255_v54 = vunpack.i.l.bf16 %v5254_v33  ;;  %v5251_v55 = vunpack.i.h.bf16 %v5249_v42  ;;  %v5250_v7 = vunpack.i.l.bf16 %v5249_v42 }
 0x3b1   :  { %4538 = vmatpush1.bf16.msk.msra.mxu1 %vm6040_vm4, %v4536_v20  ;;  %v1803_v20 = vld [vmem:[%s7243_s3 + $0x38] sm:$0xff] }
 0x3b2   :  { %v1616_v56 = vsel %vm566_vm13, %v5255_v54, %v5220_v23  ;;  %v1618_v57 = vsel %vm566_vm13, %v5256_v44, %v5245_v16  ;;  %4541 = vmatprep.subr.msk.bf16.mxu1 %vm6033_vm3, %v4539_v45  ;;  %v1694_v59 = vsel %vm7263_vm1, %v5251_v55, %v5240_v31  ;;  %v1692_v62 = vsel %vm7264_vm9, %v5250_v7, %v5230_v35  ;;  %v1796_v23 = vld [vmem:[%s7243_s3] sm:$0xff]  ;;  %v1802_v44 = vld [vmem:[%s7243_s3 + $0x30] sm:$0xff] }
 0x3b3   :  { %v4542_v58 = vpack.c.bf16 %v1618_v57, %v1616_v56  ;;  %v5259_v38 = vpop.permute.xlu0 %5258  ;;  %v5264_v4 = vpop.permute.xlu1 %5263  ;;  %v4547_v2 = vpack.c.bf16 %v1694_v59, %v1692_v62  ;;  %vm7269_vm1 = vcmask 908288   ;;  %v1806_v7 = vld [vmem:[%s7243_s3 + $0x50] sm:$0xff]  ;;  %v1805_v57 = vld [vmem:[%s7243_s3 + $0x48] sm:$0xff]  ;;  %v1804_v59 = vld [vmem:[%s7243_s3 + $0x40] sm:$0xff] }
 0x3b4   :  { %v5261_v63 = vunpack.i.h.bf16 %v5259_v38  ;;  %v5260_v1 = vunpack.i.l.bf16 %v5259_v38  ;;  %v5266_v37 = vunpack.i.h.bf16 %v5264_v4  ;;  %v5265_v41 = vunpack.i.l.bf16 %v5264_v4  ;;  %vm7270_vm9 = vmmov %vm7269_vm1  ;;  %v1807_v62 = vld [vmem:[%s7243_s3 + $0x58] sm:$0xff] }
 0x3b5   :  { %4544 = vmatpush1.bf16.msk.msra.mxu1 %vm6040_vm4, %v4542_v58  ;;  %v1801_v58 = vld [vmem:[%s7243_s3 + $0x28] sm:$0xff] }
 0x3b6   :  { %4546 = vmatprep.subr.bf16.mxu1 %v4545_v34  ;;  %v1697_v43 = vsel %vm7265_vm2, %v5260_v1, %v5261_v63  ;;  %v1699_v15 = vsel %vm7266_vm7, %v5265_v41, %v5266_v37  ;;  %vm7271_vm2 = vmmov %vm7269_vm1 }
 0x3b7   :  { %v5269_v49 = vpop.permute.xlu0 %5268  ;;  %v5274_v3 = vpop.permute.xlu1 %5273  ;;  %v4549_v8 = vpack.c.bf16 %v1699_v15, %v1697_v43  ;;  %vm7272_vm7 = vmmov %vm7269_vm1 }
 0x3b8   :  { %v5271_v9 = vunpack.i.h.bf16 %v5269_v49  ;;  %v5270_v10 = vunpack.i.l.bf16 %v5269_v49  ;;  %v5276_v48 = vunpack.i.h.bf16 %v5274_v3  ;;  %v5275_v51 = vunpack.i.l.bf16 %v5274_v3 }
 0x3b9   :  { %4548 = vmatpush1.bf16.msra.mxu1 %v4547_v2 }
 0x3ba   :  { %v1696_v60 = vsel %vm7267_vm14, %v5270_v10, %v5260_v1  ;;  %v1698_v40 = vsel %vm7268_vm15, %v5271_v9, %v5265_v41  ;;  %4550 = vmatprep.subr.bf16.mxu1 %v4549_v8  ;;  %v1765_v17 = vsel %vm7269_vm1, %v5275_v51, %v5276_v48  ;;  %vm7273_vm14 = vmmov %vm7269_vm1 }
 0x3bb   :  { %v5279_v13 = vpop.permute.xlu0 %5278  ;;  %v5284_v61 = vpop.permute.xlu1 %5283  ;;  %v4551_v14 = vpack.c.bf16 %v1698_v40, %v1696_v60  ;;  %vm7274_vm15 = vmmov %vm7269_vm1 }
 0x3bc   :  { %v5281_v5 = vunpack.i.h.bf16 %v5279_v13  ;;  %v5280_v18 = vunpack.i.l.bf16 %v5279_v13  ;;  %v5286_v21 = vunpack.i.h.bf16 %v5284_v61  ;;  %v5285_v22 = vunpack.i.l.bf16 %v5284_v61 }
 0x3bd   :  { %4552 = vmatpush1.bf16.msra.mxu1 %v4551_v14 }
 0x3be   :  { %v1767_v24 = vsel %vm7270_vm9, %v5280_v18, %v5281_v5  ;;  %v1766_v25 = vsel %vm7271_vm2, %v5286_v21, %v5280_v18  ;;  %v1764_v26 = vsel %vm7272_vm7, %v5285_v22, %v5275_v51  ;;  %vm7275_vm9 = vmmov %vm7269_vm1  ;;  %vm7276_vm2 = vcmask 261120  }
 0x3bf   :  { %v4556_v28 = vpack.c.bf16 %v1766_v25, %v1764_v26  ;;  %v5289_v29 = vpop.permute.xlu0 %5288  ;;  %v5294_v30 = vpop.permute.xlu1 %5293  ;;  %v4553_v6 = vpack.c.bf16 %v1767_v24, %v1765_v17  ;;  %vm7277_vm7 = vmmov %vm7276_vm2 }
 0x3c0   :  { %v5291_v31 = vunpack.i.h.bf16 %v5289_v29  ;;  %v5290_v11 = vunpack.i.l.bf16 %v5289_v29  ;;  %v5296_v16 = vunpack.i.h.bf16 %v5294_v30  ;;  %v5295_v19 = vunpack.i.l.bf16 %v5294_v30  ;;  %1981 = vmatmul.mubr.f32.vlgmr.msra.gmra.mrb[8].mxu1 %v1796_v23 }
 0x3c1   :  { %4555 = vmatprep.subr.msk.bf16.mxu1 %vm6068_vm8, %v4553_v6  ;;  %1986 = vmatprep.mubr.f32.mxu1 %v1800_v27 }
 0x3c2   :  { %v1769_v35 = vsel %vm7273_vm14, %v5290_v11, %v5291_v31  ;;  %v1771_v39 = vsel %vm7274_vm15, %v5295_v19, %v5296_v16  ;;  %4558 = vmatpush1.bf16.msk.msra.mxu1 %vm6076_vm10, %v4556_v28  ;;  %vm7278_vm14 = vmmov %vm7276_vm2 }
 0x3c3   :  { %v5299_v33 = vpop.permute.xlu0 %5298  ;;  %v4559_v42 = vpack.c.bf16 %v1771_v39, %v1769_v35  ;;  %vm7279_vm15 = vmmov %vm7276_vm2 }
 0x3c4   :  { %v5301_v45 = vunpack.i.h.bf16 %v5299_v33  ;;  %v5300_v50 = vunpack.i.l.bf16 %v5299_v33  ;;  %1987 = vmatmul.mubr.f32.gmra.mrb[10].mxu1 %v1799_v32 }
 0x3c5   :  { %4561 = vmatprep.subr.msk.bf16.mxu1 %vm6068_vm8, %v4559_v42  ;;  %1992 = vmatprep.mubr.f32.mxu1 %v1803_v20 }
 0x3c6   :  { %v1768_v54 = vsel %vm7269_vm1, %v5300_v50, %v5290_v11  ;;  %v1770_v55 = vsel %vm7275_vm9, %v5301_v45, %v5295_v19 }
 0x3c7   :  { %v4562_v56 = vpack.c.bf16 %v1770_v55, %v1768_v54 }
 0x3c8   :  { %1993 = vmatmul.mubr.f32.gmra.mrb[12].mxu1 %v1802_v44 }
 0x3c9   :  { %4564 = vmatpush1.bf16.msk.msra.mxu1 %vm6076_vm10, %v4562_v56  ;;  %1998 = vmatprep.mubr.f32.mxu1 %v1806_v7  ;;  %v6586_v56 = vpack.i.bf16 %v6306_v53, %v6306_v53 }
 0x3cc   :  { %1999 = vmatmul.mubr.f32.gmra.mrb[14].mxu1 %v1805_v57 }
 0x3cd   :  { %2069 = vmatprep.mubr.f32.mxu1 %v6306_v53 }
 0x3d0   :  { %4171 = vmatmul.mubr.msk.f32.vlgmr.msra.gmra.mrb[8].mxu1 %vm7276_vm2, %v1798_v0  ;;  %v1887_v38 = vpop.permute.xlu1 %1886 }
 0x3d1   :  { %2075 = vmatprep.mubr.f32.mxu1 %v6306_v53 }
 0x3d4   :  { %4172 = vmatmul.mubr.msk.f32.gmra.mrb[10].mxu1 %vm7277_vm7, %v1801_v58  ;;  %v1892_v37 = vpop.permute.xlu0 %1891  ;;  %v1897_v2 = vpop.permute.xlu1 %1896 }
 0x3d5   :  { %2081 = vmatprep.mubr.f32.mxu1 %v6306_v53 }
 0x3d8   :  { %4173 = vmatmul.mubr.msk.f32.gmra.mrb[12].mxu1 %vm7278_vm14, %v1804_v59  ;;  %v1902_v48 = vpop.permute.xlu0 %1901 }
 0x3d9   :  { %2087 = vmatprep.mubr.f32.mxu1 %v6306_v53 }
 0x3dc   :  { %4174 = vmatmul.mubr.msk.f32.gmra.mrb[14].mxu1 %vm7279_vm15, %v1807_v62 }
 0x4a3   :  { %v2071_v4 = vpop.f32.mrb[8].mxu1 }
 0x4a4   :  { %v4773_v34 = vadd.f32 %v2071_v4, %v1887_v38  ;;  %v2073_v63 = vpop.f32.mrb[9].mxu1 }
 0x4a5   :  { %v4774_v1 = vadd.f32 %v2073_v63, %v1887_v38 }
 0x4a7   :  { %v2094_v41 = vadd.f32 %v4774_v1, %v4773_v34  ;;  %v2077_v43 = vpop.f32.mrb[10].mxu1 }
 0x4a8   :  { %v4775_v15 = vadd.f32 %v2077_v43, %v1892_v37  ;;  %v2079_v49 = vpop.f32.mrb[11].mxu1 }
 0x4a9   :  { %v4776_v3 = vadd.f32 %v2079_v49, %v1892_v37  ;;  %2095 = vadd.xlane.f32.xlu1 %v2094_v41 }
 0x4ab   :  { %v2097_v8 = vadd.f32 %v4776_v3, %v4775_v15  ;;  %v2083_v9 = vpop.f32.mrb[12].mxu1 }
 0x4ac   :  { %v4777_v10 = vadd.f32 %v2083_v9, %v1897_v2  ;;  %v2085_v60 = vpop.f32.mrb[13].mxu1 }
 0x4ad   :  { %v4778_v40 = vadd.f32 %v2085_v60, %v1897_v2  ;;  %2098 = vadd.xlane.f32.xlu0 %v2097_v8 }
 0x4af   :  { %v2100_v51 = vadd.f32 %v4778_v40, %v4777_v10  ;;  %v2089_v13 = vpop.f32.mrb[14].mxu1 }
 0x4b0   :  { %v4779_v61 = vadd.f32 %v2089_v13, %v1902_v48  ;;  %v2091_v14 = vpop.f32.mrb[15].mxu1 }
 0x4b1   :  { %v4780_v5 = vadd.f32 %v2091_v14, %v1902_v48  ;;  %2101 = vadd.xlane.f32.xlu0 %v2100_v51 }
 0x4b3   :  { %v2103_v18 = vadd.f32 %v4780_v5, %v4779_v61 }
 0x4b5   :  { %2104 = vadd.xlane.f32.xlu1 %v2103_v18 }
 0x536   :  { %v2096_v21 = vpop.xlane.xlu1 %2095 }
 0x537   :  { %v2106_v22 = vmul.f32 0.00390625, %v2096_v21 }
 0x539   :  { %v6552_v23 = vsub.f32 %v4773_v34, %v2106_v22  ;;  %v6554_v17 = vsub.f32 %v4774_v1, %v2106_v22 }
 0x53a   :  { %v2099_v24 = vpop.xlane.xlu0 %2098 }
 0x53b   :  { %v2118_v25 = vmul.f32 %v6552_v23, %v6552_v23  ;;  %v2119_v26 = vmul.f32 %v6554_v17, %v6554_v17  ;;  %v2107_v27 = vmul.f32 0.00390625, %v2099_v24 }
 0x53d   :  { %v6560_v28 = vsub.f32 %v4775_v15, %v2107_v27  ;;  %v6562_v29 = vsub.f32 %v4776_v3, %v2107_v27  ;;  %v2126_v30 = vadd.f32 %v2119_v26, %v2118_v25 }
 0x53e   :  { %v2102_v6 = vpop.xlane.xlu0 %2101 }
 0x53f   :  { %v2120_v31 = vmul.f32 %v6560_v28, %v6560_v28  ;;  %v2121_v11 = vmul.f32 %v6562_v29, %v6562_v29  ;;  %v2108_v16 = vmul.f32 0.00390625, %v2102_v6  ;;  %2127 = vadd.xlane.f32.xlu0 %v2126_v30 }
 0x541   :  { %v6568_v19 = vsub.f32 %v4777_v10, %v2108_v16  ;;  %v6570_v32 = vsub.f32 %v4778_v40, %v2108_v16  ;;  %v2129_v35 = vadd.f32 %v2121_v11, %v2120_v31 }
 0x542   :  { %v2105_v39 = vpop.xlane.xlu1 %2104 }
 0x543   :  { %v2122_v20 = vmul.f32 %v6568_v19, %v6568_v19  ;;  %v2123_v33 = vmul.f32 %v6570_v32, %v6570_v32  ;;  %v2109_v42 = vmul.f32 0.00390625, %v2105_v39  ;;  %2130 = vadd.xlane.f32.xlu1 %v2129_v35 }
 0x545   :  { %v6576_v45 = vsub.f32 %v4779_v61, %v2109_v42  ;;  %v6578_v50 = vsub.f32 %v4780_v5, %v2109_v42  ;;  %v2132_v44 = vadd.f32 %v2123_v33, %v2122_v20 }
 0x547   :  { %v2124_v54 = vmul.f32 %v6576_v45, %v6576_v45  ;;  %v2125_v55 = vmul.f32 %v6578_v50, %v6578_v50  ;;  %2133 = vadd.xlane.f32.xlu0 %v2132_v44 }
 0x549   :  { %v2135_v7 = vadd.f32 %v2125_v55, %v2124_v54 }
 0x54b   :  { %2136 = vadd.xlane.f32.xlu1 %v2135_v7 }
 0x55c   :  { %5303 = vrot.lane.b32.xlu1 %v6586_v56, %s5839_s11 }
 0x55d   :  { %5308 = vrot.lane.b32.xlu0 %v6586_v56, %s5839_s11 }
 0x560   :  { %5313 = vrot.lane.b32.xlu1 %v6586_v56, %s5840_s0 }
 0x561   :  { %5318 = vrot.lane.b32.xlu0 %v6586_v56, %s5840_s0 }
 0x564   :  { %5323 = vrot.lane.b32.xlu1 %v6586_v56, %s5841_s12 }
 0x5cc   :  { %v2128_v57 = vpop.xlane.xlu0 %2127 }
 0x5cd   :  { %v2138_v0 = vmul.f32 0.003921569, %v2128_v57  ;;  %v2922_v57 = vld [vmem:[%s7246_s6] sm:$0xff] }
 0x5cf   :  { %5800 = vrsqrt.f32 %v2138_v0  ;;  %vm2144_vm1 = vcmp.eq.f32.partialorder %v2138_v0, inf  ;;  %v2147_v37 = vand.u32 2147483648, %v2138_v0  ;;  %vm2146_vm9 = vcmp.eq.f32.partialorder %v2138_v0, 0.0 }
 0x5d0   :  { %v2131_v58 = vpop.xlane.xlu1 %2130 }
 0x5d1   :  { %v2139_v59 = vmul.f32 0.003921569, %v2131_v58  ;;  %v2924_v58 = vld [vmem:[%s7246_s6 + $0x10] sm:$0xff] }
 0x5d3   :  { %5802 = vrsqrt.f32 %v2139_v59  ;;  %vm2151_vm2 = vcmp.eq.f32.partialorder %v2139_v59, inf  ;;  %v2154_v2 = vand.u32 2147483648, %v2139_v59  ;;  %vm2153_vm7 = vcmp.eq.f32.partialorder %v2139_v59, 0.0 }
 0x5d4   :  { %v2134_v62 = vpop.xlane.xlu0 %2133 }
 0x5d5   :  { %v2140_v38 = vmul.f32 0.003921569, %v2134_v62 }
 0x5d7   :  { %5804 = vrsqrt.f32 %v2140_v38  ;;  %vm2158_vm14 = vcmp.eq.f32.partialorder %v2140_v38, inf  ;;  %v2161_v48 = vand.u32 2147483648, %v2140_v38  ;;  %vm2160_vm15 = vcmp.eq.f32.partialorder %v2140_v38, 0.0 }
 0x5d8   :  { %v2137_v4 = vpop.xlane.xlu1 %2136 }
 0x5d9   :  { %v5801_v34 = vpop.eup %5800  ;;  %v2141_v63 = vmul.f32 0.003921569, %v2137_v4 }
 0x5da   :  { %v2143_v1 = vmul.f32 %v5801_v34, %v2138_v0 }
 0x5db   :  { %5806 = vrsqrt.f32 %v2141_v63  ;;  %v2168_v18 = vand.u32 2147483648, %v2141_v63 }
 0x5dc   :  { %v2145_v41 = vsel %vm2144_vm1, %v2138_v0, %v2143_v1  ;;  %vm2165_vm1 = vcmp.eq.f32.partialorder %v2141_v63, inf  ;;  %v2923_v0 = vld [vmem:[%s7246_s6 + $0x8] sm:$0xff]  ;;  %v5304_v62 = vpop.permute.xlu1 %5303 }
 0x5dd   :  { %v5803_v43 = vpop.eup %5802  ;;  %v2148_v15 = vsel %vm2146_vm9, %v2147_v37, %v2145_v41  ;;  %vm2167_vm9 = vcmp.eq.f32.partialorder %v2141_v63, 0.0 }
 0x5de   :  { %v2170_v49 = vadd.f32 1e-07, %v2148_v15  ;;  %v2150_v3 = vmul.f32 %v5803_v43, %v2139_v59 }
 0x5e0   :  { %5808 = vrcp.f32 %v2170_v49  ;;  %v2152_v8 = vsel %vm2151_vm2, %v2139_v59, %v2150_v3  ;;  %v2925_v59 = vld [vmem:[%s7246_s6 + $0x18] sm:$0xff]  ;;  %v5314_v4 = vpop.permute.xlu1 %5313  ;;  %vm7280_vm2 = vcmask 916480  }
 0x5e1   :  { %v5805_v9 = vpop.eup %5804  ;;  %v2155_v10 = vsel %vm2153_vm7, %v2154_v2, %v2152_v8  ;;  %v5306_v8 = vunpack.i.h.bf16 %v5304_v62  ;;  %vm7281_vm7 = vmmov %vm7280_vm2 }
 0x5e2   :  { %v2171_v60 = vadd.f32 1e-07, %v2155_v10  ;;  %v2157_v40 = vmul.f32 %v5805_v9, %v2140_v38  ;;  %v5305_v9 = vunpack.i.l.bf16 %v5304_v62 }
 0x5e4   :  { %5810 = vrcp.f32 %v2171_v60  ;;  %v2159_v51 = vsel %vm2158_vm14, %v2140_v38, %v2157_v40  ;;  %v5309_v38 = vpop.permute.xlu0 %5308  ;;  %vm7282_vm14 = vmmov %vm7280_vm2 }
 0x5e5   :  { %v5807_v13 = vpop.eup %5806  ;;  %v2162_v61 = vsel %vm2160_vm15, %v2161_v48, %v2159_v51  ;;  %v5311_v40 = vunpack.i.h.bf16 %v5309_v38  ;;  %v5310_v48 = vunpack.i.l.bf16 %v5309_v38  ;;  %vm7283_vm15 = vmmov %vm7280_vm2 }
 0x5e6   :  { %v2172_v14 = vadd.f32 1e-07, %v2162_v61  ;;  %v2164_v5 = vmul.f32 %v5807_v13, %v2141_v63 }
 0x5e8   :  { %5812 = vrcp.f32 %v2172_v14  ;;  %v2166_v21 = vsel %vm2165_vm1, %v2141_v63, %v2164_v5  ;;  %v6711_v34 = vpop.permute.xlu0 %5318  ;;  %v6713_v63 = vpop.permute.xlu1 %5323  ;;  %vm7284_vm1 = vmmov %vm7280_vm2 }
 0x5e9   :  { %v2169_v22 = vsel %vm2167_vm9, %v2168_v18, %v2166_v21  ;;  %vm7285_vm9 = vmmov %vm7284_vm1 }
 0x5ea   :  { %v5809_v24 = vpop.eup %5808  ;;  %v2173_v25 = vadd.f32 1e-07, %v2169_v22 }
 0x5eb   :  { %v6599_v26 = vmul.f32 %v5809_v24, %v6552_v23  ;;  %v6602_v27 = vmul.f32 %v5809_v24, %v6554_v17 }
 0x5ec   :  { %5814 = vrcp.f32 %v2173_v25 }
 0x5ed   :  { %v5327_v30 = vpack.i.bf16 %v6602_v27, %v6599_v26 }
 0x5ee   :  { %v5811_v6 = vpop.eup %5810 }
 0x5ef   :  { %v6607_v31 = vmul.f32 %v5811_v6, %v6560_v28  ;;  %v6610_v11 = vmul.f32 %v5811_v6, %v6562_v29  ;;  %5328 = vrot.lane.b32.xlu0 %v5327_v30, %s5839_s11  ;;  %5333 = vrot.lane.b32.xlu1 %v5327_v30, %s5840_s0 }
 0x5f1   :  { %v5347_v23 = vpack.i.bf16 %v6610_v11, %v6607_v31  ;;  %v4609_v17 = vpack.c.bf16 %v6610_v11, %v6602_v27  ;;  %v4611_v35 = vpack.c.bf16 %v6607_v31, %v6599_v26  ;;  %v5422_v44 = vpack.i.bf16 %v6306_v53, %v6610_v11 }
 0x5f2   :  { %v5813_v16 = vpop.eup %5812  ;;  %v5432_v54 = vpack.i.bf16 %v6607_v31, %v6599_v26 }
 0x5f3   :  { %5338 = vrot.lane.b32.xlu1 %v5327_v30, %s5841_s12  ;;  %5348 = vrot.lane.b32.xlu0 %v5347_v23, %s5840_s0  ;;  %v6623_v28 = vmul.f32 %v5813_v16, %v6568_v19  ;;  %v6626_v29 = vmul.f32 %v5813_v16, %v6570_v32 }
 0x5f5   :  { %v5357_v42 = vpack.i.bf16 %v6626_v29, %v6623_v28  ;;  %v5437_v55 = vpack.i.bf16 %v6306_v53, %v6626_v29 }
 0x5f6   :  { %v5815_v39 = vpop.eup %5814 }
 0x5f7   :  { %v6629_v20 = vmul.f32 %v5815_v39, %v6576_v45  ;;  %v6632_v33 = vmul.f32 %v5815_v39, %v6578_v50  ;;  %5353 = vrot.lane.b32.xlu0 %v5347_v23, %s5841_s12  ;;  %5343 = vrot.lane.b32.xlu1 %v5347_v23, %s5839_s11  ;;  %v5417_v50 = vpack.i.bf16 %v6306_v53, %v6602_v27 }
 0x5f9   :  { %v5377_v19 = vpack.i.bf16 %v6632_v33, %v6629_v20  ;;  %v4613_v32 = vpack.c.bf16 %v6632_v33, %v6626_v29  ;;  %v4615_v45 = vpack.c.bf16 %v6629_v20, %v6623_v28  ;;  %v5462_v7 = vpack.i.bf16 %v6306_v53, %v6632_v33  ;;  %v2839_v53 = vld [vmem:[%s7245_s5 + $0x8] sm:$0xff] }
 0x5fa   :  { %3022 = vmatprep.mubr.f32.mxu0 %v2839_v53 }
 0x5fb   :  { %5358 = vrot.lane.b32.xlu0 %v5357_v42, %s5839_s11  ;;  %5378 = vrot.lane.b32.xlu1 %v5377_v19, %s5839_s11 }
 0x5ff   :  { %5363 = vrot.lane.b32.xlu0 %v6586_v56, %s5841_s12  ;;  %5383 = vrot.lane.b32.xlu1 %v5327_v30, %s5842_s13 }
 0x603   :  { %5368 = vrot.lane.b32.xlu0 %v5357_v42, %s5840_s0  ;;  %5393 = vrot.lane.b32.xlu1 %v5377_v19, %s5840_s0 }
 0x607   :  { %5373 = vrot.lane.b32.xlu0 %v5357_v42, %s5841_s12  ;;  %5398 = vrot.lane.b32.xlu1 %v6586_v56, %s5842_s13 }
 0x60b   :  { %5388 = vrot.lane.b32.xlu0 %v5347_v23, %s5842_s13  ;;  %5413 = vrot.lane.b32.xlu1 %v5377_v19, %s5841_s12 }
 0x60f   :  { %5403 = vrot.lane.b32.xlu0 %v5357_v42, %s5842_s13  ;;  %5418 = vrot.lane.b32.xlu1 %v5417_v50, %s5843_s14 }
 0x613   :  { %5408 = vrot.lane.b32.xlu0 %v6586_v56, %s5842_s13  ;;  %5428 = vrot.lane.b32.xlu1 %v5377_v19, %s5842_s13  ;;  %v5472_v56 = vpack.i.bf16 %v6629_v20, %v6623_v28  ;;  %v5316_v19 = vunpack.i.h.bf16 %v5314_v4 }
 0x617   :  { %5423 = vrot.lane.b32.xlu0 %v5422_v44, %s5843_s14  ;;  %5433 = vrot.lane.b32.xlu1 %v5432_v54, %s5843_s14 }
 0x61b   :  { %5438 = vrot.lane.b32.xlu0 %v5437_v55, %s5843_s14  ;;  %5443 = vrot.lane.b32.xlu1 %v5417_v50, %s5844_s15 }
 0x61f   :  { %5448 = vrot.lane.b32.xlu0 %v5422_v44, %s5844_s15  ;;  %5453 = vrot.lane.b32.xlu1 %v5432_v54, %s5844_s15 }
 0x623   :  { %5458 = vrot.lane.b32.xlu0 %v5437_v55, %s5844_s15  ;;  %5463 = vrot.lane.b32.xlu1 %v5462_v7, %s5843_s14 }
 0x627   :  { %5473 = vrot.lane.b32.xlu0 %v5472_v56, %s5843_s14  ;;  %5468 = vrot.lane.b32.xlu1 %v5417_v50, %s5845_s16 }
 0x62b   :  { %5478 = vrot.lane.b32.xlu0 %v5422_v44, %s5845_s16  ;;  %5483 = vrot.lane.b32.xlu1 %v5462_v7, %s5844_s15 }
 0x62f   :  { %5493 = vrot.lane.b32.xlu0 %v5472_v56, %s5844_s15  ;;  %5488 = vrot.lane.b32.xlu1 %v5432_v54, %s5845_s16 }
 0x633   :  { %5498 = vrot.lane.b32.xlu0 %v5437_v55, %s5845_s16  ;;  %5503 = vrot.lane.b32.xlu1 %v5462_v7, %s5845_s16 }
 0x637   :  { %5508 = vrot.lane.b32.xlu0 %v5472_v56, %s5845_s16  ;;  %5513 = vrot.lane.b32.xlu1 %v5417_v50, %s5846_s17 }
 0x63b   :  { %5518 = vrot.lane.b32.xlu0 %v5422_v44, %s5846_s17  ;;  %5523 = vrot.lane.b32.xlu1 %v5432_v54, %s5846_s17 }
 0x63f   :  { %5528 = vrot.lane.b32.xlu0 %v5437_v55, %s5846_s17  ;;  %5533 = vrot.lane.b32.xlu1 %v5462_v7, %s5846_s17 }
 0x643   :  { %5538 = vrot.lane.b32.xlu0 %v5472_v56, %s5846_s17  ;;  %2928 = vperm.xlu1 %5061, %v2922_v57  }
 0x647   :  { %2933 = vperm.xlu0 %5060, %v2923_v0   ;;  %2938 = vperm.xlu1 %5061, %v2924_v58   ;;  %v5315_v58 = vunpack.i.l.bf16 %v5314_v4  ;;  %v5320_v4 = vunpack.i.l.bf16 %v6711_v34 }
 0x64b   :  { %2943 = vperm.xlu0 %5060, %v2925_v59  }
 0x661   :  { %v5329_v1 = vpop.permute.xlu0 %5328  ;;  %v5334_v37 = vpop.permute.xlu1 %5333 }
 0x662   :  { %v5331_v15 = vunpack.i.h.bf16 %v5329_v1  ;;  %v5330_v49 = vunpack.i.l.bf16 %v5329_v1  ;;  %v5336_v21 = vunpack.i.h.bf16 %v5334_v37  ;;  %v5335_v22 = vunpack.i.l.bf16 %v5334_v37 }
 0x664   :  { %v2246_v61 = vsel %vm141_vm0, %v5305_v9, %v5330_v49  ;;  %v2247_v14 = vsel %vm141_vm0, %v5330_v49, %v5331_v15  ;;  %v2327_v62 = vsel %vm222_vm5, %v5335_v22, %v5336_v21  ;;  %v2326_v15 = vsel %vm222_vm5, %v5315_v58, %v5335_v22 }
 0x665   :  { %v5349_v41 = vpop.permute.xlu0 %5348  ;;  %v6715_v43 = vpop.permute.xlu1 %5338 }
 0x666   :  { %v5351_v51 = vunpack.i.h.bf16 %v5349_v41  ;;  %v5350_v13 = vunpack.i.l.bf16 %v5349_v41  ;;  %v5321_v41 = vunpack.i.h.bf16 %v6711_v34  ;;  %v5341_v49 = vunpack.i.h.bf16 %v6715_v43 }
 0x668   :  { %v2329_v50 = vsel %vm222_vm5, %v5350_v13, %v5351_v51  ;;  %v2328_v59 = vsel %vm222_vm5, %v5316_v19, %v5350_v13  ;;  %v5326_v51 = vunpack.i.h.bf16 %v6713_v63 }
 0x669   :  { %v6717_v3 = vpop.permute.xlu0 %5353  ;;  %v5344_v2 = vpop.permute.xlu1 %5343  ;;  %v4577_v37 = vpack.c.bf16 %v2329_v50, %v2327_v62 }
 0x66a   :  { %v5346_v10 = vunpack.i.h.bf16 %v5344_v2  ;;  %v5345_v60 = vunpack.i.l.bf16 %v5344_v2  ;;  %v5356_v38 = vunpack.i.h.bf16 %v6717_v3  ;;  %v5355_v1 = vunpack.i.l.bf16 %v6717_v3 }
 0x66b   :  { %v5340_v2 = vunpack.i.l.bf16 %v6715_v43  ;;  %v4579_v3 = vpack.c.bf16 %v2328_v59, %v2326_v15 }
 0x66c   :  { %v2248_v5 = vsel %vm141_vm0, %v5306_v8, %v5345_v60  ;;  %v2249_v18 = vsel %vm141_vm0, %v5345_v60, %v5346_v10  ;;  %v2401_v13 = vsel %vm307_vm6, %v5355_v1, %v5356_v38 }
 0x66d   :  { %v4568_v24 = vpack.c.bf16 %v2248_v5, %v2246_v61  ;;  %v5359_v25 = vpop.permute.xlu0 %5358  ;;  %v5379_v30 = vpop.permute.xlu1 %5378  ;;  %v4565_v6 = vpack.c.bf16 %v2249_v18, %v2247_v14  ;;  %v5325_v5 = vunpack.i.l.bf16 %v6713_v63  ;;  %v2400_v18 = vsel %vm307_vm6, %v5326_v51, %v5355_v1 }
 0x66e   :  { %v5361_v23 = vunpack.i.h.bf16 %v5359_v25  ;;  %v5360_v16 = vunpack.i.l.bf16 %v5359_v25  ;;  %v5381_v39 = vunpack.i.h.bf16 %v5379_v30  ;;  %v5380_v42 = vunpack.i.l.bf16 %v5379_v30 }
 0x66f   :  { %4567 = vmatprep.subr.msk.bf16.mxu0 %vm6033_vm3, %v4565_v6  ;;  %v2399_v30 = vsel %vm307_vm6, %v5340_v2, %v5341_v49  ;;  %v2398_v6 = vsel %vm307_vm6, %v5325_v5, %v5340_v2 }
 0x670   :  { %v2250_v44 = vsel %vm141_vm0, %v5310_v48, %v5360_v16  ;;  %v2251_v54 = vsel %vm141_vm0, %v5360_v16, %v5361_v23  ;;  %v2252_v55 = vsel %vm141_vm0, %v5311_v40, %v5380_v42  ;;  %v2253_v7 = vsel %vm141_vm0, %v5380_v42, %v5381_v39  ;;  %4570 = vmatpush1.bf16.msk.msra.mxu0 %vm6040_vm4, %v4568_v24 }
 0x671   :  { %v4574_v56 = vpack.c.bf16 %v2252_v55, %v2250_v44  ;;  %v6732_v53 = vpop.permute.xlu0 %5363  ;;  %v6734_v57 = vpop.permute.xlu1 %5383  ;;  %v4571_v0 = vpack.c.bf16 %v2253_v7, %v2251_v54  ;;  %v4585_v16 = vpack.c.bf16 %v2401_v13, %v2399_v30  ;;  %v4588_v39 = vpack.c.bf16 %v2400_v18, %v2398_v6 }
 0x672   :  { %v5366_v42 = vunpack.i.h.bf16 %v6732_v53  ;;  %v5365_v63 = vunpack.i.l.bf16 %v6732_v53  ;;  %v5386_v50 = vunpack.i.h.bf16 %v6734_v57  ;;  %v5385_v44 = vunpack.i.l.bf16 %v6734_v57 }
 0x673   :  { %4573 = vmatprep.subr.msk.bf16.mxu0 %vm6033_vm3, %v4571_v0 }
 0x674   :  { %4576 = vmatpush1.bf16.msk.msra.mxu0 %vm6040_vm4, %v4574_v56  ;;  %v2479_v2 = vsel %vm388_vm11, %v5385_v44, %v5386_v50 }
 0x675   :  { %v5369_v8 = vpop.permute.xlu0 %5368  ;;  %v5394_v9 = vpop.permute.xlu1 %5393  ;;  %4578 = vmatprep.subr.bf16.mxu0 %v4577_v37 }
 0x676   :  { %v5371_v10 = vunpack.i.h.bf16 %v5369_v8  ;;  %v5370_v60 = vunpack.i.l.bf16 %v5369_v8  ;;  %v5396_v40 = vunpack.i.h.bf16 %v5394_v9  ;;  %v5395_v48 = vunpack.i.l.bf16 %v5394_v9 }
 0x678   :  { %v2330_v61 = vsel %vm222_vm5, %v5320_v4, %v5370_v60  ;;  %v2332_v34 = vsel %vm222_vm5, %v5321_v41, %v5395_v48  ;;  %4580 = vmatpush1.bf16.msra.mxu0 %v4579_v3  ;;  %v2331_v14 = vsel %vm222_vm5, %v5370_v60, %v5371_v10  ;;  %v2333_v43 = vsel %vm222_vm5, %v5395_v48, %v5396_v40 }
 0x679   :  { %v4583_v21 = vpack.c.bf16 %v2332_v34, %v2330_v61  ;;  %v5374_v22 = vpop.permute.xlu0 %5373  ;;  %v5399_v24 = vpop.permute.xlu1 %5398  ;;  %v4581_v25 = vpack.c.bf16 %v2333_v43, %v2331_v14 }
 0x67a   :  { %v5375_v23 = vunpack.i.l.bf16 %v5374_v22  ;;  %v5376_v19 = vunpack.i.h.bf16 %v5374_v22  ;;  %v5401_v54 = vunpack.i.h.bf16 %v5399_v24  ;;  %v5400_v38 = vunpack.i.l.bf16 %v5399_v24 }
 0x67b   :  { %4582 = vmatprep.subr.bf16.mxu0 %v4581_v25 }
 0x67c   :  { %4584 = vmatpush1.bf16.msra.mxu0 %v4583_v21  ;;  %v2402_v62 = vsel %vm307_vm6, %v5365_v63, %v5375_v23  ;;  %v2403_v1 = vsel %vm307_vm6, %v5375_v23, %v5376_v19  ;;  %v2478_v3 = vsel %vm388_vm11, %v5400_v38, %v5385_v44 }
 0x67d   :  { %v5389_v55 = vpop.permute.xlu0 %5388  ;;  %v5414_v7 = vpop.permute.xlu1 %5413  ;;  %4587 = vmatprep.subr.msk.bf16.mxu0 %vm6068_vm8, %v4585_v16 }
 0x67e   :  { %v5391_v56 = vunpack.i.h.bf16 %v5389_v55  ;;  %v5390_v0 = vunpack.i.l.bf16 %v5389_v55  ;;  %v5416_v58 = vunpack.i.h.bf16 %v5414_v7  ;;  %v5415_v59 = vunpack.i.l.bf16 %v5414_v7 }
 0x680   :  { %v2481_v53 = vsel %vm388_vm11, %v5390_v0, %v5391_v56  ;;  %v2404_v37 = vsel %vm307_vm6, %v5366_v42, %v5415_v59  ;;  %v2405_v57 = vsel %vm307_vm6, %v5415_v59, %v5416_v58  ;;  %4590 = vmatpush1.bf16.msk.msra.mxu0 %vm6076_vm10, %v4588_v39  ;;  %v2480_v8 = vsel %vm388_vm11, %v5401_v54, %v5390_v0 }
 0x681   :  { %v4591_v41 = vpack.c.bf16 %v2405_v57, %v2403_v1  ;;  %v4594_v15 = vpack.c.bf16 %v2404_v37, %v2402_v62  ;;  %v5404_v4 = vpop.permute.xlu0 %5403  ;;  %v5419_v49 = vpop.permute.xlu1 %5418  ;;  %v4597_v9 = vpack.c.bf16 %v2481_v53, %v2479_v2  ;;  %v4600_v40 = vpack.c.bf16 %v2480_v8, %v2478_v3 }
 0x682   :  { %v5406_v10 = vunpack.i.h.bf16 %v5404_v4  ;;  %v5405_v60 = vunpack.i.l.bf16 %v5404_v4  ;;  %v5421_v42 = vunpack.i.h.bf16 %v5419_v49  ;;  %v5420_v19 = vunpack.i.l.bf16 %v5419_v49 }
 0x683   :  { %4593 = vmatprep.subr.msk.bf16.mxu0 %vm6068_vm8, %v4591_v41 }
 0x684   :  { %4596 = vmatpush1.bf16.msk.msra.mxu0 %vm6076_vm10, %v4594_v15  ;;  %v2483_v43 = vsel %vm388_vm11, %v5405_v60, %v5406_v10  ;;  %v2575_v7 = vsel %vm485_vm12, %v5420_v19, %v5421_v42 }
 0x685   :  { %v5409_v48 = vpop.permute.xlu0 %5408  ;;  %v5429_v51 = vpop.permute.xlu1 %5428  ;;  %4599 = vmatprep.subr.msk.bf16.mxu0 %vm6033_vm3, %v4597_v9 }
 0x686   :  { %v5411_v13 = vunpack.i.h.bf16 %v5409_v48  ;;  %v5410_v61 = vunpack.i.l.bf16 %v5409_v48  ;;  %v5431_v34 = vunpack.i.h.bf16 %v5429_v51  ;;  %v5430_v14 = vunpack.i.l.bf16 %v5429_v51 }
 0x688   :  { %v2482_v5 = vsel %vm388_vm11, %v5410_v61, %v5405_v60  ;;  %v2484_v18 = vsel %vm388_vm11, %v5411_v13, %v5430_v14  ;;  %v2485_v21 = vsel %vm388_vm11, %v5430_v14, %v5431_v34  ;;  %4602 = vmatpush1.bf16.msk.msra.mxu0 %vm6040_vm4, %v4600_v40 }
 0x689   :  { %v4603_v22 = vpack.c.bf16 %v2485_v21, %v2483_v43  ;;  %v4606_v24 = vpack.c.bf16 %v2484_v18, %v2482_v5  ;;  %v5424_v25 = vpop.permute.xlu0 %5423  ;;  %v5434_v30 = vpop.permute.xlu1 %5433 }
 0x68a   :  { %v5426_v6 = vunpack.i.h.bf16 %v5424_v25  ;;  %v5425_v23 = vunpack.i.l.bf16 %v5424_v25  ;;  %v5436_v63 = vunpack.i.h.bf16 %v5434_v30  ;;  %v5435_v50 = vunpack.i.l.bf16 %v5434_v30 }
 0x68b   :  { %4605 = vmatprep.subr.msk.bf16.mxu0 %vm6033_vm3, %v4603_v22 }
 0x68c   :  { %4608 = vmatpush1.bf16.msk.msra.mxu0 %vm6040_vm4, %v4606_v24  ;;  %v2577_v44 = vsel %vm485_vm12, %v5425_v23, %v5426_v6  ;;  %v2576_v27 = vsel %vm485_vm12, %v5436_v63, %v5425_v23  ;;  %v2574_v11 = vsel %vm485_vm12, %v5435_v50, %v5420_v19 }
 0x68d   :  { %v5439_v16 = vpop.permute.xlu0 %5438  ;;  %v5444_v39 = vpop.permute.xlu1 %5443  ;;  %4610 = vmatprep.subr.bf16.mxu0 %v4609_v17  ;;  %v4617_v17 = vpack.c.bf16 %v2577_v44, %v2575_v7  ;;  %v4620_v26 = vpack.c.bf16 %v2576_v27, %v2574_v11 }
 0x68e   :  { %v5441_v56 = vunpack.i.h.bf16 %v5439_v16  ;;  %v5440_v0 = vunpack.i.l.bf16 %v5439_v16  ;;  %v5446_v59 = vunpack.i.h.bf16 %v5444_v39  ;;  %v5445_v62 = vunpack.i.l.bf16 %v5444_v39 }
 0x690   :  { %4612 = vmatpush1.bf16.msra.mxu0 %v4611_v35  ;;  %v2579_v38 = vsel %vm485_vm12, %v5440_v0, %v5441_v56  ;;  %v2655_v4 = vsel %vm566_vm13, %v5445_v62, %v5446_v59 }
 0x691   :  { %v5449_v54 = vpop.permute.xlu0 %5448  ;;  %v5454_v55 = vpop.permute.xlu1 %5453  ;;  %4614 = vmatprep.subr.bf16.mxu0 %v4613_v32 }
 0x692   :  { %v5451_v29 = vunpack.i.h.bf16 %v5449_v54  ;;  %v5450_v33 = vunpack.i.l.bf16 %v5449_v54  ;;  %v5456_v28 = vunpack.i.h.bf16 %v5454_v55  ;;  %v5455_v20 = vunpack.i.l.bf16 %v5454_v55 }
 0x694   :  { %4616 = vmatpush1.bf16.msra.mxu0 %v4615_v45  ;;  %v2657_v57 = vsel %vm566_vm13, %v5450_v33, %v5451_v29  ;;  %v2656_v10 = vsel %vm566_vm13, %v5456_v28, %v5450_v33  ;;  %v2654_v60 = vsel %vm566_vm13, %v5455_v20, %v5445_v62 }
 0x695   :  { %v5459_v31 = vpop.permute.xlu0 %5458  ;;  %v5464_v35 = vpop.permute.xlu1 %5463  ;;  %4619 = vmatprep.subr.msk.bf16.mxu0 %vm6068_vm8, %v4617_v17  ;;  %v4629_v3 = vpack.c.bf16 %v2657_v57, %v2655_v4  ;;  %v4632_v22 = vpack.c.bf16 %v2656_v10, %v2654_v60  ;;  %v2842_v10 = vld [vmem:[%s7245_s5 + $0x20] sm:$0xff] }
 0x696   :  { %v5466_v32 = vunpack.i.h.bf16 %v5464_v35  ;;  %v5465_v58 = vunpack.i.l.bf16 %v5464_v35  ;;  %v5461_v49 = vunpack.i.h.bf16 %v5459_v31  ;;  %v5460_v2 = vunpack.i.l.bf16 %v5459_v31 }
 0x698   :  { %v2581_v1 = vsel %vm485_vm12, %v5465_v58, %v5466_v32  ;;  %4622 = vmatpush1.bf16.msk.msra.mxu0 %vm6076_vm10, %v4620_v26  ;;  %v2659_v43 = vsel %vm566_vm13, %v5460_v2, %v5461_v49  ;;  %v2838_v49 = vld [vmem:[%s7245_s5] sm:$0xff] }
 0x699   :  { %v4623_v45 = vpack.c.bf16 %v2581_v1, %v2579_v38  ;;  %v5474_v53 = vpop.permute.xlu0 %5473  ;;  %v5469_v37 = vpop.permute.xlu1 %5468 }
 0x69a   :  { %v5476_v41 = vunpack.i.h.bf16 %v5474_v53  ;;  %v5475_v15 = vunpack.i.l.bf16 %v5474_v53  ;;  %v5471_v5 = vunpack.i.h.bf16 %v5469_v37  ;;  %v5470_v18 = vunpack.i.l.bf16 %v5469_v37 }
 0x69b   :  { %4625 = vmatprep.subr.msk.bf16.mxu0 %vm6068_vm8, %v4623_v45 }
 0x69c   :  { %v2578_v8 = vsel %vm485_vm12, %v5475_v15, %v5440_v0  ;;  %v2580_v9 = vsel %vm485_vm12, %v5476_v41, %v5465_v58  ;;  %v2735_v50 = vsel %vm7281_vm7, %v5470_v18, %v5471_v5  ;;  %vm7287_vm7 = vmmov %vm7284_vm1 }
 0x69d   :  { %v4626_v40 = vpack.c.bf16 %v2580_v9, %v2578_v8  ;;  %v5479_v48 = vpop.permute.xlu0 %5478  ;;  %v5484_v51 = vpop.permute.xlu1 %5483 }
 0x69e   :  { %v5481_v13 = vunpack.i.h.bf16 %v5479_v48  ;;  %v5480_v61 = vunpack.i.l.bf16 %v5479_v48  ;;  %v5486_v34 = vunpack.i.h.bf16 %v5484_v51  ;;  %v5485_v14 = vunpack.i.l.bf16 %v5484_v51 }
 0x69f   :  { %4628 = vmatpush1.bf16.msk.msra.mxu0 %vm6076_vm10, %v4626_v40 }
 0x6a0   :  { %v2661_v21 = vsel %vm566_vm13, %v5485_v14, %v5486_v34  ;;  %4631 = vmatprep.subr.msk.bf16.mxu0 %vm6033_vm3, %v4629_v3  ;;  %v2737_v6 = vsel %vm7280_vm2, %v5480_v61, %v5481_v13  ;;  %vm7286_vm2 = vmmov %vm7284_vm1 }
 0x6a1   :  { %v4635_v24 = vpack.c.bf16 %v2661_v21, %v2659_v43  ;;  %v5494_v25 = vpop.permute.xlu0 %5493  ;;  %v5489_v30 = vpop.permute.xlu1 %5488  ;;  %v4641_v11 = vpack.c.bf16 %v2737_v6, %v2735_v50  ;;  %v2841_v43 = vld [vmem:[%s7245_s5 + $0x18] sm:$0xff]  ;;  %v2844_v6 = vld [vmem:[%s7245_s5 + $0x30] sm:$0xff] }
 0x6a2   :  { %v5496_v23 = vunpack.i.h.bf16 %v5494_v25  ;;  %v5495_v16 = vunpack.i.l.bf16 %v5494_v25  ;;  %v5491_v39 = vunpack.i.h.bf16 %v5489_v30  ;;  %v5490_v42 = vunpack.i.l.bf16 %v5489_v30  ;;  %v2845_v21 = vld [vmem:[%s7245_s5 + $0x38] sm:$0xff]  ;;  %v2840_v50 = vld [vmem:[%s7245_s5 + $0x10] sm:$0xff] }
 0x6a3   :  { %4634 = vmatpush1.bf16.msk.msra.mxu0 %vm6040_vm4, %v4632_v22 }
 0x6a4   :  { %v2658_v19 = vsel %vm566_vm13, %v5495_v16, %v5460_v2  ;;  %v2660_v63 = vsel %vm566_vm13, %v5496_v23, %v5485_v14  ;;  %4637 = vmatprep.subr.msk.bf16.mxu0 %vm6033_vm3, %v4635_v24  ;;  %v2736_v54 = vsel %vm7282_vm14, %v5491_v39, %v5480_v61  ;;  %v2734_v55 = vsel %vm7283_vm15, %v5490_v42, %v5470_v18  ;;  %v2848_v39 = vld [vmem:[%s7245_s5 + $0x50] sm:$0xff] }
 0x6a5   :  { %v4638_v44 = vpack.c.bf16 %v2660_v63, %v2658_v19  ;;  %v5499_v7 = vpop.permute.xlu0 %5498  ;;  %v5504_v27 = vpop.permute.xlu1 %5503  ;;  %v4643_v29 = vpack.c.bf16 %v2736_v54, %v2734_v55  ;;  %vm7288_vm14 = vcmask 908288   ;;  %v2847_v19 = vld [vmem:[%s7245_s5 + $0x48] sm:$0xff]  ;;  %v6880_v63 = vld [vmem:[#allocation2] sm:$0xff]  ;;  %v2849_v55 = vld [vmem:[%s7245_s5 + $0x58] sm:$0xff] }
 0x6a6   :  { %v5501_v17 = vunpack.i.h.bf16 %v5499_v7  ;;  %v5500_v56 = vunpack.i.l.bf16 %v5499_v7  ;;  %v5506_v0 = vunpack.i.h.bf16 %v5504_v27  ;;  %v5505_v26 = vunpack.i.l.bf16 %v5504_v27  ;;  %vm7289_vm15 = vmmov %vm7288_vm14  ;;  %v2846_v54 = vld [vmem:[%s7245_s5 + $0x40] sm:$0xff] }
 0x6a7   :  { %4640 = vmatpush1.bf16.msk.msra.mxu0 %vm6040_vm4, %v4638_v44  ;;  %v2843_v44 = vld [vmem:[%s7245_s5 + $0x28] sm:$0xff] }
 0x6a8   :  { %4642 = vmatprep.subr.bf16.mxu0 %v4641_v11  ;;  %v2739_v31 = vsel %vm7284_vm1, %v5500_v56, %v5501_v17  ;;  %v2741_v35 = vsel %vm7285_vm9, %v5505_v26, %v5506_v0  ;;  %vm7290_vm1 = vmmov %vm7288_vm14 }
 0x6a9   :  { %v5509_v33 = vpop.permute.xlu0 %5508  ;;  %v5514_v32 = vpop.permute.xlu1 %5513  ;;  %v4645_v58 = vpack.c.bf16 %v2741_v35, %v2739_v31  ;;  %vm7291_vm9 = vmmov %vm7290_vm1 }
 0x6aa   :  { %v5511_v59 = vunpack.i.h.bf16 %v5509_v33  ;;  %v5510_v62 = vunpack.i.l.bf16 %v5509_v33  ;;  %v5516_v28 = vunpack.i.h.bf16 %v5514_v32  ;;  %v5515_v20 = vunpack.i.l.bf16 %v5514_v32 }
 0x6ab   :  { %4644 = vmatpush1.bf16.msra.mxu0 %v4643_v29 }
 0x6ac   :  { %v2738_v38 = vsel %vm7286_vm2, %v5510_v62, %v5500_v56  ;;  %v2740_v1 = vsel %vm7287_vm7, %v5511_v59, %v5505_v26  ;;  %4646 = vmatprep.subr.bf16.mxu0 %v4645_v58  ;;  %v2807_v2 = vsel %vm7288_vm14, %v5515_v20, %v5516_v28  ;;  %vm7292_vm2 = vmmov %vm7290_vm1 }
 0x6ad   :  { %v4647_v45 = vpack.c.bf16 %v2740_v1, %v2738_v38  ;;  %v5519_v53 = vpop.permute.xlu0 %5518  ;;  %v5524_v37 = vpop.permute.xlu1 %5523  ;;  %vm7293_vm7 = vmmov %vm7290_vm1 }
 0x6ae   :  { %v5521_v57 = vunpack.i.h.bf16 %v5519_v53  ;;  %v5520_v41 = vunpack.i.l.bf16 %v5519_v53  ;;  %v5526_v15 = vunpack.i.h.bf16 %v5524_v37  ;;  %v5525_v4 = vunpack.i.l.bf16 %v5524_v37  ;;  %vm7294_vm14 = vmmov %vm7290_vm1 }
 0x6af   :  { %4648 = vmatpush1.bf16.msra.mxu0 %v4647_v45 }
 0x6b0   :  { %v2809_v8 = vsel %vm7289_vm15, %v5520_v41, %v5521_v57  ;;  %v2808_v9 = vsel %vm7290_vm1, %v5526_v15, %v5520_v41  ;;  %v2806_v3 = vsel %vm7291_vm9, %v5525_v4, %v5515_v20  ;;  %vm7295_vm15 = vmmov %vm7290_vm1  ;;  %vm7296_vm1 = vcmask 261120  }
 0x6b1   :  { %v4649_v60 = vpack.c.bf16 %v2809_v8, %v2807_v2  ;;  %v4652_v40 = vpack.c.bf16 %v2808_v9, %v2806_v3  ;;  %v5529_v48 = vpop.permute.xlu0 %5528  ;;  %v5534_v51 = vpop.permute.xlu1 %5533  ;;  %vm7297_vm9 = vmmov %vm7296_vm1 }
 0x6b2   :  { %v5531_v13 = vunpack.i.h.bf16 %v5529_v48  ;;  %v5530_v61 = vunpack.i.l.bf16 %v5529_v48  ;;  %v5536_v34 = vunpack.i.h.bf16 %v5534_v51  ;;  %v5535_v14 = vunpack.i.l.bf16 %v5534_v51  ;;  %3023 = vmatmul.mubr.f32.vlgmr.msra.gmra.mrb[8].mxu0 %v2838_v49 }
 0x6b3   :  { %4651 = vmatprep.subr.msk.bf16.mxu0 %vm6068_vm8, %v4649_v60  ;;  %3028 = vmatprep.mubr.f32.mxu0 %v2842_v10 }
 0x6b4   :  { %v2811_v5 = vsel %vm7292_vm2, %v5530_v61, %v5531_v13  ;;  %v2813_v18 = vsel %vm7293_vm7, %v5535_v14, %v5536_v34  ;;  %4654 = vmatpush1.bf16.msk.msra.mxu0 %vm6076_vm10, %v4652_v40  ;;  %vm7298_vm2 = vmmov %vm7296_vm1 }
 0x6b5   :  { %v4655_v22 = vpack.c.bf16 %v2813_v18, %v2811_v5  ;;  %v5539_v24 = vpop.permute.xlu0 %5538  ;;  %vm7299_vm7 = vmmov %vm7296_vm1 }
 0x6b6   :  { %v5541_v25 = vunpack.i.h.bf16 %v5539_v24  ;;  %v5540_v30 = vunpack.i.l.bf16 %v5539_v24  ;;  %3029 = vmatmul.mubr.f32.gmra.mrb[10].mxu0 %v2841_v43 }
 0x6b7   :  { %4657 = vmatprep.subr.msk.bf16.mxu0 %vm6068_vm8, %v4655_v22  ;;  %3034 = vmatprep.mubr.f32.mxu0 %v2845_v21 }
 0x6b8   :  { %v2810_v23 = vsel %vm7294_vm14, %v5540_v30, %v5530_v61  ;;  %v2812_v16 = vsel %vm7295_vm15, %v5541_v25, %v5535_v14 }
 0x6b9   :  { %v4658_v42 = vpack.c.bf16 %v2812_v16, %v2810_v23 }
 0x6ba   :  { %3035 = vmatmul.mubr.f32.gmra.mrb[12].mxu0 %v2844_v6 }
 0x6bb   :  { %4660 = vmatpush1.bf16.msk.msra.mxu0 %vm6076_vm10, %v4658_v42  ;;  %3040 = vmatprep.mubr.f32.mxu0 %v2848_v39  ;;  %v6936_v42 = vpack.i.bf16 %v6880_v63, %v6880_v63 }
 0x6be   :  { %3041 = vmatmul.mubr.f32.gmra.mrb[14].mxu0 %v2847_v19 }
 0x6bf   :  { %3111 = vmatprep.mubr.f32.mxu0 %v6880_v63 }
 0x6c2   :  { %4175 = vmatmul.mubr.msk.f32.vlgmr.msra.gmra.mrb[8].mxu0 %vm7296_vm1, %v2840_v50  ;;  %v2929_v7 = vpop.permute.xlu1 %2928 }
 0x6c3   :  { %3117 = vmatprep.mubr.f32.mxu0 %v6880_v63 }
 0x6c6   :  { %4176 = vmatmul.mubr.msk.f32.gmra.mrb[10].mxu0 %vm7297_vm9, %v2843_v44  ;;  %v2934_v0 = vpop.permute.xlu0 %2933  ;;  %v2939_v32 = vpop.permute.xlu1 %2938 }
 0x6c7   :  { %3123 = vmatprep.mubr.f32.mxu0 %v6880_v63 }
 0x6ca   :  { %4177 = vmatmul.mubr.msk.f32.gmra.mrb[12].mxu0 %vm7298_vm2, %v2846_v54  ;;  %v2944_v28 = vpop.permute.xlu0 %2943 }
 0x6cb   :  { %3129 = vmatprep.mubr.f32.mxu0 %v6880_v63 }
 0x6ce   :  { %4178 = vmatmul.mubr.msk.f32.gmra.mrb[14].mxu0 %vm7299_vm7, %v2849_v55 }
 0x795   :  { %v3113_v27 = vpop.f32.mrb[8].mxu0 }
 0x796   :  { %v4781_v11 = vadd.f32 %v3113_v27, %v2929_v7  ;;  %v3115_v17 = vpop.f32.mrb[9].mxu0 }
 0x797   :  { %v4782_v56 = vadd.f32 %v3115_v17, %v2929_v7 }
 0x799   :  { %v3136_v26 = vadd.f32 %v4782_v56, %v4781_v11  ;;  %v3119_v31 = vpop.f32.mrb[10].mxu0 }
 0x79a   :  { %v4783_v35 = vadd.f32 %v3119_v31, %v2934_v0  ;;  %v3121_v29 = vpop.f32.mrb[11].mxu0 }
 0x79b   :  { %v4784_v33 = vadd.f32 %v3121_v29, %v2934_v0  ;;  %3137 = vadd.xlane.f32.xlu1 %v3136_v26 }
 0x79d   :  { %v3139_v58 = vadd.f32 %v4784_v33, %v4783_v35  ;;  %v3125_v59 = vpop.f32.mrb[12].mxu0 }
 0x79e   :  { %v4785_v62 = vadd.f32 %v3125_v59, %v2939_v32  ;;  %v3127_v38 = vpop.f32.mrb[13].mxu0 }
 0x79f   :  { %v4786_v1 = vadd.f32 %v3127_v38, %v2939_v32  ;;  %3140 = vadd.xlane.f32.xlu0 %v3139_v58 }
 0x7a1   :  { %v3142_v20 = vadd.f32 %v4786_v1, %v4785_v62  ;;  %v3131_v45 = vpop.f32.mrb[14].mxu0 }
 0x7a2   :  { %v4787_v53 = vadd.f32 %v3131_v45, %v2944_v28  ;;  %v3133_v37 = vpop.f32.mrb[15].mxu0 }
 0x7a3   :  { %v4788_v57 = vadd.f32 %v3133_v37, %v2944_v28  ;;  %3143 = vadd.xlane.f32.xlu0 %v3142_v20 }
 0x7a5   :  { %v3145_v41 = vadd.f32 %v4788_v57, %v4787_v53 }
 0x7a7   :  { %3146 = vadd.xlane.f32.xlu1 %v3145_v41 }
 0x828   :  { %v3138_v15 = vpop.xlane.xlu1 %3137 }
 0x829   :  { %v3148_v4 = vmul.f32 0.00390625, %v3138_v15 }
 0x82b   :  { %v6902_v49 = vsub.f32 %v4781_v11, %v3148_v4  ;;  %v6904_v2 = vsub.f32 %v4782_v56, %v3148_v4 }
 0x82c   :  { %v3141_v8 = vpop.xlane.xlu0 %3140 }
 0x82d   :  { %v3160_v9 = vmul.f32 %v6902_v49, %v6902_v49  ;;  %v3161_v3 = vmul.f32 %v6904_v2, %v6904_v2  ;;  %v3149_v10 = vmul.f32 0.00390625, %v3141_v8 }
 0x82f   :  { %v6910_v60 = vsub.f32 %v4783_v35, %v3149_v10  ;;  %v6912_v40 = vsub.f32 %v4784_v33, %v3149_v10  ;;  %v3168_v48 = vadd.f32 %v3161_v3, %v3160_v9 }
 0x830   :  { %v3144_v51 = vpop.xlane.xlu0 %3143 }
 0x831   :  { %v3162_v13 = vmul.f32 %v6910_v60, %v6910_v60  ;;  %v3163_v61 = vmul.f32 %v6912_v40, %v6912_v40  ;;  %v3150_v34 = vmul.f32 0.00390625, %v3144_v51  ;;  %3169 = vadd.xlane.f32.xlu0 %v3168_v48 }
 0x833   :  { %v6918_v14 = vsub.f32 %v4785_v62, %v3150_v34  ;;  %v6920_v43 = vsub.f32 %v4786_v1, %v3150_v34  ;;  %v3171_v5 = vadd.f32 %v3163_v61, %v3162_v13 }
 0x834   :  { %v3147_v18 = vpop.xlane.xlu1 %3146 }
 0x835   :  { %v3164_v21 = vmul.f32 %v6918_v14, %v6918_v14  ;;  %v3165_v22 = vmul.f32 %v6920_v43, %v6920_v43  ;;  %v3151_v24 = vmul.f32 0.00390625, %v3147_v18  ;;  %3172 = vadd.xlane.f32.xlu1 %v3171_v5 }
 0x837   :  { %v6926_v25 = vsub.f32 %v4787_v53, %v3151_v24  ;;  %v6928_v30 = vsub.f32 %v4788_v57, %v3151_v24  ;;  %v3174_v6 = vadd.f32 %v3165_v22, %v3164_v21 }
 0x839   :  { %v3166_v23 = vmul.f32 %v6926_v25, %v6926_v25  ;;  %v3167_v16 = vmul.f32 %v6928_v30, %v6928_v30  ;;  %3175 = vadd.xlane.f32.xlu0 %v3174_v6 }
 0x83b   :  { %v3177_v39 = vadd.f32 %v3167_v16, %v3166_v23 }
 0x83d   :  { %3178 = vadd.xlane.f32.xlu1 %v3177_v39 }
 0x84e   :  { %5543 = vrot.lane.b32.xlu1 %v6936_v42, %s5839_s11 }
 0x84f   :  { %5548 = vrot.lane.b32.xlu0 %v6936_v42, %s5839_s11 }
 0x852   :  { %5553 = vrot.lane.b32.xlu1 %v6936_v42, %s5840_s0 }
 0x853   :  { %5558 = vrot.lane.b32.xlu0 %v6936_v42, %s5840_s0 }
 0x856   :  { %5563 = vrot.lane.b32.xlu1 %v6936_v42, %s5841_s12 }
 0x857   :  { %5568 = vrot.lane.b32.xlu0 %v6936_v42, %s5841_s12 }
 0x8be   :  { %v3170_v19 = vpop.xlane.xlu0 %3169 }
 0x8bf   :  { %v3180_v50 = vmul.f32 0.003921569, %v3170_v19  ;;  %v5849_v19 = vmov 1983009808  }
 0x8c1   :  { %5816 = vrsqrt.f32 %v3180_v50  ;;  %vm3186_vm14 = vcmp.eq.f32.partialorder %v3180_v50, inf  ;;  %v3189_v0 = vand.u32 2147483648, %v3180_v50  ;;  %vm3188_vm15 = vcmp.eq.f32.partialorder %v3180_v50, 0.0 }
 0x8c2   :  { %v3173_v44 = vpop.xlane.xlu1 %3172 }
 0x8c3   :  { %v3181_v54 = vmul.f32 0.003921569, %v3173_v44 }
 0x8c5   :  { %5818 = vrsqrt.f32 %v3181_v54  ;;  %vm3193_vm1 = vcmp.eq.f32.partialorder %v3181_v54, inf  ;;  %v3196_v32 = vand.u32 2147483648, %v3181_v54  ;;  %vm3195_vm9 = vcmp.eq.f32.partialorder %v3181_v54, 0.0 }
 0x8c6   :  { %v3176_v55 = vpop.xlane.xlu0 %3175 }
 0x8c7   :  { %v3182_v7 = vmul.f32 0.003921569, %v3176_v55 }
 0x8c9   :  { %5820 = vrsqrt.f32 %v3182_v7  ;;  %vm3200_vm2 = vcmp.eq.f32.partialorder %v3182_v7, inf  ;;  %v3203_v28 = vand.u32 2147483648, %v3182_v7  ;;  %vm3202_vm7 = vcmp.eq.f32.partialorder %v3182_v7, 0.0 }
 0x8ca   :  { %v3179_v27 = vpop.xlane.xlu1 %3178 }
 0x8cb   :  { %v5817_v11 = vpop.eup %5816  ;;  %v3183_v17 = vmul.f32 0.003921569, %v3179_v27 }
 0x8cc   :  { %v3185_v56 = vmul.f32 %v5817_v11, %v3180_v50 }
 0x8cd   :  { %5822 = vrsqrt.f32 %v3183_v17  ;;  %v3210_v41 = vand.u32 2147483648, %v3183_v17 }
 0x8ce   :  { %v3187_v26 = vsel %vm3186_vm14, %v3180_v50, %v3185_v56  ;;  %vm3207_vm14 = vcmp.eq.f32.partialorder %v3183_v17, inf  ;;  %v3962_v50 = vunpack.c.l.s4 %v5849_v19  ;;  %v3953_v56 = vld [vmem:[%s7248_s8] sm:$0x3] }
 0x8cf   :  { %v5819_v31 = vpop.eup %5818  ;;  %v3190_v35 = vsel %vm3188_vm15, %v3189_v0, %v3187_v26  ;;  %vm3209_vm15 = vcmp.eq.f32.partialorder %v3183_v17, 0.0  ;;  %v5549_v0 = vpop.permute.xlu0 %5548 }
 0x8d0   :  { %v3212_v29 = vadd.f32 1e-07, %v3190_v35  ;;  %v3192_v33 = vmul.f32 %v5819_v31, %v3181_v54  ;;  %v3963_v44 = vunpack.c.0.s8 %v3962_v50  ;;  %v5544_v26 = vpop.permute.xlu1 %5543 }
 0x8d2   :  { %5824 = vrcp.f32 %v3212_v29  ;;  %v3194_v58 = vsel %vm3193_vm1, %v3181_v54, %v3192_v33  ;;  %v3965_v54 = vshrl.u32 %v54_v12, 7 }
 0x8d3   :  { %v5821_v59 = vpop.eup %5820  ;;  %v3197_v62 = vsel %vm3195_vm9, %v3196_v32, %v3194_v58  ;;  %v7061_v31 = vpop.permute.xlu0 %5558 }
 0x8d4   :  { %v3213_v38 = vadd.f32 1e-07, %v3197_v62  ;;  %v3199_v1 = vmul.f32 %v5821_v59, %v3182_v7  ;;  %v3966_v55 = vsub.s32 %v3963_v44, %v3965_v54  ;;  %v5554_v35 = vpop.permute.xlu1 %5553 }
 0x8d6   :  { %5826 = vrcp.f32 %v3213_v38  ;;  %v3201_v20 = vsel %vm3200_vm2, %v3182_v7, %v3199_v1  ;;  %v3880_v7 = vld [vmem:[%s7247_s7] sm:$0x3f] }
 0x8d7   :  { %v5823_v45 = vpop.eup %5822  ;;  %v3204_v53 = vsel %vm3202_vm7, %v3203_v28, %v3201_v20  ;;  %v7044_v27 = vrot.slane %v3880_v7, %v3966_v55  ;;  %v3960_v12 = vcombine.high %v3880_v7, %v3880_v7  ;;  %v7063_v29 = vpop.permute.xlu0 %5568 }
 0x8d8   :  { %v3214_v37 = vadd.f32 1e-07, %v3204_v53  ;;  %v3206_v57 = vmul.f32 %v5823_v45, %v3183_v17  ;;  %v7065_v33 = vpop.permute.xlu1 %5563  ;;  %v5545_v45 = vunpack.i.l.bf16 %v5544_v26 }
 0x8d9   :  { %v3975_v11 = vcombine.high %v7044_v27, %v7044_v27 }
 0x8da   :  { %5828 = vrcp.f32 %v3214_v37  ;;  %v3208_v15 = vsel %vm3207_vm14, %v3183_v17, %v3206_v57  ;;  %v7052_v17 = vrot.slane %v3960_v12, %v3966_v55  ;;  %v5546_v57 = vunpack.i.h.bf16 %v5544_v26 }
 0x8db   :  { %v3211_v4 = vsel %vm3209_vm15, %v3210_v41, %v3208_v15  ;;  %4044 = vmatprep.mubr.f32.mxu1 %v3975_v11  ;;  %v5556_v12 = vunpack.i.h.bf16 %v5554_v35 }
 0x8dc   :  { %v5825_v8 = vpop.eup %5824  ;;  %v3215_v9 = vadd.f32 1e-07, %v3211_v4 }
 0x8dd   :  { %v6951_v3 = vmul.f32 %v5825_v8, %v6902_v49  ;;  %v6954_v10 = vmul.f32 %v5825_v8, %v6904_v2 }
 0x8de   :  { %5830 = vrcp.f32 %v3215_v9 }
 0x8df   :  { %3232 = vst [vmem:[#allocation2 + $0x8] sm:$0xff] %v6951_v3  ;;  %3233 = vst [vmem:[#allocation2 + $0x10] sm:$0xff] %v6954_v10  ;;  %v5572_v48 = vpack.i.bf16 %v6954_v10, %v6951_v3 }
 0x8e0   :  { %v5827_v51 = vpop.eup %5826 }
 0x8e1   :  { %v6961_v13 = vmul.f32 %v5827_v51, %v6910_v60  ;;  %v6964_v61 = vmul.f32 %v5827_v51, %v6912_v40  ;;  %5573 = vrot.lane.b32.xlu0 %v5572_v48, %s5839_s11  ;;  %5578 = vrot.lane.b32.xlu1 %v5572_v48, %s5840_s0 }
 0x8e3   :  { %v5597_v49 = vpack.i.bf16 %v6964_v61, %v6961_v13  ;;  %v4705_v2 = vpack.c.bf16 %v6964_v61, %v6954_v10  ;;  %v4707_v5 = vpack.c.bf16 %v6961_v13, %v6951_v3  ;;  %v5657_v6 = vpack.i.bf16 %v6880_v63, %v6964_v61 }
 0x8e4   :  { %v5829_v34 = vpop.eup %5828  ;;  %v5667_v23 = vpack.i.bf16 %v6961_v13, %v6951_v3 }
 0x8e5   :  { %v6975_v60 = vmul.f32 %v5829_v34, %v6918_v14  ;;  %v6978_v40 = vmul.f32 %v5829_v34, %v6920_v43  ;;  %5583 = vrot.lane.b32.xlu1 %v5572_v48, %s5841_s12  ;;  %5598 = vrot.lane.b32.xlu0 %v5597_v49, %s5840_s0 }
 0x8e7   :  { %v5607_v14 = vpack.i.bf16 %v6978_v40, %v6975_v60  ;;  %v5672_v16 = vpack.i.bf16 %v6880_v63, %v6978_v40 }
 0x8e8   :  { %v5831_v18 = vpop.eup %5830 }
 0x8e9   :  { %v6983_v21 = vmul.f32 %v5831_v18, %v6926_v25  ;;  %v6986_v22 = vmul.f32 %v5831_v18, %v6928_v30  ;;  %5588 = vrot.lane.b32.xlu1 %v5572_v48, %s5842_s13  ;;  %5603 = vrot.lane.b32.xlu0 %v5597_v49, %s5841_s12  ;;  %v5652_v30 = vpack.i.bf16 %v6880_v63, %v6954_v10 }
 0x8eb   :  { %v4709_v43 = vpack.c.bf16 %v6986_v22, %v6978_v40  ;;  %v4711_v24 = vpack.c.bf16 %v6983_v21, %v6975_v60  ;;  %v5627_v25 = vpack.i.bf16 %v6986_v22, %v6983_v21  ;;  %v5722_v39 = vpack.i.bf16 %v6983_v21, %v6975_v60 }
 0x8ed   :  { %5608 = vrot.lane.b32.xlu0 %v5607_v14, %s5839_s11  ;;  %5593 = vrot.lane.b32.xlu1 %v5597_v49, %s5839_s11 }
 0x8f1   :  { %5613 = vrot.lane.b32.xlu0 %v5597_v49, %s5842_s13  ;;  %5628 = vrot.lane.b32.xlu1 %v5627_v25, %s5839_s11 }
 0x8f5   :  { %5618 = vrot.lane.b32.xlu0 %v5607_v14, %s5840_s0  ;;  %5633 = vrot.lane.b32.xlu1 %v6936_v42, %s5842_s13 }
 0x8f9   :  { %5623 = vrot.lane.b32.xlu0 %v5607_v14, %s5841_s12  ;;  %5648 = vrot.lane.b32.xlu1 %v5627_v25, %s5840_s0 }
 0x8fd   :  { %5638 = vrot.lane.b32.xlu0 %v5607_v14, %s5842_s13  ;;  %5653 = vrot.lane.b32.xlu1 %v5652_v30, %s5843_s14  ;;  %v5551_v14 = vunpack.i.h.bf16 %v5549_v0 }
 0x901   :  { %5643 = vrot.lane.b32.xlu0 %v6936_v42, %s5842_s13  ;;  %5663 = vrot.lane.b32.xlu1 %v5627_v25, %s5841_s12  ;;  %v5712_v42 = vpack.i.bf16 %v6880_v63, %v6986_v22 }
 0x905   :  { %5658 = vrot.lane.b32.xlu0 %v5657_v6, %s5843_s14  ;;  %5668 = vrot.lane.b32.xlu1 %v5667_v23, %s5843_s14 }
 0x909   :  { %5673 = vrot.lane.b32.xlu0 %v5672_v16, %s5843_s14  ;;  %5678 = vrot.lane.b32.xlu1 %v5627_v25, %s5842_s13  ;;  %v5550_v25 = vunpack.i.l.bf16 %v5549_v0 }
 0x90d   :  { %5688 = vrot.lane.b32.xlu0 %v5657_v6, %s5844_s15  ;;  %5683 = vrot.lane.b32.xlu1 %v5652_v30, %s5844_s15 }
 0x911   :  { %5698 = vrot.lane.b32.xlu0 %v5672_v16, %s5844_s15  ;;  %5693 = vrot.lane.b32.xlu1 %v5667_v23, %s5844_s15 }
 0x915   :  { %5708 = vrot.lane.b32.xlu0 %v5657_v6, %s5845_s16  ;;  %5703 = vrot.lane.b32.xlu1 %v5652_v30, %s5845_s16 }
 0x919   :  { %5723 = vrot.lane.b32.xlu0 %v5722_v39, %s5843_s14  ;;  %5713 = vrot.lane.b32.xlu1 %v5712_v42, %s5843_s14 }
 0x91d   :  { %5728 = vrot.lane.b32.xlu0 %v5672_v16, %s5845_s16  ;;  %5718 = vrot.lane.b32.xlu1 %v5667_v23, %s5845_s16 }
 0x921   :  { %5743 = vrot.lane.b32.xlu0 %v5722_v39, %s5844_s15  ;;  %5733 = vrot.lane.b32.xlu1 %v5712_v42, %s5844_s15 }
 0x925   :  { %5748 = vrot.lane.b32.xlu0 %v5657_v6, %s5846_s17  ;;  %5738 = vrot.lane.b32.xlu1 %v5652_v30, %s5846_s17 }
 0x929   :  { %5763 = vrot.lane.b32.xlu0 %v5722_v39, %s5845_s16  ;;  %5753 = vrot.lane.b32.xlu1 %v5712_v42, %s5845_s16 }
 0x92d   :  { %5768 = vrot.lane.b32.xlu0 %v5672_v16, %s5846_s17  ;;  %5758 = vrot.lane.b32.xlu1 %v5667_v23, %s5846_s17 }
 0x931   :  { %5778 = vrot.lane.b32.xlu0 %v5722_v39, %s5846_s17  ;;  %5773 = vrot.lane.b32.xlu1 %v5712_v42, %s5846_s17 }
 0x935   :  { %3956 = vperm.xlu1 %5061, %v3953_v56  }
 0x953   :  { %v5574_v32 = vpop.permute.xlu0 %5573  ;;  %v5579_v58 = vpop.permute.xlu1 %5578 }
 0x954   :  { %v5576_v28 = vunpack.i.h.bf16 %v5574_v32  ;;  %v5575_v20 = vunpack.i.l.bf16 %v5574_v32  ;;  %v5581_v39 = vunpack.i.h.bf16 %v5579_v58  ;;  %v5580_v42 = vunpack.i.l.bf16 %v5579_v58 }
 0x955   :  { %v5555_v58 = vunpack.i.l.bf16 %v5554_v35  ;;  %v5560_v35 = vunpack.i.l.bf16 %v7061_v31 }
 0x956   :  { %v3288_v4 = vsel %vm141_vm0, %v5545_v45, %v5575_v20  ;;  %v3289_v8 = vsel %vm141_vm0, %v5575_v20, %v5576_v28 }
 0x957   :  { %v5599_v59 = vpop.permute.xlu0 %5598  ;;  %v7067_v62 = vpop.permute.xlu1 %5583 }
 0x958   :  { %v5601_v9 = vunpack.i.h.bf16 %v5599_v59  ;;  %v5600_v48 = vunpack.i.l.bf16 %v5599_v59  ;;  %v3369_v59 = vsel %vm222_vm5, %v5580_v42, %v5581_v39 }
 0x95a   :  { %v3371_v44 = vsel %vm222_vm5, %v5600_v48, %v5601_v9  ;;  %v3370_v28 = vsel %vm222_vm5, %v5556_v12, %v5600_v48  ;;  %v5585_v48 = vunpack.i.l.bf16 %v7067_v62  ;;  %v5571_v12 = vunpack.i.h.bf16 %v7063_v29 }
 0x95b   :  { %v7069_v38 = vpop.permute.xlu0 %5603  ;;  %v7071_v1 = vpop.permute.xlu1 %5588 }
 0x95c   :  { %v5606_v20 = vunpack.i.h.bf16 %v7069_v38  ;;  %v5605_v45 = vunpack.i.l.bf16 %v7069_v38 }
 0x95f   :  { %v5609_v53 = vpop.permute.xlu0 %5608  ;;  %v5594_v37 = vpop.permute.xlu1 %5593 }
 0x960   :  { %v5596_v41 = vunpack.i.h.bf16 %v5594_v37  ;;  %v5595_v15 = vunpack.i.l.bf16 %v5594_v37  ;;  %v5611_v51 = vunpack.i.h.bf16 %v5609_v53  ;;  %v5610_v49 = vunpack.i.l.bf16 %v5609_v53 }
 0x961   :  { %v4673_v53 = vpack.c.bf16 %v3371_v44, %v3369_v59 }
 0x962   :  { %v3290_v34 = vsel %vm141_vm0, %v5546_v57, %v5595_v15  ;;  %v3291_v18 = vsel %vm141_vm0, %v5595_v15, %v5596_v41  ;;  %v3292_v54 = vsel %vm141_vm0, %v5550_v25, %v5610_v49  ;;  %v3293_v55 = vsel %vm141_vm0, %v5610_v49, %v5611_v51 }
 0x963   :  { %v4661_v30 = vpack.c.bf16 %v3291_v18, %v3289_v8  ;;  %v4664_v6 = vpack.c.bf16 %v3290_v34, %v3288_v4  ;;  %v7077_v23 = vpop.permute.xlu0 %5613  ;;  %v5629_v16 = vpop.permute.xlu1 %5628  ;;  %v5561_v41 = vunpack.i.h.bf16 %v7061_v31  ;;  %v3368_v15 = vsel %vm222_vm5, %v5555_v58, %v5580_v42 }
 0x964   :  { %v5631_v19 = vunpack.i.h.bf16 %v5629_v16  ;;  %v5630_v50 = vunpack.i.l.bf16 %v5629_v16  ;;  %v5586_v4 = vunpack.i.h.bf16 %v7067_v62  ;;  %v4675_v38 = vpack.c.bf16 %v3370_v28, %v3368_v15 }
 0x965   :  { %4663 = vmatprep.subr.msk.bf16.mxu1 %vm6033_vm3, %v4661_v30  ;;  %v3443_v34 = vsel %vm307_vm6, %v5605_v45, %v5606_v20  ;;  %v5566_v30 = vunpack.i.h.bf16 %v7065_v33  ;;  %v5565_v42 = vunpack.i.l.bf16 %v7065_v33  ;;  %v5591_v33 = vunpack.i.h.bf16 %v7071_v1 }
 0x966   :  { %v3294_v7 = vsel %vm141_vm0, %v5551_v14, %v5630_v50  ;;  %v3295_v11 = vsel %vm141_vm0, %v5630_v50, %v5631_v19  ;;  %4666 = vmatpush1.bf16.msk.msra.mxu1 %vm6040_vm4, %v4664_v6  ;;  %v3441_v19 = vsel %vm307_vm6, %v5585_v48, %v5586_v4  ;;  %vm7300_vm0 = vcmask 916480  }
 0x967   :  { %v4667_v56 = vpack.c.bf16 %v3295_v11, %v3293_v55  ;;  %v4670_v0 = vpack.c.bf16 %v3294_v7, %v3292_v54  ;;  %v5619_v26 = vpop.permute.xlu0 %5618  ;;  %v7088_v32 = vpop.permute.xlu1 %5633  ;;  %v3442_v50 = vsel %vm307_vm6, %v5566_v30, %v5605_v45  ;;  %v4681_v44 = vpack.c.bf16 %v3443_v34, %v3441_v19  ;;  %vm7308_vm9 = vmmov %vm7300_vm0 }
 0x968   :  { %v5621_v37 = vunpack.i.h.bf16 %v5619_v26  ;;  %v5620_v57 = vunpack.i.l.bf16 %v5619_v26  ;;  %v5616_v54 = vunpack.i.h.bf16 %v7077_v23  ;;  %v5615_v55 = vunpack.i.l.bf16 %v7077_v23 }
 0x969   :  { %4669 = vmatprep.subr.msk.bf16.mxu1 %vm6033_vm3, %v4667_v56  ;;  %v5570_v56 = vunpack.i.l.bf16 %v7063_v29  ;;  %v5590_v23 = vunpack.i.l.bf16 %v7071_v1  ;;  %v5635_v29 = vunpack.i.l.bf16 %v7088_v32 }
 0x96a   :  { %4672 = vmatpush1.bf16.msk.msra.mxu1 %vm6040_vm4, %v4670_v0  ;;  %v3372_v18 = vsel %vm222_vm5, %v5560_v35, %v5620_v57  ;;  %v3373_v31 = vsel %vm222_vm5, %v5620_v57, %v5621_v37  ;;  %v3440_v0 = vsel %vm307_vm6, %v5565_v42, %v5585_v48  ;;  %v3523_v45 = vsel %vm388_vm11, %v5615_v55, %v5616_v54 }
 0x96b   :  { %v5624_v8 = vpop.permute.xlu0 %5623  ;;  %v5649_v9 = vpop.permute.xlu1 %5648  ;;  %4674 = vmatprep.subr.bf16.mxu1 %v4673_v53  ;;  %v4684_v59 = vpack.c.bf16 %v3442_v50, %v3440_v0  ;;  %v5636_v53 = vunpack.i.h.bf16 %v7088_v32  ;;  %v3520_v48 = vsel %vm388_vm11, %v5635_v29, %v5590_v23 }
 0x96c   :  { %v5651_v51 = vunpack.i.h.bf16 %v5649_v9  ;;  %v5650_v49 = vunpack.i.l.bf16 %v5649_v9  ;;  %v5626_v7 = vunpack.i.h.bf16 %v5624_v8  ;;  %v5625_v11 = vunpack.i.l.bf16 %v5624_v8 }
 0x96d   :  { %v3521_v9 = vsel %vm388_vm11, %v5590_v23, %v5591_v33  ;;  %v3522_v32 = vsel %vm388_vm11, %v5636_v53, %v5615_v55 }
 0x96e   :  { %v3374_v14 = vsel %vm222_vm5, %v5561_v41, %v5650_v49  ;;  %4676 = vmatpush1.bf16.msra.mxu1 %v4675_v38  ;;  %v3375_v25 = vsel %vm222_vm5, %v5650_v49, %v5651_v51  ;;  %v3444_v37 = vsel %vm307_vm6, %v5570_v56, %v5625_v11  ;;  %v3445_v57 = vsel %vm307_vm6, %v5625_v11, %v5626_v7  ;;  %vm7301_vm5 = vmmov %vm7300_vm0 }
 0x96f   :  { %v4679_v6 = vpack.c.bf16 %v3374_v14, %v3372_v18  ;;  %v5639_v16 = vpop.permute.xlu0 %5638  ;;  %v7109_v39 = vpop.permute.xlu1 %5653  ;;  %v4677_v62 = vpack.c.bf16 %v3375_v25, %v3373_v31  ;;  %v4693_v38 = vpack.c.bf16 %v3523_v45, %v3521_v9  ;;  %v4696_v31 = vpack.c.bf16 %v3522_v32, %v3520_v48 }
 0x970   :  { %v5641_v51 = vunpack.i.h.bf16 %v5639_v16  ;;  %v5640_v49 = vunpack.i.l.bf16 %v5639_v16  ;;  %v5655_v56 = vunpack.i.l.bf16 %v7109_v39 }
 0x971   :  { %4678 = vmatprep.subr.bf16.mxu1 %v4677_v62 }
 0x972   :  { %4680 = vmatpush1.bf16.msra.mxu1 %v4679_v6  ;;  %v3525_v62 = vsel %vm388_vm11, %v5640_v49, %v5641_v51 }
 0x973   :  { %v5644_v26 = vpop.permute.xlu0 %5643  ;;  %v5664_v58 = vpop.permute.xlu1 %5663  ;;  %4683 = vmatprep.subr.msk.bf16.mxu1 %vm6068_vm8, %v4681_v44 }
 0x974   :  { %v5666_v28 = vunpack.i.h.bf16 %v5664_v58  ;;  %v5665_v20 = vunpack.i.l.bf16 %v5664_v58  ;;  %v5645_v34 = vunpack.i.l.bf16 %v5644_v26  ;;  %v5646_v25 = vunpack.i.h.bf16 %v5644_v26 }
 0x976   :  { %v3446_v41 = vsel %vm307_vm6, %v5571_v12, %v5665_v20  ;;  %v3447_v35 = vsel %vm307_vm6, %v5665_v20, %v5666_v28  ;;  %4686 = vmatpush1.bf16.msk.msra.mxu1 %vm6076_vm10, %v4684_v59  ;;  %v3524_v42 = vsel %vm388_vm11, %v5645_v34, %v5640_v49  ;;  %v5656_v12 = vunpack.i.h.bf16 %v7109_v39  ;;  %vm7302_vm6 = vmmov %vm7300_vm0 }
 0x977   :  { %v4687_v1 = vpack.c.bf16 %v3447_v35, %v3445_v57  ;;  %v4690_v15 = vpack.c.bf16 %v3446_v41, %v3444_v37  ;;  %v5659_v4 = vpop.permute.xlu0 %5658  ;;  %v5669_v8 = vpop.permute.xlu1 %5668 }
 0x978   :  { %v5661_v7 = vunpack.i.h.bf16 %v5659_v4  ;;  %v5660_v11 = vunpack.i.l.bf16 %v5659_v4  ;;  %v5671_v26 = vunpack.i.h.bf16 %v5669_v8  ;;  %v5670_v58 = vunpack.i.l.bf16 %v5669_v8 }
 0x979   :  { %4689 = vmatprep.subr.msk.bf16.mxu1 %vm6068_vm8, %v4687_v1  ;;  %v3617_v23 = vsel %vm485_vm12, %v5655_v56, %v5656_v12 }
 0x97a   :  { %4692 = vmatpush1.bf16.msk.msra.mxu1 %vm6076_vm10, %v4690_v15  ;;  %v3619_v59 = vsel %vm485_vm12, %v5660_v11, %v5661_v7  ;;  %v3618_v61 = vsel %vm485_vm12, %v5671_v26, %v5660_v11 }
 0x97b   :  { %v5674_v18 = vpop.permute.xlu0 %5673  ;;  %v5679_v14 = vpop.permute.xlu1 %5678  ;;  %4695 = vmatprep.subr.msk.bf16.mxu1 %vm6033_vm3, %v4693_v38  ;;  %v4713_v10 = vpack.c.bf16 %v3619_v59, %v3617_v23 }
 0x97c   :  { %v5681_v30 = vunpack.i.h.bf16 %v5679_v14  ;;  %v5680_v6 = vunpack.i.l.bf16 %v5679_v14  ;;  %v5676_v13 = vunpack.i.h.bf16 %v5674_v18 }
 0x97e   :  { %v3526_v19 = vsel %vm388_vm11, %v5646_v25, %v5680_v6  ;;  %v3527_v16 = vsel %vm388_vm11, %v5680_v6, %v5681_v30  ;;  %4698 = vmatpush1.bf16.msk.msra.mxu1 %vm6040_vm4, %v4696_v31  ;;  %vm7303_vm11 = vmmov %vm7300_vm0 }
 0x97f   :  { %v4699_v50 = vpack.c.bf16 %v3527_v16, %v3525_v62  ;;  %v4702_v44 = vpack.c.bf16 %v3526_v19, %v3524_v42  ;;  %v5689_v54 = vpop.permute.xlu0 %5688  ;;  %v5684_v55 = vpop.permute.xlu1 %5683 }
 0x980   :  { %v5691_v20 = vunpack.i.h.bf16 %v5689_v54  ;;  %v5690_v45 = vunpack.i.l.bf16 %v5689_v54  ;;  %v5686_v53 = vunpack.i.h.bf16 %v5684_v55  ;;  %v5685_v3 = vunpack.i.l.bf16 %v5684_v55 }
 0x981   :  { %4701 = vmatprep.subr.msk.bf16.mxu1 %vm6033_vm3, %v4699_v50 }
 0x982   :  { %4704 = vmatpush1.bf16.msk.msra.mxu1 %vm6040_vm4, %v4702_v44  ;;  %v3699_v15 = vsel %vm566_vm13, %v5690_v45, %v5691_v20  ;;  %v3697_v4 = vsel %vm566_vm13, %v5685_v3, %v5686_v53 }
 0x983   :  { %v7153_v0 = vpop.permute.xlu0 %5698  ;;  %v5694_v33 = vpop.permute.xlu1 %5693  ;;  %4706 = vmatprep.subr.bf16.mxu1 %v4705_v2  ;;  %v3616_v2 = vsel %vm485_vm12, %v5670_v58, %v5655_v56  ;;  %v4725_v51 = vpack.c.bf16 %v3699_v15, %v3697_v4 }
 0x984   :  { %v4716_v29 = vpack.c.bf16 %v3618_v61, %v3616_v2  ;;  %v5696_v37 = vunpack.i.h.bf16 %v5694_v33  ;;  %v5695_v57 = vunpack.i.l.bf16 %v5694_v33  ;;  %v5701_v30 = vunpack.i.h.bf16 %v7153_v0 }
 0x985   :  { %v5700_v6 = vunpack.i.l.bf16 %v7153_v0 }
 0x986   :  { %4708 = vmatpush1.bf16.msra.mxu1 %v4707_v5  ;;  %v5675_v5 = vunpack.i.l.bf16 %v5674_v18  ;;  %v3698_v49 = vsel %vm566_vm13, %v5696_v37, %v5690_v45  ;;  %v3696_v34 = vsel %vm566_vm13, %v5695_v57, %v5685_v3 }
 0x987   :  { %v7163_v28 = vpop.permute.xlu0 %5708  ;;  %v7165_v39 = vpop.permute.xlu1 %5703  ;;  %4710 = vmatprep.subr.bf16.mxu1 %v4709_v43  ;;  %v4728_v62 = vpack.c.bf16 %v3698_v49, %v3696_v34  ;;  %v3701_v56 = vsel %vm566_vm13, %v5700_v6, %v5701_v30 }
 0x988   :  { %v3621_v8 = vsel %vm485_vm12, %v5675_v5, %v5676_v13  ;;  %v5711_v18 = vunpack.i.h.bf16 %v7163_v28  ;;  %v5710_v14 = vunpack.i.l.bf16 %v7163_v28  ;;  %v5706_v31 = vunpack.i.h.bf16 %v7165_v39 }
 0x989   :  { %v5705_v25 = vunpack.i.l.bf16 %v7165_v39 }
 0x98a   :  { %4712 = vmatpush1.bf16.msra.mxu1 %v4711_v24  ;;  %v3779_v12 = vsel %vm7301_vm5, %v5710_v14, %v5711_v18 }
 0x98b   :  { %v5724_v40 = vpop.permute.xlu0 %5723  ;;  %v5714_v22 = vpop.permute.xlu1 %5713  ;;  %4715 = vmatprep.subr.msk.bf16.mxu1 %vm6068_vm8, %v4713_v10  ;;  %v3777_v11 = vsel %vm7300_vm0, %v5705_v25, %v5706_v31 }
 0x98c   :  { %v5726_v43 = vunpack.i.h.bf16 %v5724_v40  ;;  %v5725_v41 = vunpack.i.l.bf16 %v5724_v40  ;;  %v5716_v35 = vunpack.i.h.bf16 %v5714_v22  ;;  %v5715_v1 = vunpack.i.l.bf16 %v5714_v22 }
 0x98d   :  { %v4737_v61 = vpack.c.bf16 %v3779_v12, %v3777_v11 }
 0x98e   :  { %v3620_v60 = vsel %vm485_vm12, %v5725_v41, %v5675_v5  ;;  %v3622_v21 = vsel %vm485_vm12, %v5726_v43, %v5715_v1  ;;  %v3623_v24 = vsel %vm485_vm12, %v5715_v1, %v5716_v35  ;;  %4718 = vmatpush1.bf16.msk.msra.mxu1 %vm6076_vm10, %v4716_v29  ;;  %vm7304_vm12 = vcmask 908288  }
 0x98f   :  { %v4719_v9 = vpack.c.bf16 %v3623_v24, %v3621_v8  ;;  %v4722_v38 = vpack.c.bf16 %v3622_v21, %v3620_v60  ;;  %v5729_v32 = vpop.permute.xlu0 %5728  ;;  %v5719_v48 = vpop.permute.xlu1 %5718  ;;  %vm7306_vm1 = vmmov %vm7304_vm12 }
 0x990   :  { %v5721_v42 = vunpack.i.h.bf16 %v5719_v48  ;;  %v5720_v19 = vunpack.i.l.bf16 %v5719_v48  ;;  %v5731_v2 = vunpack.i.h.bf16 %v5729_v32  ;;  %v5730_v20 = vunpack.i.l.bf16 %v5729_v32  ;;  %vm7310_vm2 = vmmov %vm7306_vm1 }
 0x991   :  { %4721 = vmatprep.subr.msk.bf16.mxu1 %vm6068_vm8, %v4719_v9  ;;  %vm7311_vm7 = vmmov %vm7306_vm1 }
 0x992   :  { %4724 = vmatpush1.bf16.msk.msra.mxu1 %vm6076_vm10, %v4722_v38  ;;  %v3778_v39 = vsel %vm7302_vm6, %v5721_v42, %v5710_v14  ;;  %v3776_v10 = vsel %vm7303_vm11, %v5720_v19, %v5705_v25  ;;  %vm7312_vm14 = vmmov %vm7306_vm1  ;;  %vm7316_vm6 = vcmask 261120   ;;  %vm4122_vm11 = vcmask 1041408  }
 0x993   :  { %v5744_v16 = vpop.permute.xlu0 %5743  ;;  %v5734_v50 = vpop.permute.xlu1 %5733  ;;  %4727 = vmatprep.subr.msk.bf16.mxu1 %vm6033_vm3, %v4725_v51  ;;  %v4739_v5 = vpack.c.bf16 %v3778_v39, %v3776_v10  ;;  %vm7313_vm15 = vmmov %vm7306_vm1 }
 0x994   :  { %v5746_v44 = vunpack.i.h.bf16 %v5744_v16  ;;  %v5745_v54 = vunpack.i.l.bf16 %v5744_v16  ;;  %v5736_v55 = vunpack.i.h.bf16 %v5734_v50  ;;  %v5735_v7 = vunpack.i.l.bf16 %v5734_v50 }
 0x996   :  { %v3700_v0 = vsel %vm566_vm13, %v5745_v54, %v5700_v6  ;;  %v3702_v33 = vsel %vm566_vm13, %v5746_v44, %v5735_v7  ;;  %v3703_v26 = vsel %vm566_vm13, %v5735_v7, %v5736_v55  ;;  %4730 = vmatpush1.bf16.msk.msra.mxu1 %vm6040_vm4, %v4728_v62  ;;  %vm7305_vm13 = vmmov %vm7300_vm0 }
 0x997   :  { %v4731_v58 = vpack.c.bf16 %v3703_v26, %v3701_v56  ;;  %v4734_v59 = vpack.c.bf16 %v3702_v33, %v3700_v0  ;;  %v5749_v23 = vpop.permute.xlu0 %5748  ;;  %v5739_v28 = vpop.permute.xlu1 %5738  ;;  %v3781_v35 = vsel %vm7305_vm13, %v5730_v20, %v5731_v2 }
 0x998   :  { %v5751_v45 = vunpack.i.h.bf16 %v5749_v23  ;;  %v5750_v53 = vunpack.i.l.bf16 %v5749_v23  ;;  %v5741_v3 = vunpack.i.h.bf16 %v5739_v28  ;;  %v5740_v13 = vunpack.i.l.bf16 %v5739_v28 }
 0x999   :  { %4733 = vmatprep.subr.msk.bf16.mxu1 %vm6033_vm3, %v4731_v58  ;;  %vm7307_vm3 = vmmov %vm7300_vm0 }
 0x99a   :  { %4736 = vmatpush1.bf16.msk.msra.mxu1 %vm6040_vm4, %v4734_v59  ;;  %v3851_v41 = vsel %vm7304_vm12, %v5750_v53, %v5751_v45  ;;  %v3849_v47 = vsel %vm7306_vm1, %v5740_v13, %v5741_v3  ;;  %vm7309_vm4 = vmmov %vm7300_vm0 }
 0x99b   :  { %v5764_v29 = vpop.permute.xlu0 %5763  ;;  %v5754_v37 = vpop.permute.xlu1 %5753  ;;  %4738 = vmatprep.subr.bf16.mxu1 %v4737_v61  ;;  %v4745_v38 = vpack.c.bf16 %v3851_v41, %v3849_v47  ;;  %vm7314_vm0 = vmmov %vm7306_vm1 }
 0x99c   :  { %v5766_v57 = vunpack.i.h.bf16 %v5764_v29  ;;  %v5765_v40 = vunpack.i.l.bf16 %v5764_v29  ;;  %v5756_v22 = vunpack.i.h.bf16 %v5754_v37  ;;  %v5755_v43 = vunpack.i.l.bf16 %v5754_v37  ;;  %vm7315_vm5 = vmmov %vm7314_vm0 }
 0x99e   :  { %v3780_v1 = vsel %vm7307_vm3, %v5765_v40, %v5730_v20  ;;  %v3782_v15 = vsel %vm7308_vm9, %v5766_v57, %v5755_v43  ;;  %4740 = vmatpush1.bf16.msra.mxu1 %v4739_v5  ;;  %v3783_v52 = vsel %vm7309_vm4, %v5755_v43, %v5756_v22 }
 0x99f   :  { %v4743_v4 = vpack.c.bf16 %v3782_v15, %v3780_v1  ;;  %v5769_v8 = vpop.permute.xlu0 %5768  ;;  %v5759_v60 = vpop.permute.xlu1 %5758  ;;  %v4741_v21 = vpack.c.bf16 %v3783_v52, %v3781_v35 }
 0x9a0   :  { %v5761_v24 = vunpack.i.h.bf16 %v5759_v60  ;;  %v5760_v9 = vunpack.i.l.bf16 %v5759_v60  ;;  %v5771_v32 = vunpack.i.h.bf16 %v5769_v8  ;;  %v5770_v48 = vunpack.i.l.bf16 %v5769_v8 }
 0x9a1   :  { %4742 = vmatprep.subr.bf16.mxu1 %v4741_v21 }
 0x9a2   :  { %v3850_v51 = vsel %vm7310_vm2, %v5761_v24, %v5750_v53  ;;  %v3848_v49 = vsel %vm7311_vm7, %v5760_v9, %v5740_v13  ;;  %4744 = vmatpush1.bf16.msra.mxu1 %v4743_v4  ;;  %v3853_v62 = vsel %vm7312_vm14, %v5770_v48, %v5771_v32 }
 0x9a3   :  { %v4748_v34 = vpack.c.bf16 %v3850_v51, %v3848_v49  ;;  %v5779_v18 = vpop.permute.xlu0 %5778  ;;  %v5774_v14 = vpop.permute.xlu1 %5773  ;;  %4747 = vmatprep.subr.msk.bf16.mxu1 %vm6068_vm8, %v4745_v38 }
 0x9a4   :  { %v5781_v31 = vunpack.i.h.bf16 %v5779_v18  ;;  %v5780_v25 = vunpack.i.l.bf16 %v5779_v18  ;;  %v5776_v30 = vunpack.i.h.bf16 %v5774_v14  ;;  %v5775_v6 = vunpack.i.l.bf16 %v5774_v14 }
 0x9a5   :  { %4045 = vmatmul.mubr.f32.vlgmr.msra.gmra.mrb[16].mxu1 %v7044_v27 }
 0x9a6   :  { %v3852_v42 = vsel %vm7313_vm15, %v5780_v25, %v5770_v48  ;;  %v3854_v19 = vsel %vm7314_vm0, %v5781_v31, %v5775_v6  ;;  %v3855_v16 = vsel %vm7315_vm5, %v5775_v6, %v5776_v30  ;;  %4750 = vmatpush1.bf16.msk.msra.mxu1 %vm6076_vm10, %v4748_v34  ;;  %4115 = vmatprep.mubr.f32.mxu1 %v6880_v63 }
 0x9a7   :  { %v4751_v50 = vpack.c.bf16 %v3855_v16, %v3853_v62  ;;  %v4754_v44 = vpack.c.bf16 %v3854_v19, %v3852_v42 }
 0x9a9   :  { %4753 = vmatprep.subr.msk.bf16.mxu1 %vm6068_vm8, %v4751_v50 }
 0x9aa   :  { %4756 = vmatpush1.bf16.msk.msra.mxu1 %vm6076_vm10, %v4754_v44 }
 0x9ad   :  { %4179 = vmatmul.mubr.msk.f32.vlgmr.msra.gmra.mrb[16].mxu1 %vm7316_vm6, %v7052_v17 }
 0x9b4   :  { %v3957_v27 = vpop.permute.xlu1 %3956 }
 0xa80   :  { %v4117_v54 = vpop.f32.mrb[16].mxu1 }
 0xa81   :  { %v4789_v55 = vadd.f32 %v4117_v54, %v3957_v27  ;;  %v4119_v7 = vpop.f32.mrb[17].mxu1 }
 0xa82   :  { %v4790_v11 = vadd.f32 %v4119_v7, %v3957_v27 }
 0xa83   :  { %v4123_v12 = vsel %vm4122_vm11, %v4789_v55, 0.0 }
 0xa84   :  { %v4124_v56 = vsel %vm4122_vm11, %v4790_v11, 0.0 }
 0xa85   :  { %v4125_v63 = vadd.f32 %v4124_v56, %v4123_v12 }
 0xa87   :  { %4126 = vadd.xlane.f32.xlu0 %v4125_v63 }
 0xb14   :  { %v4127_v0 = vpop.xlane.xlu0 %4126 }
 0xb15   :  { %v4128_v33 = vmul.f32 0.00390625, %v4127_v0 }
 0xb17   :  { %v4129_v36 = vsub.f32 %v4789_v55, %v4128_v33  ;;  %v4130_v26 = vsub.f32 %v4790_v11, %v4128_v33 }
 0xb19   :  { %v4131_v58 = vmul.f32 %v4129_v36, %v4129_v36  ;;  %v4132_v46 = vmul.f32 %v4130_v26, %v4130_v26 }
 0xb1b   :  { %v4133_v59 = vsel %vm4122_vm11, %v4131_v58, 0.0  ;;  %v4134_v23 = vsel %vm4122_vm11, %v4132_v46, 0.0 }
 0xb1c   :  { %v4135_v28 = vadd.f32 %v4134_v23, %v4133_v59 }
 0xb1e   :  { %4136 = vadd.xlane.f32.xlu1 %v4135_v28 }
 0xbab   :  { %v4137_v17 = vpop.xlane.xlu1 %4136 }
 0xbac   :  { %v4138_v39 = vmul.f32 0.003921569, %v4137_v17 }
 0xbae   :  { %5832 = vrsqrt.f32 %v4138_v39  ;;  %vm4141_vm8 = vcmp.eq.f32.partialorder %v4138_v39, inf  ;;  %v4144_v2 = vand.u32 2147483648, %v4138_v39  ;;  %vm4143_vm10 = vcmp.eq.f32.partialorder %v4138_v39, 0.0 }
 0xbb8   :  { %v5833_v10 = vpop.eup %5832 }
 0xbb9   :  { %v4140_v61 = vmul.f32 %v5833_v10, %v4138_v39 }
 0xbbb   :  { %v4142_v20 = vsel %vm4141_vm8, %v4138_v39, %v4140_v61 }
 0xbbc   :  { %v4145_v45 = vsel %vm4143_vm10, %v4144_v2, %v4142_v20 }
 0xbbd   :  { %v4146_v53 = vadd.f32 1e-07, %v4145_v45 }
 0xbbf   :  { %5834 = vrcp.f32 %v4146_v53 }
 0xbc9   :  { %v5835_v3 = vpop.eup %5834 }
 0xbca   :  { %v4149_v13 = vmul.f32 %v5835_v3, %v4129_v36  ;;  %v4150_v5 = vmul.f32 %v5835_v3, %v4130_v26 }
 0xbcc   :  { %v4153_v29 = vcombine.low %v4149_v13, %v4150_v5 }
 0xbce   :  { %4180 = vst.sshfl [vmem:[%s7249_s9] sm:$0x33 pattern:$0x76325410] %v4153_v29 }

</bundles_post_ra>
